<compile_context>
chip_gen: v7x
topology: tpu7x:2x2x1
jax: 0.10.0
libtpu: 0.0.40
codegen_flags: <defaults>
</compile_context>

<pallas_src>
import functools

import jax
import jax.numpy as jnp
from jax.experimental import pallas as pl
from jax.experimental.pallas import tpu as pltpu


# ----------------------------------------------------------------------------- kernel

def _decoder_kernel(ids_ref,                       # (K*Bp, 1) int32 token ids (VMEM)
                    emb_ref, h0_ref, enc_ref, enct_ref,
                    wih_ref, whh_ref, bih_ref, bhh_ref,
                    wc_ref, bc_ref, wo_ref, bo_ref,
                    out_ref, hid_ref,
                    *, steps):
    t = pl.program_id(0)
    Bp, Hp = h0_ref.shape
    Vtab = emb_ref.shape[0]

    # Initialize the hidden-state carry (output block has a constant index map, so it
    # stays VMEM-resident across grid steps -- accumulator pattern).
    @pl.when(t == 0)
    def _():
        hid_ref[...] = h0_ref[...]

    # Hoist grid-invariant loads out of the unrolled step loop.
    emb = emb_ref[...]                               # (Vtab, Hp)
    enc = enc_ref[...]                               # (Bp, L, Hp)
    enct = enct_ref[...]                             # (Bp, Hp, L)
    wih = wih_ref[...]
    whh = whh_ref[...]
    bih = bih_ref[...]
    bhh = bhh_ref[...]
    wc_h = wc_ref[0:Hp, :]
    wc_c = wc_ref[Hp:2 * Hp, :]
    bc = bc_ref[...]
    wo = wo_ref[...]
    bo = bo_ref[...]                                 # padded vocab columns hold -1e30
    col_iota = jax.lax.broadcasted_iota(jnp.int32, (Bp, Vtab), 1)

    def step(k, h):
        # ---- embedding gather as a one-hot MXU matmul (vectorized, no OOB hazard) ----
        row0 = pl.multiple_of(k * Bp, Bp)
        ids_col = ids_ref[pl.ds(row0, Bp), :]                              # (Bp, 1)
        onehot = (col_iota == ids_col).astype(emb.dtype)                   # (Bp, Vtab)
        x = jnp.dot(onehot, emb, preferred_element_type=jnp.float32)       # (Bp, Hp)
        # TODO(synk): embedding_dropout (p=0.1) skipped -- identity in eval mode.

        # ---- single-step GRU (PyTorch gate order: r, z, n) ----
        gi = jnp.dot(x, wih, preferred_element_type=jnp.float32) + bih
        gh = jnp.dot(h, whh, preferred_element_type=jnp.float32) + bhh
        r = jax.nn.sigmoid(gi[:, 0:Hp] + gh[:, 0:Hp])
        z = jax.nn.sigmoid(gi[:, Hp:2 * Hp] + gh[:, Hp:2 * Hp])
        n = jnp.tanh(gi[:, 2 * Hp:3 * Hp] + r * gh[:, 2 * Hp:3 * Hp])
        h_new = (1.0 - z) * n + z * h                                      # (Bp, Hp)

        # ---- dot attention; scores via pre-transposed enc_t (plain MXU matmul) ----
        scores = jnp.einsum('bqh,bhl->bql', h_new[:, None, :], enct,
                            preferred_element_type=jnp.float32)            # (Bp, 1, L)
        m = jnp.max(scores, axis=-1, keepdims=True)
        e = jnp.exp(scores - m)
        attn = e * pl.reciprocal(jnp.sum(e, axis=-1, keepdims=True), approx=True)
        context = jnp.einsum('bql,blh->bqh', attn, enc,
                             preferred_element_type=jnp.float32)[:, 0, :]  # (Bp, Hp)

        # ---- concat Linear (2H -> H) + tanh, as split matmuls ----
        co = jnp.tanh(
            jnp.dot(h_new, wc_h, preferred_element_type=jnp.float32)
            + jnp.dot(context, wc_c, preferred_element_type=jnp.float32)
            + bc)                                                           # (Bp, Hp)

        # ---- output Linear (H -> V) + softmax (mask baked into bo; exact divide) ----
        logits = jnp.dot(co.astype(wo.dtype), wo,
                         preferred_element_type=jnp.float32) + bo
        lm = jnp.max(logits, axis=-1, keepdims=True)
        le = jnp.exp(logits - lm)
        out_ref[k, :, :] = le / jnp.sum(le, axis=-1, keepdims=True)

        return h_new

    hid_ref[...] = jax.lax.fori_loop(0, steps, step, hid_ref[...], unroll=True)


# ----------------------------------------------------------------------------- wrappers

def _round_up(x, m):
    return ((x + m - 1) // m) * m


def _pad_to(x, shape):
    return jnp.pad(x, [(0, s - d) for d, s in zip(x.shape, shape)])


def prepare_params(params, big_weights_dtype=jnp.float32):
    """Pad weights once to lane/sublane-aligned shapes; bake the vocab mask into b_out.

    big_weights_dtype: storage dtype for the two dominant tensors (emb_table, w_out);
    bf16 halves their VMEM/HBM footprint at realistic sizes (accumulation stays f32).
    """
    Vtab, H = params["emb_table"].shape
    V = params["w_out"].shape[1]
    # v6e/v7x MXUs are 256 wide; pad H to 256 granularity unless H is genuinely tiny.
    Hp = _round_up(H, 128) if H <= 128 else _round_up(H, 256)
    Vp = _round_up(V, 128)
    Vtab_p = _round_up(Vtab, 8)

    def pad_gru_w(w):   # (H, 3H) -> (Hp, 3Hp), gate blocks padded independently
        return jnp.concatenate(
            [_pad_to(w[:, i * H:(i + 1) * H], (Hp, Hp)) for i in range(3)], axis=1)

    def pad_gru_b(b):   # (1, 3H) -> (1, 3Hp); padded columns MUST stay zero
        return jnp.concatenate(
            [_pad_to(b[:, i * H:(i + 1) * H], (1, Hp)) for i in range(3)], axis=1)

    wc = params["w_concat"]
    wc_p = jnp.concatenate([_pad_to(wc[:H], (Hp, Hp)), _pad_to(wc[H:], (Hp, Hp))], axis=0)

    # Bake the vocab mask: padded logit columns get -1e30 through the bias (padded
    # w_out columns are zero).  b_out stays f32 so -1e30 remains finite.
    b_out_p = jnp.pad(params["b_out"].astype(jnp.float32),
                      ((0, 0), (0, Vp - V)), constant_values=-1e30)

    return {
        "H": H, "V": V, "Hp": Hp, "Vp": Vp,
        "emb_table": _pad_to(params["emb_table"], (Vtab_p, Hp)).astype(big_weights_dtype),
        "w_ih": pad_gru_w(params["w_ih"]), "w_hh": pad_gru_w(params["w_hh"]),
        "b_ih": pad_gru_b(params["b_ih"]), "b_hh": pad_gru_b(params["b_hh"]),
        "w_concat": wc_p, "b_concat": _pad_to(params["b_concat"], (1, Hp)),
        "w_out": _pad_to(params["w_out"], (Hp, Vp)).astype(big_weights_dtype),
        "b_out": b_out_p,
    }


def luong_attn_decode(pp, input_steps, last_hidden, encoder_outputs, steps_per_block=4):
    """Run T decoder steps (teacher-forced token ids) in a single pallas_call.

    input_steps: (T, B) int32; last_hidden: (1, B, H); encoder_outputs: (L, B, H).
    Returns: probs (T, B, V), final hidden (1, B, H).
    """
    T, B = input_steps.shape
    L = encoder_outputs.shape[0]
    H, V, Hp, Vp = pp["H"], pp["V"], pp["Hp"], pp["Vp"]
    Vtab = pp["emb_table"].shape[0]
    Bp = _round_up(max(B, 8), 8)             # full f32 sublane: no masked partial stores
    K = next(k for k in range(min(steps_per_block, T), 0, -1) if T % k == 0)

    h0 = _pad_to(last_hidden[0].astype(jnp.float32), (Bp, Hp))                # (Bp, Hp)
    enc = _pad_to(jnp.transpose(encoder_outputs, (1, 0, 2)).astype(jnp.float32),
                  (Bp, L, Hp))                                                # (Bp, L, Hp)
    enct = jnp.transpose(enc, (0, 2, 1))                                      # (Bp, Hp, L)
    ids = _pad_to(input_steps.astype(jnp.int32), (T, Bp)).reshape(T * Bp, 1)  # (T*Bp, 1)

    args = (ids, pp["emb_table"], h0, enc, enct,
            pp["w_ih"], pp["w_hh"], pp["b_ih"], pp["b_hh"],
            pp["w_concat"], pp["b_concat"], pp["w_out"], pp["b_out"])

    # Explicit scoped-VMEM budget: resident (grid-invariant) operands + pipelined blocks,
    # clamped to physical VMEM (64 MiB on v7x, 128 MiB on v5e/v6e).
    nbytes = lambda a: a.size * a.dtype.itemsize
    resident = sum(nbytes(a) for a in args[1:])
    pipelined = 2 * (K * Bp * 4 + K * Bp * Vp * 4 + Bp * Hp * 4)
    try:
        phys_vmem = pltpu.get_tpu_info().vmem_capacity_bytes
    except Exception:
        phys_vmem = 128 * 1024 * 1024
    vmem_limit = int(min(0.9 * phys_vmem,
                         max(32 << 20, 2 * resident + pipelined + (4 << 20))))

    def build(single_buffer):
        const = dict(pipeline_mode=pl.Buffered(1)) if single_buffer else {}
        c2 = lambda t: (0, 0)
        c3 = lambda t: (0, 0, 0)
        return pl.pallas_call(
            functools.partial(_decoder_kernel, steps=K),
            out_shape=(jax.ShapeDtypeStruct((T, Bp, Vp), jnp.float32),
                       jax.ShapeDtypeStruct((Bp, Hp), jnp.float32)),
            grid=(T // K,),
            in_specs=[
                pl.BlockSpec((K * Bp, 1), lambda t: (t, 0)),        # token ids (per block)
                pl.BlockSpec((Vtab, Hp), c2, **const),              # embedding table
                pl.BlockSpec((Bp, Hp), c2, **const),                # h0
                pl.BlockSpec((Bp, L, Hp), c3, **const),             # encoder outputs
                pl.BlockSpec((Bp, Hp, L), c3, **const),             # encoder outputs^T
                pl.BlockSpec((Hp, 3 * Hp), c2, **const),            # w_ih
                pl.BlockSpec((Hp, 3 * Hp), c2, **const),            # w_hh
                pl.BlockSpec((1, 3 * Hp), c2, **const),             # b_ih
                pl.BlockSpec((1, 3 * Hp), c2, **const),             # b_hh
                pl.BlockSpec((2 * Hp, Hp), c2, **const),            # w_concat
                pl.BlockSpec((1, Hp), c2, **const),                 # b_concat
                pl.BlockSpec((Hp, Vp), c2, **const),                # w_out
                pl.BlockSpec((1, Vp), c2, **const),                 # b_out (masked pad)
            ],
            out_specs=(
                pl.BlockSpec((K, Bp, Vp), lambda t: (t, 0, 0)),     # per-step probs
                pl.BlockSpec((Bp, Hp), c2),                         # hidden carry / final
            ),
            compiler_params=pltpu.CompilerParams(
                dimension_semantics=("arbitrary",),
                vmem_limit_bytes=vmem_limit),
        )

    try:
        out_p, hid_p = build(single_buffer=True)(*args)
    except Exception:
        # Fallback if this JAX build rejects Buffered(1) on grid-invariant inputs.
        out_p, hid_p = build(single_buffer=False)(*args)

    # TODO(synk): on v7x at real vocab sizes, DMA-gather embedding rows from HBM
    # (memory_space=pl.ANY) instead of keeping the table VMEM-resident.
    return out_p[:, :B, :V], hid_p[None, :B, :H]


def luong_attn_decoder_forward(pp, input_step, last_hidden, encoder_outputs):
    """Single decode step == the PyTorch module's forward. input_step: (1, B)."""
    probs, hidden = luong_attn_decode(pp, input_step, last_hidden, encoder_outputs)
    return probs[0], hidden


# ----------------------------------------------------------------------------- reference

def reference_forward(params, input_step, last_hidden, encoder_outputs):
    """Plain-JAX reference mirroring the PyTorch forward exactly (unpadded, f32)."""
    H = params["emb_table"].shape[1]
    x = jnp.take(params["emb_table"], input_step[0], axis=0)
    h = last_hidden[0]
    gi = x @ params["w_ih"] + params["b_ih"]
    gh = h @ params["w_hh"] + params["b_hh"]
    r = jax.nn.sigmoid(gi[:, :H] + gh[:, :H])
    z = jax.nn.sigmoid(gi[:, H:2 * H] + gh[:, H:2 * H])
    n = jnp.tanh(gi[:, 2 * H:] + r * gh[:, 2 * H:])
    h_new = (1.0 - z) * n + z * h
    scores = jnp.sum(h_new[None] * encoder_outputs, axis=2).T          # (B, L)
    attn = jax.nn.softmax(scores, axis=1)[:, None, :]                  # (B, 1, L)
    context = jnp.einsum("bql,lbh->bqh", attn, encoder_outputs)[:, 0]  # (B, H)
    cat = jnp.concatenate([h_new, context], axis=1)
    co = jnp.tanh(cat @ params["w_concat"] + params["b_concat"])
    logits = co @ params["w_out"] + params["b_out"]
    return jax.nn.softmax(logits, axis=1), h_new[None]


def make_params(key, vocab, H):
    ks = jax.random.split(key, 8)
    s = 0.1
    return {
        "emb_table": jax.random.normal(ks[0], (vocab, H), jnp.float32) * s,
        "w_ih": jax.random.normal(ks[1], (H, 3 * H), jnp.float32) * s,
        "w_hh": jax.random.normal(ks[2], (H, 3 * H), jnp.float32) * s,
        "b_ih": jax.random.normal(ks[3], (1, 3 * H), jnp.float32) * s,
        "b_hh": jax.random.normal(ks[4], (1, 3 * H), jnp.float32) * s,
        "w_concat": jax.random.normal(ks[5], (2 * H, H), jnp.float32) * s,
        "b_concat": jnp.zeros((1, H), jnp.float32),
        "w_out": jax.random.normal(ks[6], (H, vocab), jnp.float32) * s,
        "b_out": jnp.zeros((1, vocab), jnp.float32),
    }


if __name__ == "__main__":
    B, H, L, V = 2, 32, 8, 48   # batch, hidden, encoder seq len, vocab / output_size
    T = 8                       # decode steps for the multi-step (amortized) path
    key = jax.random.PRNGKey(0)
    kp, k1, k2, k3, k4 = jax.random.split(key, 5)

    params = make_params(kp, V, H)
    pp = prepare_params(params)   # big_weights_dtype=jnp.bfloat16 halves VMEM at real sizes

    input_step = jax.random.randint(k1, (1, B), 0, V, dtype=jnp.int32)
    last_hidden = jax.random.normal(k2, (1, B, H), jnp.float32)
    encoder_outputs = jax.random.normal(k3, (L, B, H), jnp.float32)

    # --- single step (== the PyTorch module forward) ---
    out, hidden = luong_attn_decoder_forward(pp, input_step, last_hidden, encoder_outputs)
    out = jax.block_until_ready(out)
    hidden = jax.block_until_ready(hidden)

    ref_out, ref_hidden = reference_forward(params, input_step, last_hidden, encoder_outputs)
    assert out.shape == (B, V) and hidden.shape == (1, B, H)
    assert jnp.allclose(out, ref_out, atol=2e-3), float(jnp.max(jnp.abs(out - ref_out)))
    assert jnp.allclose(hidden, ref_hidden, atol=1e-4), \
        float(jnp.max(jnp.abs(hidden - ref_hidden)))

    # --- T decode steps in a single pallas_call (weights stay VMEM-resident) ---
    input_steps = jax.random.randint(k4, (T, B), 0, V, dtype=jnp.int32)
    outs, hid_T = luong_attn_decode(pp, input_steps, last_hidden, encoder_outputs)
    outs = jax.block_until_ready(outs)
    hid_T = jax.block_until_ready(hid_T)

    h = last_hidden
    ref_outs = []
    for t in range(T):
        o, h = reference_forward(params, input_steps[t:t + 1], h, encoder_outputs)
        ref_outs.append(o)
    ref_outs = jnp.stack(ref_outs, axis=0)
    assert outs.shape == (T, B, V) and hid_T.shape == (1, B, H)
    assert jnp.allclose(outs, ref_outs, atol=2e-3), float(jnp.max(jnp.abs(outs - ref_outs)))
    assert jnp.allclose(hid_T, h, atol=1e-4), float(jnp.max(jnp.abs(hid_T - h)))

    print("KERNEL_OK")
</pallas_src>

<mosaic_0001>
module attributes {stable_mosaic.version = 11 : i64} {
  func.func @_decoder_kernel(%arg0: i32, %arg1: memref<8x1xi32, #tpu.memory_space<vmem>>, %arg2: memref<48x128xf32, #tpu.memory_space<vmem>>, %arg3: memref<8x128xf32, #tpu.memory_space<vmem>>, %arg4: memref<8x8x128xf32, #tpu.memory_space<vmem>>, %arg5: memref<8x128x8xf32, #tpu.memory_space<vmem>>, %arg6: memref<128x384xf32, #tpu.memory_space<vmem>>, %arg7: memref<128x384xf32, #tpu.memory_space<vmem>>, %arg8: memref<1x384xf32, #tpu.memory_space<vmem>>, %arg9: memref<1x384xf32, #tpu.memory_space<vmem>>, %arg10: memref<256x128xf32, #tpu.memory_space<vmem>>, %arg11: memref<1x128xf32, #tpu.memory_space<vmem>>, %arg12: memref<128x128xf32, #tpu.memory_space<vmem>>, %arg13: memref<1x128xf32, #tpu.memory_space<vmem>>, %arg14: memref<1x8x128xf32, #tpu.memory_space<vmem>>, %arg15: memref<8x128xf32, #tpu.memory_space<vmem>>) attributes {dimension_semantics = [#tpu.dimension_semantics<arbitrary>], iteration_bounds = array<i64: 1>, scalar_prefetch = 0 : i64, scratch_operands = 0 : i64, tpu.core_type = #tpu.core_type<tc>, window_params = [{transform_indices = @transform_0, window_bounds = array<i64: 8, 1>}, {pipeline_mode = #tpu.pipeline_mode<synchronous>, transform_indices = @transform_1, window_bounds = array<i64: 48, 128>}, {pipeline_mode = #tpu.pipeline_mode<synchronous>, transform_indices = @transform_2, window_bounds = array<i64: 8, 128>}, {pipeline_mode = #tpu.pipeline_mode<synchronous>, transform_indices = @transform_3, window_bounds = array<i64: 8, 8, 128>}, {pipeline_mode = #tpu.pipeline_mode<synchronous>, transform_indices = @transform_4, window_bounds = array<i64: 8, 128, 8>}, {pipeline_mode = #tpu.pipeline_mode<synchronous>, transform_indices = @transform_5, window_bounds = array<i64: 128, 384>}, {pipeline_mode = #tpu.pipeline_mode<synchronous>, transform_indices = @transform_6, window_bounds = array<i64: 128, 384>}, {pipeline_mode = #tpu.pipeline_mode<synchronous>, transform_indices = @transform_7, window_bounds = array<i64: 1, 384>}, {pipeline_mode = #tpu.pipeline_mode<synchronous>, transform_indices = @transform_8, window_bounds = array<i64: 1, 384>}, {pipeline_mode = #tpu.pipeline_mode<synchronous>, transform_indices = @transform_9, window_bounds = array<i64: 256, 128>}, {pipeline_mode = #tpu.pipeline_mode<synchronous>, transform_indices = @transform_10, window_bounds = array<i64: 1, 128>}, {pipeline_mode = #tpu.pipeline_mode<synchronous>, transform_indices = @transform_11, window_bounds = array<i64: 128, 128>}, {pipeline_mode = #tpu.pipeline_mode<synchronous>, transform_indices = @transform_12, window_bounds = array<i64: 1, 128>}, {transform_indices = @transform_13, window_bounds = array<i64: 1, 8, 128>}, {pipeline_mode = #tpu.pipeline_mode<synchronous>, transform_indices = @transform_14, window_bounds = array<i64: 8, 128>}]} {
    %c0_i32 = arith.constant 0 : i32
    %0 = arith.cmpi eq, %arg0, %c0_i32 : i32
    %1 = arith.extui %0 : i1 to i32
    %c0_i32_0 = arith.constant 0 : i32
    %2 = arith.cmpi ne, %1, %c0_i32_0 : i32
    scf.if %2 {
      %c0_47 = arith.constant 0 : index
      %c0_48 = arith.constant 0 : index
      %95 = vector.load %arg3[%c0_47, %c0_48] : memref<8x128xf32, #tpu.memory_space<vmem>>, vector<8x128xf32>
      %c0_49 = arith.constant 0 : index
      %c0_50 = arith.constant 0 : index
      %96 = vector.load %arg15[%c0_49, %c0_50] : memref<8x128xf32, #tpu.memory_space<vmem>>, vector<8x128xf32>
      tpu.vector_store %arg15[%c0_49, %c0_50], %95 {strides = array<i32>} : memref<8x128xf32, #tpu.memory_space<vmem>>, vector<8x128xf32>,
    } else {
    }
    %c0 = arith.constant 0 : index
    %c0_1 = arith.constant 0 : index
    %3 = vector.load %arg2[%c0, %c0_1] : memref<48x128xf32, #tpu.memory_space<vmem>>, vector<48x128xf32>
    %c0_2 = arith.constant 0 : index
    %c0_3 = arith.constant 0 : index
    %c0_4 = arith.constant 0 : index
    %4 = vector.load %arg4[%c0_2, %c0_3, %c0_4] : memref<8x8x128xf32, #tpu.memory_space<vmem>>, vector<8x8x128xf32>
    %c0_5 = arith.constant 0 : index
    %c0_6 = arith.constant 0 : index
    %c0_7 = arith.constant 0 : index
    %5 = vector.load %arg5[%c0_5, %c0_6, %c0_7] : memref<8x128x8xf32, #tpu.memory_space<vmem>>, vector<8x128x8xf32>
    %c0_8 = arith.constant 0 : index
    %c0_9 = arith.constant 0 : index
    %6 = vector.load %arg6[%c0_8, %c0_9] : memref<128x384xf32, #tpu.memory_space<vmem>>, vector<128x384xf32>
    %c0_10 = arith.constant 0 : index
    %c0_11 = arith.constant 0 : index
    %7 = vector.load %arg7[%c0_10, %c0_11] : memref<128x384xf32, #tpu.memory_space<vmem>>, vector<128x384xf32>
    %c0_12 = arith.constant 0 : index
    %c0_13 = arith.constant 0 : index
    %8 = vector.load %arg8[%c0_12, %c0_13] : memref<1x384xf32, #tpu.memory_space<vmem>>, vector<1x384xf32>
    %c0_14 = arith.constant 0 : index
    %c0_15 = arith.constant 0 : index
    %9 = vector.load %arg9[%c0_14, %c0_15] : memref<1x384xf32, #tpu.memory_space<vmem>>, vector<1x384xf32>
    %c0_16 = arith.constant 0 : index
    %c0_17 = arith.constant 0 : index
    %10 = vector.load %arg10[%c0_16, %c0_17] : memref<256x128xf32, #tpu.memory_space<vmem>>, vector<128x128xf32>
    %c128 = arith.constant 128 : index
    %c0_18 = arith.constant 0 : index
    %11 = vector.load %arg10[%c128, %c0_18] : memref<256x128xf32, #tpu.memory_space<vmem>>, vector<128x128xf32>
    %c0_19 = arith.constant 0 : index
    %c0_20 = arith.constant 0 : index
    %12 = vector.load %arg11[%c0_19, %c0_20] : memref<1x128xf32, #tpu.memory_space<vmem>>, vector<1x128xf32>
    %c0_21 = arith.constant 0 : index
    %c0_22 = arith.constant 0 : index
    %13 = vector.load %arg12[%c0_21, %c0_22] : memref<128x128xf32, #tpu.memory_space<vmem>>, vector<128x128xf32>
    %c0_23 = arith.constant 0 : index
    %c0_24 = arith.constant 0 : index
    %14 = vector.load %arg13[%c0_23, %c0_24] : memref<1x128xf32, #tpu.memory_space<vmem>>, vector<1x128xf32>
    %15 = tpu.iota {dimensions = array<i32: 1>} : vector<8x48xi32>
    %c0_25 = arith.constant 0 : index
    %c0_26 = arith.constant 0 : index
    %16 = vector.load %arg15[%c0_25, %c0_26] : memref<8x128xf32, #tpu.memory_space<vmem>>, vector<8x128xf32>
    %c0_i32_27 = arith.constant 0 : i32
    %c8_i32 = arith.constant 8 : i32
    %17 = arith.muli %c0_i32_27, %c8_i32 : i32
    %18 = tpu.assume_multiple %17, 8 : i32
    %19 = arith.index_cast %18 : i32 to index
    %c0_28 = arith.constant 0 : index
    %20 = vector.load %arg1[%19, %c0_28] : memref<8x1xi32, #tpu.memory_space<vmem>>, vector<8x1xi32>
    %21 = vector.broadcast %20 : vector<8x1xi32> to vector<8x48xi32>
    %22 = arith.cmpi eq, %15, %21 : vector<8x48xi32>
    %23 = arith.extui %22 : vector<8x48xi1> to vector<8x48xi32>
    %24 = arith.sitofp %23 : vector<8x48xi32> to vector<8x48xf32>
    %cst = arith.constant dense<0.000000e+00> : vector<8x128xf32>
    %25 = tpu.matmul %24, %3, %cst {dimension_numbers = #tpu.dot_dimension_numbers<[1], [0], [0], [1], [0, 0, 1, 1], [], []>} : vector<8x48xf32>, vector<48x128xf32>, vector<8x128xf32> -> vector<8x128xf32>
    %cst_29 = arith.constant dense<0.000000e+00> : vector<8x384xf32>
    %26 = tpu.matmul %25, %6, %cst_29 {dimension_numbers = #tpu.dot_dimension_numbers<[1], [0], [0], [1], [0, 0, 1, 1], [], []>} : vector<8x128xf32>, vector<128x384xf32>, vector<8x384xf32> -> vector<8x384xf32>
    %27 = vector.broadcast %8 : vector<1x384xf32> to vector<8x384xf32>
    %28 = arith.addf %26, %27 : vector<8x384xf32>
    %cst_30 = arith.constant dense<0.000000e+00> : vector<8x384xf32>
    %29 = tpu.matmul %16, %7, %cst_30 {dimension_numbers = #tpu.dot_dimension_numbers<[1], [0], [0], [1], [0, 0, 1, 1], [], []>} : vector<8x128xf32>, vector<128x384xf32>, vector<8x384xf32> -> vector<8x384xf32>
    %30 = vector.broadcast %9 : vector<1x384xf32> to vector<8x384xf32>
    %31 = arith.addf %29, %30 : vector<8x384xf32>
    %32 = vector.extract_strided_slice %28 {offsets = [0, 0], sizes = [8, 128], strides = [1, 1]} : vector<8x384xf32> to vector<8x128xf32>
    %33 = vector.extract_strided_slice %31 {offsets = [0, 0], sizes = [8, 128], strides = [1, 1]} : vector<8x384xf32> to vector<8x128xf32>
    %34 = arith.addf %32, %33 : vector<8x128xf32>
    %35 = arith.negf %34 : vector<8x128xf32>
    %36 = math.exp %35 : vector<8x128xf32>
    %cst_31 = arith.constant 1.000000e+00 : f32
    %37 = vector.broadcast %cst_31 : f32 to vector<8x128xf32>
    %38 = arith.addf %37, %36 : vector<8x128xf32>
    %39 = arith.divf %37, %38 : vector<8x128xf32>
    %40 = vector.extract_strided_slice %28 {offsets = [0, 128], sizes = [8, 128], strides = [1, 1]} : vector<8x384xf32> to vector<8x128xf32>
    %41 = vector.extract_strided_slice %31 {offsets = [0, 128], sizes = [8, 128], strides = [1, 1]} : vector<8x384xf32> to vector<8x128xf32>
    %42 = arith.addf %40, %41 : vector<8x128xf32>
    %43 = arith.negf %42 : vector<8x128xf32>
    %44 = math.exp %43 : vector<8x128xf32>
    %cst_32 = arith.constant 1.000000e+00 : f32
    %45 = vector.broadcast %cst_32 : f32 to vector<8x128xf32>
    %46 = arith.addf %45, %44 : vector<8x128xf32>
    %47 = arith.divf %45, %46 : vector<8x128xf32>
    %48 = vector.extract_strided_slice %28 {offsets = [0, 256], sizes = [8, 128], strides = [1, 1]} : vector<8x384xf32> to vector<8x128xf32>
    %49 = vector.extract_strided_slice %31 {offsets = [0, 256], sizes = [8, 128], strides = [1, 1]} : vector<8x384xf32> to vector<8x128xf32>
    %50 = arith.mulf %39, %49 : vector<8x128xf32>
    %51 = arith.addf %48, %50 : vector<8x128xf32>
    %52 = math.tanh %51 : vector<8x128xf32>
    %cst_33 = arith.constant 1.000000e+00 : f32
    %53 = vector.broadcast %cst_33 : f32 to vector<8x128xf32>
    %54 = arith.subf %53, %47 : vector<8x128xf32>
    %55 = arith.mulf %54, %52 : vector<8x128xf32>
    %56 = arith.mulf %47, %16 : vector<8x128xf32>
    %57 = arith.addf %55, %56 : vector<8x128xf32>
    %58 = vector.shape_cast %57 : vector<8x128xf32> to vector<8x1x128xf32>
    "tpu.trace_start"() <{level = 10 : i32, message = "bqh,bhl->bql"}> : () -> ()
    %cst_34 = arith.constant dense<0.000000e+00> : vector<8x1x8xf32>
    %59 = tpu.matmul %58, %5, %cst_34 {dimension_numbers = #tpu.dot_dimension_numbers<[2], [1], [1], [2], [0, 0, 0, 1, 1, 2], [0], [0]>} : vector<8x1x128xf32>, vector<8x128x8xf32>, vector<8x1x8xf32> -> vector<8x1x8xf32>
    "tpu.trace_stop"() : () -> ()
    %cst_35 = arith.constant dense<0xFF800000> : vector<8x1xf32>
    %60 = vector.multi_reduction <maximumf>, %59, %cst_35 [2] : vector<8x1x8xf32> to vector<8x1xf32>
    %61 = vector.shape_cast %60 : vector<8x1xf32> to vector<8x1x1xf32>
    %62 = vector.broadcast %61 : vector<8x1x1xf32> to vector<8x1x8xf32>
    %63 = arith.subf %59, %62 : vector<8x1x8xf32>
    %64 = math.exp %63 : vector<8x1x8xf32>
    %cst_36 = arith.constant dense<0.000000e+00> : vector<8x1xf32>
    %65 = vector.multi_reduction <add>, %64, %cst_36 [2] : vector<8x1x8xf32> to vector<8x1xf32>
    %66 = vector.shape_cast %65 : vector<8x1xf32> to vector<8x1x1xf32>
    %67 = tpu.reciprocal %66 {approx = true} : vector<8x1x1xf32> -> vector<8x1x1xf32>
    %68 = vector.broadcast %67 : vector<8x1x1xf32> to vector<8x1x8xf32>
    %69 = arith.mulf %64, %68 : vector<8x1x8xf32>
    "tpu.trace_start"() <{level = 10 : i32, message = "bql,blh->bqh"}> : () -> ()
    %cst_37 = arith.constant dense<0.000000e+00> : vector<8x1x128xf32>
    %70 = tpu.matmul %69, %4, %cst_37 {dimension_numbers = #tpu.dot_dimension_numbers<[2], [1], [1], [2], [0, 0, 0, 1, 1, 2], [0], [0]>} : vector<8x1x8xf32>, vector<8x8x128xf32>, vector<8x1x128xf32> -> vector<8x1x128xf32>
    "tpu.trace_stop"() : () -> ()
    %71 = vector.shape_cast %70 : vector<8x1x128xf32> to vector<8x128xf32>
    %cst_38 = arith.constant dense<0.000000e+00> : vector<8x128xf32>
    %72 = tpu.matmul %57, %10, %cst_38 {dimension_numbers = #tpu.dot_dimension_numbers<[1], [0], [0], [1], [0, 0, 1, 1], [], []>} : vector<8x128xf32>, vector<128x128xf32>, vector<8x128xf32> -> vector<8x128xf32>
    %cst_39 = arith.constant dense<0.000000e+00> : vector<8x128xf32>
    %73 = tpu.matmul %71, %11, %cst_39 {dimension_numbers = #tpu.dot_dimension_numbers<[1], [0], [0], [1], [0, 0, 1, 1], [], []>} : vector<8x128xf32>, vector<128x128xf32>, vector<8x128xf32> -> vector<8x128xf32>
    %74 = arith.addf %72, %73 : vector<8x128xf32>
    %75 = vector.broadcast %12 : vector<1x128xf32> to vector<8x128xf32>
    %76 = arith.addf %74, %75 : vector<8x128xf32>
    %77 = math.tanh %76 : vector<8x128xf32>
    %cst_40 = arith.constant dense<0.000000e+00> : vector<8x128xf32>
    %78 = tpu.matmul %77, %13, %cst_40 {dimension_numbers = #tpu.dot_dimension_numbers<[1], [0], [0], [1], [0, 0, 1, 1], [], []>} : vector<8x128xf32>, vector<128x128xf32>, vector<8x128xf32> -> vector<8x128xf32>
    %79 = vector.broadcast %14 : vector<1x128xf32> to vector<8x128xf32>
    %80 = arith.addf %78, %79 : vector<8x128xf32>
    %cst_41 = arith.constant dense<0xFF800000> : vector<8xf32>
    %81 = vector.multi_reduction <maximumf>, %80, %cst_41 [1] : vector<8x128xf32> to vector<8xf32>
    %82 = vector.shape_cast %81 : vector<8xf32> to vector<8x1xf32>
    %83 = vector.broadcast %82 : vector<8x1xf32> to vector<8x128xf32>
    %84 = arith.subf %80, %83 : vector<8x128xf32>
    %85 = math.exp %84 : vector<8x128xf32>
    %cst_42 = arith.constant dense<0.000000e+00> : vector<8xf32>
    %86 = vector.multi_reduction <add>, %85, %cst_42 [1] : vector<8x128xf32> to vector<8xf32>
    %87 = vector.shape_cast %86 : vector<8xf32> to vector<8x1xf32>
    %88 = vector.broadcast %87 : vector<8x1xf32> to vector<8x128xf32>
    %89 = arith.divf %85, %88 : vector<8x128xf32>
    %90 = arith.index_cast %c0_i32_27 : i32 to index
    %c0_43 = arith.constant 0 : index
    %c0_44 = arith.constant 0 : index
    %91 = vector.load %arg14[%90, %c0_43, %c0_44] : memref<1x8x128xf32, #tpu.memory_space<vmem>>, vector<1x8x128xf32>
    %92 = vector.shape_cast %91 : vector<1x8x128xf32> to vector<8x128xf32>
    %93 = vector.shape_cast %89 : vector<8x128xf32> to vector<1x8x128xf32>
    tpu.vector_store %arg14[%90, %c0_43, %c0_44], %93 {strides = array<i32>} : memref<1x8x128xf32, #tpu.memory_space<vmem>>, vector<1x8x128xf32>,
    %c1_i32 = arith.constant 1 : i32
    %c0_45 = arith.constant 0 : index
    %c0_46 = arith.constant 0 : index
    %94 = vector.load %arg15[%c0_45, %c0_46] : memref<8x128xf32, #tpu.memory_space<vmem>>, vector<8x128xf32>
    tpu.vector_store %arg15[%c0_45, %c0_46], %57 {strides = array<i32>} : memref<8x128xf32, #tpu.memory_space<vmem>>, vector<8x128xf32>,
    return
  }
  func.func @transform_0(%arg0: i32) -> (i32, i32) {
    %c0_i32 = arith.constant 0 : i32
    %c0_i32_0 = arith.constant 0 : i32
    return %arg0, %c0_i32 : i32, i32
  }
  func.func @transform_1(%arg0: i32) -> (i32, i32) {
    %c0_i32 = arith.constant 0 : i32
    %c0_i32_0 = arith.constant 0 : i32
    %c0_i32_1 = arith.constant 0 : i32
    return %c0_i32, %c0_i32_0 : i32, i32
  }
  func.func @transform_2(%arg0: i32) -> (i32, i32) {
    %c0_i32 = arith.constant 0 : i32
    %c0_i32_0 = arith.constant 0 : i32
    %c0_i32_1 = arith.constant 0 : i32
    return %c0_i32, %c0_i32_0 : i32, i32
  }
  func.func @transform_3(%arg0: i32) -> (i32, i32, i32) {
    %c0_i32 = arith.constant 0 : i32
    %c0_i32_0 = arith.constant 0 : i32
    %c0_i32_1 = arith.constant 0 : i32
    %c0_i32_2 = arith.constant 0 : i32
    return %c0_i32, %c0_i32_0, %c0_i32_1 : i32, i32, i32
  }
  func.func @transform_4(%arg0: i32) -> (i32, i32, i32) {
    %c0_i32 = arith.constant 0 : i32
    %c0_i32_0 = arith.constant 0 : i32
    %c0_i32_1 = arith.constant 0 : i32
    %c0_i32_2 = arith.constant 0 : i32
    return %c0_i32, %c0_i32_0, %c0_i32_1 : i32, i32, i32
  }
  func.func @transform_5(%arg0: i32) -> (i32, i32) {
    %c0_i32 = arith.constant 0 : i32
    %c0_i32_0 = arith.constant 0 : i32
    %c0_i32_1 = arith.constant 0 : i32
    return %c0_i32, %c0_i32_0 : i32, i32
  }
  func.func @transform_6(%arg0: i32) -> (i32, i32) {
    %c0_i32 = arith.constant 0 : i32
    %c0_i32_0 = arith.constant 0 : i32
    %c0_i32_1 = arith.constant 0 : i32
    return %c0_i32, %c0_i32_0 : i32, i32
  }
  func.func @transform_7(%arg0: i32) -> (i32, i32) {
    %c0_i32 = arith.constant 0 : i32
    %c0_i32_0 = arith.constant 0 : i32
    %c0_i32_1 = arith.constant 0 : i32
    return %c0_i32, %c0_i32_0 : i32, i32
  }
  func.func @transform_8(%arg0: i32) -> (i32, i32) {
    %c0_i32 = arith.constant 0 : i32
    %c0_i32_0 = arith.constant 0 : i32
    %c0_i32_1 = arith.constant 0 : i32
    return %c0_i32, %c0_i32_0 : i32, i32
  }
  func.func @transform_9(%arg0: i32) -> (i32, i32) {
    %c0_i32 = arith.constant 0 : i32
    %c0_i32_0 = arith.constant 0 : i32
    %c0_i32_1 = arith.constant 0 : i32
    return %c0_i32, %c0_i32_0 : i32, i32
  }
  func.func @transform_10(%arg0: i32) -> (i32, i32) {
    %c0_i32 = arith.constant 0 : i32
    %c0_i32_0 = arith.constant 0 : i32
    %c0_i32_1 = arith.constant 0 : i32
    return %c0_i32, %c0_i32_0 : i32, i32
  }
  func.func @transform_11(%arg0: i32) -> (i32, i32) {
    %c0_i32 = arith.constant 0 : i32
    %c0_i32_0 = arith.constant 0 : i32
    %c0_i32_1 = arith.constant 0 : i32
    return %c0_i32, %c0_i32_0 : i32, i32
  }
  func.func @transform_12(%arg0: i32) -> (i32, i32) {
    %c0_i32 = arith.constant 0 : i32
    %c0_i32_0 = arith.constant 0 : i32
    %c0_i32_1 = arith.constant 0 : i32
    return %c0_i32, %c0_i32_0 : i32, i32
  }
  func.func @transform_13(%arg0: i32) -> (i32, i32, i32) {
    %c0_i32 = arith.constant 0 : i32
    %c0_i32_0 = arith.constant 0 : i32
    %c0_i32_1 = arith.constant 0 : i32
    return %arg0, %c0_i32, %c0_i32_0 : i32, i32, i32
  }
  func.func @transform_14(%arg0: i32) -> (i32, i32) {
    %c0_i32 = arith.constant 0 : i32
    %c0_i32_0 = arith.constant 0 : i32
    %c0_i32_1 = arith.constant 0 : i32
    return %c0_i32, %c0_i32_0 : i32, i32
  }
}

module attributes {stable_mosaic.version = 11 : i64} {
  func.func @_decoder_kernel(%arg0: i32, %arg1: memref<8x1xi32, #tpu.memory_space<vmem>>, %arg2: memref<48x128xf32, #tpu.memory_space<vmem>>, %arg3: memref<8x128xf32, #tpu.memory_space<vmem>>, %arg4: memref<8x8x128xf32, #tpu.memory_space<vmem>>, %arg5: memref<8x128x8xf32, #tpu.memory_space<vmem>>, %arg6: memref<128x384xf32, #tpu.memory_space<vmem>>, %arg7: memref<128x384xf32, #tpu.memory_space<vmem>>, %arg8: memref<1x384xf32, #tpu.memory_space<vmem>>, %arg9: memref<1x384xf32, #tpu.memory_space<vmem>>, %arg10: memref<256x128xf32, #tpu.memory_space<vmem>>, %arg11: memref<1x128xf32, #tpu.memory_space<vmem>>, %arg12: memref<128x128xf32, #tpu.memory_space<vmem>>, %arg13: memref<1x128xf32, #tpu.memory_space<vmem>>, %arg14: memref<1x8x128xf32, #tpu.memory_space<vmem>>, %arg15: memref<8x128xf32, #tpu.memory_space<vmem>>) attributes {dimension_semantics = [#tpu.dimension_semantics<arbitrary>], iteration_bounds = array<i64: 1>, scalar_prefetch = 0 : i64, scratch_operands = 0 : i64, tpu.core_type = #tpu.core_type<tc>, window_params = [{transform_indices = @transform_0, window_bounds = array<i64: 8, 1>}, {pipeline_mode = #tpu.pipeline_mode<synchronous>, transform_indices = @transform_1, window_bounds = array<i64: 48, 128>}, {pipeline_mode = #tpu.pipeline_mode<synchronous>, transform_indices = @transform_2, window_bounds = array<i64: 8, 128>}, {pipeline_mode = #tpu.pipeline_mode<synchronous>, transform_indices = @transform_3, window_bounds = array<i64: 8, 8, 128>}, {pipeline_mode = #tpu.pipeline_mode<synchronous>, transform_indices = @transform_4, window_bounds = array<i64: 8, 128, 8>}, {pipeline_mode = #tpu.pipeline_mode<synchronous>, transform_indices = @transform_5, window_bounds = array<i64: 128, 384>}, {pipeline_mode = #tpu.pipeline_mode<synchronous>, transform_indices = @transform_6, window_bounds = array<i64: 128, 384>}, {pipeline_mode = #tpu.pipeline_mode<synchronous>, transform_indices = @transform_7, window_bounds = array<i64: 1, 384>}, {pipeline_mode = #tpu.pipeline_mode<synchronous>, transform_indices = @transform_8, window_bounds = array<i64: 1, 384>}, {pipeline_mode = #tpu.pipeline_mode<synchronous>, transform_indices = @transform_9, window_bounds = array<i64: 256, 128>}, {pipeline_mode = #tpu.pipeline_mode<synchronous>, transform_indices = @transform_10, window_bounds = array<i64: 1, 128>}, {pipeline_mode = #tpu.pipeline_mode<synchronous>, transform_indices = @transform_11, window_bounds = array<i64: 128, 128>}, {pipeline_mode = #tpu.pipeline_mode<synchronous>, transform_indices = @transform_12, window_bounds = array<i64: 1, 128>}, {transform_indices = @transform_13, window_bounds = array<i64: 1, 8, 128>}, {pipeline_mode = #tpu.pipeline_mode<synchronous>, transform_indices = @transform_14, window_bounds = array<i64: 8, 128>}]} {
    %c0_i32 = arith.constant 0 : i32
    %0 = arith.cmpi eq, %arg0, %c0_i32 : i32
    %1 = arith.extui %0 : i1 to i32
    %c0_i32_0 = arith.constant 0 : i32
    %2 = arith.cmpi ne, %1, %c0_i32_0 : i32
    scf.if %2 {
      %c0_47 = arith.constant 0 : index
      %c0_48 = arith.constant 0 : index
      %95 = vector.load %arg3[%c0_47, %c0_48] : memref<8x128xf32, #tpu.memory_space<vmem>>, vector<8x128xf32>
      %c0_49 = arith.constant 0 : index
      %c0_50 = arith.constant 0 : index
      %96 = vector.load %arg15[%c0_49, %c0_50] : memref<8x128xf32, #tpu.memory_space<vmem>>, vector<8x128xf32>
      tpu.vector_store %arg15[%c0_49, %c0_50], %95 {strides = array<i32>} : memref<8x128xf32, #tpu.memory_space<vmem>>, vector<8x128xf32>,
    } else {
    }
    %c0 = arith.constant 0 : index
    %c0_1 = arith.constant 0 : index
    %3 = vector.load %arg2[%c0, %c0_1] : memref<48x128xf32, #tpu.memory_space<vmem>>, vector<48x128xf32>
    %c0_2 = arith.constant 0 : index
    %c0_3 = arith.constant 0 : index
    %c0_4 = arith.constant 0 : index
    %4 = vector.load %arg4[%c0_2, %c0_3, %c0_4] : memref<8x8x128xf32, #tpu.memory_space<vmem>>, vector<8x8x128xf32>
    %c0_5 = arith.constant 0 : index
    %c0_6 = arith.constant 0 : index
    %c0_7 = arith.constant 0 : index
    %5 = vector.load %arg5[%c0_5, %c0_6, %c0_7] : memref<8x128x8xf32, #tpu.memory_space<vmem>>, vector<8x128x8xf32>
    %c0_8 = arith.constant 0 : index
    %c0_9 = arith.constant 0 : index
    %6 = vector.load %arg6[%c0_8, %c0_9] : memref<128x384xf32, #tpu.memory_space<vmem>>, vector<128x384xf32>
    %c0_10 = arith.constant 0 : index
    %c0_11 = arith.constant 0 : index
    %7 = vector.load %arg7[%c0_10, %c0_11] : memref<128x384xf32, #tpu.memory_space<vmem>>, vector<128x384xf32>
    %c0_12 = arith.constant 0 : index
    %c0_13 = arith.constant 0 : index
    %8 = vector.load %arg8[%c0_12, %c0_13] : memref<1x384xf32, #tpu.memory_space<vmem>>, vector<1x384xf32>
    %c0_14 = arith.constant 0 : index
    %c0_15 = arith.constant 0 : index
    %9 = vector.load %arg9[%c0_14, %c0_15] : memref<1x384xf32, #tpu.memory_space<vmem>>, vector<1x384xf32>
    %c0_16 = arith.constant 0 : index
    %c0_17 = arith.constant 0 : index
    %10 = vector.load %arg10[%c0_16, %c0_17] : memref<256x128xf32, #tpu.memory_space<vmem>>, vector<128x128xf32>
    %c128 = arith.constant 128 : index
    %c0_18 = arith.constant 0 : index
    %11 = vector.load %arg10[%c128, %c0_18] : memref<256x128xf32, #tpu.memory_space<vmem>>, vector<128x128xf32>
    %c0_19 = arith.constant 0 : index
    %c0_20 = arith.constant 0 : index
    %12 = vector.load %arg11[%c0_19, %c0_20] : memref<1x128xf32, #tpu.memory_space<vmem>>, vector<1x128xf32>
    %c0_21 = arith.constant 0 : index
    %c0_22 = arith.constant 0 : index
    %13 = vector.load %arg12[%c0_21, %c0_22] : memref<128x128xf32, #tpu.memory_space<vmem>>, vector<128x128xf32>
    %c0_23 = arith.constant 0 : index
    %c0_24 = arith.constant 0 : index
    %14 = vector.load %arg13[%c0_23, %c0_24] : memref<1x128xf32, #tpu.memory_space<vmem>>, vector<1x128xf32>
    %15 = tpu.iota {dimensions = array<i32: 1>} : vector<8x48xi32>
    %c0_25 = arith.constant 0 : index
    %c0_26 = arith.constant 0 : index
    %16 = vector.load %arg15[%c0_25, %c0_26] : memref<8x128xf32, #tpu.memory_space<vmem>>, vector<8x128xf32>
    %c0_i32_27 = arith.constant 0 : i32
    %c8_i32 = arith.constant 8 : i32
    %17 = arith.muli %c0_i32_27, %c8_i32 : i32
    %18 = tpu.assume_multiple %17, 8 : i32
    %19 = arith.index_cast %18 : i32 to index
    %c0_28 = arith.constant 0 : index
    %20 = vector.load %arg1[%19, %c0_28] : memref<8x1xi32, #tpu.memory_space<vmem>>, vector<8x1xi32>
    %21 = vector.broadcast %20 : vector<8x1xi32> to vector<8x48xi32>
    %22 = arith.cmpi eq, %15, %21 : vector<8x48xi32>
    %23 = arith.extui %22 : vector<8x48xi1> to vector<8x48xi32>
    %24 = arith.sitofp %23 : vector<8x48xi32> to vector<8x48xf32>
    %cst = arith.constant dense<0.000000e+00> : vector<8x128xf32>
    %25 = tpu.matmul %24, %3, %cst {dimension_numbers = #tpu.dot_dimension_numbers<[1], [0], [0], [1], [0, 0, 1, 1], [], []>} : vector<8x48xf32>, vector<48x128xf32>, vector<8x128xf32> -> vector<8x128xf32>
    %cst_29 = arith.constant dense<0.000000e+00> : vector<8x384xf32>
    %26 = tpu.matmul %25, %6, %cst_29 {dimension_numbers = #tpu.dot_dimension_numbers<[1], [0], [0], [1], [0, 0, 1, 1], [], []>} : vector<8x128xf32>, vector<128x384xf32>, vector<8x384xf32> -> vector<8x384xf32>
    %27 = vector.broadcast %8 : vector<1x384xf32> to vector<8x384xf32>
    %28 = arith.addf %26, %27 : vector<8x384xf32>
    %cst_30 = arith.constant dense<0.000000e+00> : vector<8x384xf32>
    %29 = tpu.matmul %16, %7, %cst_30 {dimension_numbers = #tpu.dot_dimension_numbers<[1], [0], [0], [1], [0, 0, 1, 1], [], []>} : vector<8x128xf32>, vector<128x384xf32>, vector<8x384xf32> -> vector<8x384xf32>
    %30 = vector.broadcast %9 : vector<1x384xf32> to vector<8x384xf32>
    %31 = arith.addf %29, %30 : vector<8x384xf32>
    %32 = vector.extract_strided_slice %28 {offsets = [0, 0], sizes = [8, 128], strides = [1, 1]} : vector<8x384xf32> to vector<8x128xf32>
    %33 = vector.extract_strided_slice %31 {offsets = [0, 0], sizes = [8, 128], strides = [1, 1]} : vector<8x384xf32> to vector<8x128xf32>
    %34 = arith.addf %32, %33 : vector<8x128xf32>
    %35 = arith.negf %34 : vector<8x128xf32>
    %36 = math.exp %35 : vector<8x128xf32>
    %cst_31 = arith.constant 1.000000e+00 : f32
    %37 = vector.broadcast %cst_31 : f32 to vector<8x128xf32>
    %38 = arith.addf %37, %36 : vector<8x128xf32>
    %39 = arith.divf %37, %38 : vector<8x128xf32>
    %40 = vector.extract_strided_slice %28 {offsets = [0, 128], sizes = [8, 128], strides = [1, 1]} : vector<8x384xf32> to vector<8x128xf32>
    %41 = vector.extract_strided_slice %31 {offsets = [0, 128], sizes = [8, 128], strides = [1, 1]} : vector<8x384xf32> to vector<8x128xf32>
    %42 = arith.addf %40, %41 : vector<8x128xf32>
    %43 = arith.negf %42 : vector<8x128xf32>
    %44 = math.exp %43 : vector<8x128xf32>
    %cst_32 = arith.constant 1.000000e+00 : f32
    %45 = vector.broadcast %cst_32 : f32 to vector<8x128xf32>
    %46 = arith.addf %45, %44 : vector<8x128xf32>
    %47 = arith.divf %45, %46 : vector<8x128xf32>
    %48 = vector.extract_strided_slice %28 {offsets = [0, 256], sizes = [8, 128], strides = [1, 1]} : vector<8x384xf32> to vector<8x128xf32>
    %49 = vector.extract_strided_slice %31 {offsets = [0, 256], sizes = [8, 128], strides = [1, 1]} : vector<8x384xf32> to vector<8x128xf32>
    %50 = arith.mulf %39, %49 : vector<8x128xf32>
    %51 = arith.addf %48, %50 : vector<8x128xf32>
    %52 = math.tanh %51 : vector<8x128xf32>
    %cst_33 = arith.constant 1.000000e+00 : f32
    %53 = vector.broadcast %cst_33 : f32 to vector<8x128xf32>
    %54 = arith.subf %53, %47 : vector<8x128xf32>
    %55 = arith.mulf %54, %52 : vector<8x128xf32>
    %56 = arith.mulf %47, %16 : vector<8x128xf32>
    %57 = arith.addf %55, %56 : vector<8x128xf32>
    %58 = vector.shape_cast %57 : vector<8x128xf32> to vector<8x1x128xf32>
    "tpu.trace_start"() <{level = 10 : i32, message = "bqh,bhl->bql"}> : () -> ()
    %cst_34 = arith.constant dense<0.000000e+00> : vector<8x1x8xf32>
    %59 = tpu.matmul %58, %5, %cst_34 {dimension_numbers = #tpu.dot_dimension_numbers<[2], [1], [1], [2], [0, 0, 0, 1, 1, 2], [0], [0]>} : vector<8x1x128xf32>, vector<8x128x8xf32>, vector<8x1x8xf32> -> vector<8x1x8xf32>
    "tpu.trace_stop"() : () -> ()
    %cst_35 = arith.constant dense<0xFF800000> : vector<8x1xf32>
    %60 = vector.multi_reduction <maximumf>, %59, %cst_35 [2] : vector<8x1x8xf32> to vector<8x1xf32>
    %61 = vector.shape_cast %60 : vector<8x1xf32> to vector<8x1x1xf32>
    %62 = vector.broadcast %61 : vector<8x1x1xf32> to vector<8x1x8xf32>
    %63 = arith.subf %59, %62 : vector<8x1x8xf32>
    %64 = math.exp %63 : vector<8x1x8xf32>
    %cst_36 = arith.constant dense<0.000000e+00> : vector<8x1xf32>
    %65 = vector.multi_reduction <add>, %64, %cst_36 [2] : vector<8x1x8xf32> to vector<8x1xf32>
    %66 = vector.shape_cast %65 : vector<8x1xf32> to vector<8x1x1xf32>
    %67 = tpu.reciprocal %66 {approx = true} : vector<8x1x1xf32> -> vector<8x1x1xf32>
    %68 = vector.broadcast %67 : vector<8x1x1xf32> to vector<8x1x8xf32>
    %69 = arith.mulf %64, %68 : vector<8x1x8xf32>
    "tpu.trace_start"() <{level = 10 : i32, message = "bql,blh->bqh"}> : () -> ()
    %cst_37 = arith.constant dense<0.000000e+00> : vector<8x1x128xf32>
    %70 = tpu.matmul %69, %4, %cst_37 {dimension_numbers = #tpu.dot_dimension_numbers<[2], [1], [1], [2], [0, 0, 0, 1, 1, 2], [0], [0]>} : vector<8x1x8xf32>, vector<8x8x128xf32>, vector<8x1x128xf32> -> vector<8x1x128xf32>
    "tpu.trace_stop"() : () -> ()
    %71 = vector.shape_cast %70 : vector<8x1x128xf32> to vector<8x128xf32>
    %cst_38 = arith.constant dense<0.000000e+00> : vector<8x128xf32>
    %72 = tpu.matmul %57, %10, %cst_38 {dimension_numbers = #tpu.dot_dimension_numbers<[1], [0], [0], [1], [0, 0, 1, 1], [], []>} : vector<8x128xf32>, vector<128x128xf32>, vector<8x128xf32> -> vector<8x128xf32>
    %cst_39 = arith.constant dense<0.000000e+00> : vector<8x128xf32>
    %73 = tpu.matmul %71, %11, %cst_39 {dimension_numbers = #tpu.dot_dimension_numbers<[1], [0], [0], [1], [0, 0, 1, 1], [], []>} : vector<8x128xf32>, vector<128x128xf32>, vector<8x128xf32> -> vector<8x128xf32>
    %74 = arith.addf %72, %73 : vector<8x128xf32>
    %75 = vector.broadcast %12 : vector<1x128xf32> to vector<8x128xf32>
    %76 = arith.addf %74, %75 : vector<8x128xf32>
    %77 = math.tanh %76 : vector<8x128xf32>
    %cst_40 = arith.constant dense<0.000000e+00> : vector<8x128xf32>
    %78 = tpu.matmul %77, %13, %cst_40 {dimension_numbers = #tpu.dot_dimension_numbers<[1], [0], [0], [1], [0, 0, 1, 1], [], []>} : vector<8x128xf32>, vector<128x128xf32>, vector<8x128xf32> -> vector<8x128xf32>
    %79 = vector.broadcast %14 : vector<1x128xf32> to vector<8x128xf32>
    %80 = arith.addf %78, %79 : vector<8x128xf32>
    %cst_41 = arith.constant dense<0xFF800000> : vector<8xf32>
    %81 = vector.multi_reduction <maximumf>, %80, %cst_41 [1] : vector<8x128xf32> to vector<8xf32>
    %82 = vector.shape_cast %81 : vector<8xf32> to vector<8x1xf32>
    %83 = vector.broadcast %82 : vector<8x1xf32> to vector<8x128xf32>
    %84 = arith.subf %80, %83 : vector<8x128xf32>
    %85 = math.exp %84 : vector<8x128xf32>
    %cst_42 = arith.constant dense<0.000000e+00> : vector<8xf32>
    %86 = vector.multi_reduction <add>, %85, %cst_42 [1] : vector<8x128xf32> to vector<8xf32>
    %87 = vector.shape_cast %86 : vector<8xf32> to vector<8x1xf32>
    %88 = vector.broadcast %87 : vector<8x1xf32> to vector<8x128xf32>
    %89 = arith.divf %85, %88 : vector<8x128xf32>
    %90 = arith.index_cast %c0_i32_27 : i32 to index
    %c0_43 = arith.constant 0 : index
    %c0_44 = arith.constant 0 : index
    %91 = vector.load %arg14[%90, %c0_43, %c0_44] : memref<1x8x128xf32, #tpu.memory_space<vmem>>, vector<1x8x128xf32>
    %92 = vector.shape_cast %91 : vector<1x8x128xf32> to vector<8x128xf32>
    %93 = vector.shape_cast %89 : vector<8x128xf32> to vector<1x8x128xf32>
    tpu.vector_store %arg14[%90, %c0_43, %c0_44], %93 {strides = array<i32>} : memref<1x8x128xf32, #tpu.memory_space<vmem>>, vector<1x8x128xf32>,
    %c1_i32 = arith.constant 1 : i32
    %c0_45 = arith.constant 0 : index
    %c0_46 = arith.constant 0 : index
    %94 = vector.load %arg15[%c0_45, %c0_46] : memref<8x128xf32, #tpu.memory_space<vmem>>, vector<8x128xf32>
    tpu.vector_store %arg15[%c0_45, %c0_46], %57 {strides = array<i32>} : memref<8x128xf32, #tpu.memory_space<vmem>>, vector<8x128xf32>,
    return
  }
  func.func @transform_0(%arg0: i32) -> (i32, i32) {
    %c0_i32 = arith.constant 0 : i32
    %c0_i32_0 = arith.constant 0 : i32
    return %arg0, %c0_i32 : i32, i32
  }
  func.func @transform_1(%arg0: i32) -> (i32, i32) {
    %c0_i32 = arith.constant 0 : i32
    %c0_i32_0 = arith.constant 0 : i32
    %c0_i32_1 = arith.constant 0 : i32
    return %c0_i32, %c0_i32_0 : i32, i32
  }
  func.func @transform_2(%arg0: i32) -> (i32, i32) {
    %c0_i32 = arith.constant 0 : i32
    %c0_i32_0 = arith.constant 0 : i32
    %c0_i32_1 = arith.constant 0 : i32
    return %c0_i32, %c0_i32_0 : i32, i32
  }
  func.func @transform_3(%arg0: i32) -> (i32, i32, i32) {
    %c0_i32 = arith.constant 0 : i32
    %c0_i32_0 = arith.constant 0 : i32
    %c0_i32_1 = arith.constant 0 : i32
    %c0_i32_2 = arith.constant 0 : i32
    return %c0_i32, %c0_i32_0, %c0_i32_1 : i32, i32, i32
  }
  func.func @transform_4(%arg0: i32) -> (i32, i32, i32) {
    %c0_i32 = arith.constant 0 : i32
    %c0_i32_0 = arith.constant 0 : i32
    %c0_i32_1 = arith.constant 0 : i32
    %c0_i32_2 = arith.constant 0 : i32
    return %c0_i32, %c0_i32_0, %c0_i32_1 : i32, i32, i32
  }
  func.func @transform_5(%arg0: i32) -> (i32, i32) {
    %c0_i32 = arith.constant 0 : i32
    %c0_i32_0 = arith.constant 0 : i32
    %c0_i32_1 = arith.constant 0 : i32
    return %c0_i32, %c0_i32_0 : i32, i32
  }
  func.func @transform_6(%arg0: i32) -> (i32, i32) {
    %c0_i32 = arith.constant 0 : i32
    %c0_i32_0 = arith.constant 0 : i32
    %c0_i32_1 = arith.constant 0 : i32
    return %c0_i32, %c0_i32_0 : i32, i32
  }
  func.func @transform_7(%arg0: i32) -> (i32, i32) {
    %c0_i32 = arith.constant 0 : i32
    %c0_i32_0 = arith.constant 0 : i32
    %c0_i32_1 = arith.constant 0 : i32
    return %c0_i32, %c0_i32_0 : i32, i32
  }
  func.func @transform_8(%arg0: i32) -> (i32, i32) {
    %c0_i32 = arith.constant 0 : i32
    %c0_i32_0 = arith.constant 0 : i32
    %c0_i32_1 = arith.constant 0 : i32
    return %c0_i32, %c0_i32_0 : i32, i32
  }
  func.func @transform_9(%arg0: i32) -> (i32, i32) {
    %c0_i32 = arith.constant 0 : i32
    %c0_i32_0 = arith.constant 0 : i32
    %c0_i32_1 = arith.constant 0 : i32
    return %c0_i32, %c0_i32_0 : i32, i32
  }
  func.func @transform_10(%arg0: i32) -> (i32, i32) {
    %c0_i32 = arith.constant 0 : i32
    %c0_i32_0 = arith.constant 0 : i32
    %c0_i32_1 = arith.constant 0 : i32
    return %c0_i32, %c0_i32_0 : i32, i32
  }
  func.func @transform_11(%arg0: i32) -> (i32, i32) {
    %c0_i32 = arith.constant 0 : i32
    %c0_i32_0 = arith.constant 0 : i32
    %c0_i32_1 = arith.constant 0 : i32
    return %c0_i32, %c0_i32_0 : i32, i32
  }
  func.func @transform_12(%arg0: i32) -> (i32, i32) {
    %c0_i32 = arith.constant 0 : i32
    %c0_i32_0 = arith.constant 0 : i32
    %c0_i32_1 = arith.constant 0 : i32
    return %c0_i32, %c0_i32_0 : i32, i32
  }
  func.func @transform_13(%arg0: i32) -> (i32, i32, i32) {
    %c0_i32 = arith.constant 0 : i32
    %c0_i32_0 = arith.constant 0 : i32
    %c0_i32_1 = arith.constant 0 : i32
    return %arg0, %c0_i32, %c0_i32_0 : i32, i32, i32
  }
  func.func @transform_14(%arg0: i32) -> (i32, i32) {
    %c0_i32 = arith.constant 0 : i32
    %c0_i32_0 = arith.constant 0 : i32
    %c0_i32_1 = arith.constant 0 : i32
    return %c0_i32, %c0_i32_0 : i32, i32
  }
}

</mosaic_0001>

<bundles_post_ra>
// kernel: tpu_custom_call.1
= control target key start
LH: loop header
LB: loop body
LE: loop exit
PB: predicated region body
PF: predicated region fallthrough
CT: control target
= control target key end

     0   :  { %20 = vsyncpa [#allocation3], 0  ;;  %s4889_s0 = inlined_call_operand.vmem [shape: s32[8,1], index: 0, kind: input, shape index: {}]   ;;  %s4890_s1 = inlined_call_operand.hbm [shape: f32[48,128], index: 1, kind: input, shape index: {}]   ;;  %s4891_s2 = inlined_call_operand.vmem [shape: f32[8,128], index: 2, kind: input, shape index: {}]   ;;  %s4892_s3 = inlined_call_operand.vmem [shape: f32[8,8,128], index: 3, kind: input, shape index: {}]   ;;  %s4893_s4 = inlined_call_operand.vmem [shape: f32[8,128,8], index: 4, kind: input, shape index: {}]   ;;  %s4894_s5 = inlined_call_operand.vmem [shape: f32[128,384], index: 5, kind: input, shape index: {}]   ;;  %s4895_s6 = inlined_call_operand.vmem [shape: f32[128,384], index: 6, kind: input, shape index: {}]   ;;  %s4896_s7 = inlined_call_operand.vmem [shape: f32[1,384], index: 7, kind: input, shape index: {}]   ;;  %s4897_s8 = inlined_call_operand.vmem [shape: f32[1,384], index: 8, kind: input, shape index: {}]   ;;  %s4898_s9 = inlined_call_operand.vmem [shape: f32[256,128], index: 9, kind: input, shape index: {}]   ;;  %s4899_s10 = inlined_call_operand.vmem [shape: f32[1,128], index: 10, kind: input, shape index: {}]   ;;  %s4900_s11 = inlined_call_operand.hbm [shape: f32[128,128], index: 11, kind: input, shape index: {}]   ;;  %s4901_s12 = inlined_call_operand.vmem [shape: f32[1,128], index: 12, kind: input, shape index: {}]   ;;  %s4902_s13 = inlined_call_operand.hbm [shape: f32[1,8,128], index: 13, kind: output, shape index: {0}]   ;;  %s4903_s14 = inlined_call_operand.hbm [shape: f32[8,128], index: 14, kind: output, shape index: {1}]  }
   0x1   :  { %21 = vsyncpa [#allocation6], 0 }
   0x2   :  { %22 = vsyncpa [#allocation4], 0 }
   0x3   :  { %23 = vsyncpa [#allocation9], 0  ;;  %s3693_s29 = smov [#allocation2]   ;;  %s3597_s17 = scalar_lea.hbm %s4890_s1, 768 }
   0x4   :  { %s31_s30 = sshll.u32 %s3693_s29, 4  ;;  %p3598_p0 = scmp.ne.s32.totalorder %s4890_s1, %s3597_s17  ;;  %s32_s30 = int_to_ptr.vmem [resolvable:$true] %s31_s30 }
   0x5   :  { %p3601_p1 = scmp.lt.u32.totalorder %s3597_s17, %s4890_s1 }
   0x7   :  { %p3603_p2 = pnand %p3601_p1, %p3598_p0 }
   0x9   :  { %3606 = shalt.err (!%p3603_p2)
}
   0xa   :  { %s3607_s22 = scalar_lea.vmem %s32_s30, 768  ;;  %p3612_p4 = scmp.lt.s32.totalorder %s32_s30, %s32_s30 }
   0xb   :  { %p3608_p3 = scmp.ne.s32.totalorder %s32_s30, %s3607_s22  ;;  %p3613_p5 = scmp.lt.s32.totalorder %s3607_s22, %s3607_s22 }
   0xd   :  { %p3614_p6 = por %p3613_p5, %p3612_p4 }
   0xf   :  { %p3615_p7 = pnand %p3614_p6, %p3608_p3 }
  0x11   :  { %3618 = shalt.err (!%p3615_p7)
}
  0x12   :  { %s3694_s23 = smov 128   ;;  %s3695_s24 = smov 8  }
  0x13   :  { %37 = dma.hbm_to_vmem [thread:$0]  %s4890_s1, 768, %s32_s30, [#allocation3], %s3694_s23, %s3694_s23, %s3695_s24  }
  0x14   :  { %s3696_s27 = smov [#allocation5]   ;;  %s3619_s16 = scalar_lea.hbm %s4900_s11, 2048 }
  0x15   :  { %s61_s28 = sshll.u32 %s3696_s27, 4  ;;  %p3620_p8 = scmp.ne.s32.totalorder %s4900_s11, %s3619_s16  ;;  %s62_s28 = int_to_ptr.vmem [resolvable:$true] %s61_s28 }
  0x16   :  { %p3623_p9 = scmp.lt.u32.totalorder %s3619_s16, %s4900_s11 }
  0x18   :  { %p3625_p10 = pnand %p3623_p9, %p3620_p8 }
  0x1a   :  { %3628 = shalt.err (!%p3625_p10)
}
  0x1b   :  { %s3629_s21 = scalar_lea.vmem %s62_s28, 2048  ;;  %p3634_p12 = scmp.lt.s32.totalorder %s62_s28, %s62_s28 }
  0x1c   :  { %p3630_p11 = scmp.ne.s32.totalorder %s62_s28, %s3629_s21  ;;  %p3635_p13 = scmp.lt.s32.totalorder %s3629_s21, %s3629_s21 }
  0x1e   :  { %p3636_p0 = por %p3635_p13, %p3634_p12 }
  0x20   :  { %p3637_p1 = pnand %p3636_p0, %p3630_p11 }
  0x22   :  { %3640 = shalt.err (!%p3637_p1)
}
  0x23   :  { %67 = dma.hbm_to_vmem [thread:$0]  %s4900_s11, 2048, %s62_s28, [#allocation6], %s3694_s23, %s3694_s23, %s3695_s24  }
  0x24   :  { %3685 = dma.done.wait [#allocation3], 768  }
  0x25   :  { %3686 = vsyncadd [#allocation3], 4294966528 }
  0x26   :  { %3687 = dma.done.wait [#allocation6], 2048  }
  0x27   :  { %3688 = vsyncadd [#allocation6], 4294965248  ;;  %v3697_v0 = vmov 0   ;;  %v3698_v1 = vmov 0.0|0.0   ;;  %v3699_v2 = vmov 0.0   ;;  %v375_v3 = vld [vmem:[%s4889_s0] sm:$0xff]  ;;  %v372_v61 = vlaneseq }
  0x28   :  { %3548 = vset.pattern.permute.xlu0 %v3697_v0  ;;  %3146 = vmatprep.subr.bf16.mxu0 %v3698_v1  ;;  %v82_v4 = vld [vmem:[#allocation2] sm:$0xff]  ;;  %v83_v5 = vld [vmem:[#allocation2 + $0x8] sm:$0xff]  ;;  %v84_v7 = vld [vmem:[#allocation2 + $0x10] sm:$0xff]  ;;  %vm3700_vm0 = vmmov 0   ;;  %vm382_vm1 = vcmask 392192   ;;  %vm1409_vm3 = vcmask 57344  }
  0x29   :  { %536 = vmatprep.mubr.f32.mxu1 %v3699_v2  ;;  %377 = vperm.xlu0 %3548, %v375_v3   ;;  %v3147_v6 = vpack.c.bf16 %v83_v5, %v82_v4  ;;  %v85_v8 = vld [vmem:[#allocation2 + $0x18] sm:$0xff]  ;;  %v228_v11 = vld [vmem:[%s4894_s5 + $0x20] sm:$0xff]  ;;  %v86_v13 = vld [vmem:[#allocation2 + $0x20] sm:$0xff]  ;;  %v373_v62 = vand.u32 127, %v372_v61  ;;  %vm1498_vm4 = vcmask 64512   ;;  %vm2092_vm5 = vcmask 1041409  }
  0x2a   :  { %2648 = vmatprep.mubr.msk.f32.mxu0 %vm3700_vm0, %v3699_v2  ;;  %v3150_v9 = vpack.c.bf16 %v85_v8, %v84_v7  ;;  %v225_v10 = vld [vmem:[%s4894_s5 + $0x8] sm:$0xff]  ;;  %v224_v12 = vld [vmem:[%s4894_s5] sm:$0xff]  ;;  %v87_v14 = vld [vmem:[#allocation2 + $0x28] sm:$0xff]  ;;  %vm2095_vm6 = vcmask 1042434   ;;  %vm2098_vm7 = vcmask 1043459   ;;  %vm2101_vm8 = vcmask 1044484  }
  0x2b   :  { %3148 = vmatpush3.bf16.msra.mxu0 %v3147_v6  ;;  %v3155_v15 = vpack.c.bf16 %v228_v11, %v225_v10  ;;  %v227_v16 = vld [vmem:[%s4894_s5 + $0x18] sm:$0xff]  ;;  %v234_v19 = vld [vmem:[%s4894_s5 + $0x50] sm:$0xff]  ;;  %v233_v22 = vld [vmem:[%s4894_s5 + $0x48] sm:$0xff]  ;;  %v3153_v23 = vpack.c.bf16 %v87_v14, %v86_v13  ;;  %vm2104_vm9 = vcmask 1045509   ;;  %vm2107_vm10 = vcmask 1046534  }
  0x2c   :  { %3149 = vmatprep.subr.bf16.mxu0 %v3698_v1  ;;  %v3157_v17 = vpack.c.bf16 %v227_v16, %v224_v12  ;;  %v231_v18 = vld [vmem:[%s4894_s5 + $0x38] sm:$0xff]  ;;  %v230_v20 = vld [vmem:[%s4894_s5 + $0x30] sm:$0xff]  ;;  %v237_v25 = vld [vmem:[%s4894_s5 + $0x68] sm:$0xff]  ;;  %vm2110_vm11 = vcmask 1047559  }
  0x2d   :  { %3156 = vmatprep.subr.bf16.mxu1 %v3155_v15  ;;  %v3159_v21 = vpack.c.bf16 %v234_v19, %v231_v18  ;;  %v3161_v24 = vpack.c.bf16 %v233_v22, %v230_v20  ;;  %v240_v26 = vld [vmem:[%s4894_s5 + $0x80] sm:$0xff]  ;;  %v239_v29 = vld [vmem:[%s4894_s5 + $0x78] sm:$0xff]  ;;  %v246_v32 = vld [vmem:[%s4894_s5 + $0xb0] sm:$0xff] }
  0x2e   :  { %3158 = vmatpush1.bf16.msra.mxu1 %v3157_v17  ;;  %v236_v27 = vld [vmem:[%s4894_s5 + $0x60] sm:$0xff]  ;;  %v3163_v28 = vpack.c.bf16 %v240_v26, %v237_v25  ;;  %v243_v31 = vld [vmem:[%s4894_s5 + $0x98] sm:$0xff]  ;;  %v242_v33 = vld [vmem:[%s4894_s5 + $0x90] sm:$0xff] }
  0x2f   :  { %3151 = vmatpush3.bf16.msra.mxu0 %v3150_v9  ;;  %3160 = vmatprep.subr.bf16.mxu1 %v3159_v21  ;;  %v3165_v30 = vpack.c.bf16 %v239_v29, %v236_v27  ;;  %v3167_v34 = vpack.c.bf16 %v246_v32, %v243_v31  ;;  %v245_v35 = vld [vmem:[%s4894_s5 + $0xa8] sm:$0xff]  ;;  %v252_v38 = vld [vmem:[%s4894_s5 + $0xe0] sm:$0xff]  ;;  %v251_v41 = vld [vmem:[%s4894_s5 + $0xd8] sm:$0xff] }
  0x30   :  { %3152 = vmatprep.subr.bf16.mxu0 %v3698_v1  ;;  %v3169_v36 = vpack.c.bf16 %v245_v35, %v242_v33  ;;  %v249_v37 = vld [vmem:[%s4894_s5 + $0xc8] sm:$0xff]  ;;  %v248_v39 = vld [vmem:[%s4894_s5 + $0xc0] sm:$0xff]  ;;  %v255_v43 = vld [vmem:[%s4894_s5 + $0xf8] sm:$0xff] }
  0x31   :  { %v3171_v40 = vpack.c.bf16 %v252_v38, %v249_v37  ;;  %v3173_v42 = vpack.c.bf16 %v251_v41, %v248_v39  ;;  %v258_v44 = vld [vmem:[%s4894_s5 + $0x110] sm:$0xff]  ;;  %v257_v47 = vld [vmem:[%s4894_s5 + $0x108] sm:$0xff]  ;;  %v264_v50 = vld [vmem:[%s4894_s5 + $0x140] sm:$0xff] }
  0x32   :  { %3162 = vmatpush1.bf16.msra.mxu1 %v3161_v24  ;;  %v254_v45 = vld [vmem:[%s4894_s5 + $0xf0] sm:$0xff]  ;;  %v3175_v46 = vpack.c.bf16 %v258_v44, %v255_v43  ;;  %v261_v49 = vld [vmem:[%s4894_s5 + $0x128] sm:$0xff]  ;;  %v260_v51 = vld [vmem:[%s4894_s5 + $0x120] sm:$0xff] }
  0x33   :  { %3154 = vmatpush3.bf16.msra.mxu0 %v3153_v23  ;;  %3164 = vmatprep.subr.bf16.mxu1 %v3163_v28  ;;  %v3177_v48 = vpack.c.bf16 %v257_v47, %v254_v45  ;;  %v3179_v52 = vpack.c.bf16 %v264_v50, %v261_v49  ;;  %v263_v53 = vld [vmem:[%s4894_s5 + $0x138] sm:$0xff]  ;;  %v270_v56 = vld [vmem:[%s4894_s5 + $0x170] sm:$0xff]  ;;  %v269_v59 = vld [vmem:[%s4894_s5 + $0x168] sm:$0xff] }
  0x34   :  { %3187 = vmatprep.subr.bf16.mxu0 %v3698_v1  ;;  %v3181_v54 = vpack.c.bf16 %v263_v53, %v260_v51  ;;  %v267_v55 = vld [vmem:[%s4894_s5 + $0x158] sm:$0xff]  ;;  %v266_v57 = vld [vmem:[%s4894_s5 + $0x150] sm:$0xff]  ;;  %v229_v0 = vld [vmem:[%s4894_s5 + $0x28] sm:$0xff] }
  0x35   :  { %v3183_v58 = vpack.c.bf16 %v270_v56, %v267_v55  ;;  %v3185_v60 = vpack.c.bf16 %v269_v59, %v266_v57  ;;  %v226_v63 = vld [vmem:[%s4894_s5 + $0x10] sm:$0xff]  ;;  %v232_v5 = vld [vmem:[%s4894_s5 + $0x40] sm:$0xff]  ;;  %v235_v6 = vld [vmem:[%s4894_s5 + $0x58] sm:$0xff] }
  0x36   :  { %3166 = vmatpush1.bf16.msra.mxu1 %v3165_v30  ;;  %v3188_v4 = vpack.c.bf16 %v229_v0, %v226_v63  ;;  %v3191_v8 = vpack.c.bf16 %v235_v6, %v232_v5  ;;  %v238_v9 = vld [vmem:[%s4894_s5 + $0x70] sm:$0xff]  ;;  %v241_v10 = vld [vmem:[%s4894_s5 + $0x88] sm:$0xff]  ;;  %v244_v12 = vld [vmem:[%s4894_s5 + $0xa0] sm:$0xff] }
  0x37   :  { %3168 = vmatprep.subr.bf16.mxu1 %v3167_v34  ;;  %v3194_v11 = vpack.c.bf16 %v241_v10, %v238_v9  ;;  %v247_v13 = vld [vmem:[%s4894_s5 + $0xb8] sm:$0xff]  ;;  %v250_v15 = vld [vmem:[%s4894_s5 + $0xd0] sm:$0xff]  ;;  %v253_v16 = vld [vmem:[%s4894_s5 + $0xe8] sm:$0xff] }
  0x38   :  { %v3197_v14 = vpack.c.bf16 %v247_v13, %v244_v12  ;;  %v3200_v17 = vpack.c.bf16 %v253_v16, %v250_v15  ;;  %v256_v18 = vld [vmem:[%s4894_s5 + $0x100] sm:$0xff]  ;;  %v259_v19 = vld [vmem:[%s4894_s5 + $0x118] sm:$0xff]  ;;  %v262_v21 = vld [vmem:[%s4894_s5 + $0x130] sm:$0xff] }
  0x39   :  { %v3203_v20 = vpack.c.bf16 %v259_v19, %v256_v18  ;;  %v265_v22 = vld [vmem:[%s4894_s5 + $0x148] sm:$0xff]  ;;  %v268_v24 = vld [vmem:[%s4894_s5 + $0x160] sm:$0xff]  ;;  %v271_v25 = vld [vmem:[%s4894_s5 + $0x178] sm:$0xff] }
  0x3a   :  { %3170 = vmatpush1.bf16.msra.mxu1 %v3169_v36  ;;  %v3206_v23 = vpack.c.bf16 %v265_v22, %v262_v21  ;;  %v3209_v26 = vpack.c.bf16 %v271_v25, %v268_v24  ;;  %v273_v27 = vld [vmem:[%s4895_s6 + $0x8] sm:$0xff]  ;;  %v276_v28 = vld [vmem:[%s4895_s6 + $0x20] sm:$0xff]  ;;  %v275_v31 = vld [vmem:[%s4895_s6 + $0x18] sm:$0xff] }
  0x3b   :  { %3172 = vmatprep.subr.bf16.mxu1 %v3171_v40  ;;  %v3211_v29 = vpack.c.bf16 %v276_v28, %v273_v27  ;;  %v272_v30 = vld [vmem:[%s4895_s6] sm:$0xff]  ;;  %v274_v32 = vld [vmem:[%s4895_s6 + $0x10] sm:$0xff]  ;;  %v277_v33 = vld [vmem:[%s4895_s6 + $0x28] sm:$0xff] }
  0x3c   :  { %v279_v34 = vld [vmem:[%s4895_s6 + $0x38] sm:$0xff]  ;;  %v282_v35 = vld [vmem:[%s4895_s6 + $0x50] sm:$0xff]  ;;  %v3213_v36 = vpack.c.bf16 %v275_v31, %v272_v30  ;;  %v3244_v38 = vpack.c.bf16 %v277_v33, %v274_v32  ;;  %v281_v40 = vld [vmem:[%s4895_s6 + $0x48] sm:$0xff] }
  0x3d   :  { %v278_v37 = vld [vmem:[%s4895_s6 + $0x30] sm:$0xff]  ;;  %v3215_v39 = vpack.c.bf16 %v282_v35, %v279_v34  ;;  %v280_v41 = vld [vmem:[%s4895_s6 + $0x40] sm:$0xff]  ;;  %v285_v44 = vld [vmem:[%s4895_s6 + $0x68] sm:$0xff] }
  0x3e   :  { %3174 = vmatpush1.bf16.msra.mxu1 %v3173_v42  ;;  %v283_v42 = vld [vmem:[%s4895_s6 + $0x58] sm:$0xff]  ;;  %v288_v45 = vld [vmem:[%s4895_s6 + $0x80] sm:$0xff]  ;;  %v3217_v47 = vpack.c.bf16 %v281_v40, %v278_v37  ;;  %v289_v53 = vld [vmem:[%s4895_s6 + $0x88] sm:$0xff] }
  0x3f   :  { %3176 = vmatprep.subr.bf16.mxu1 %v3175_v46  ;;  %v3247_v49 = vpack.c.bf16 %v283_v42, %v280_v41  ;;  %v3219_v50 = vpack.c.bf16 %v288_v45, %v285_v44  ;;  %v287_v51 = vld [vmem:[%s4895_s6 + $0x78] sm:$0xff]  ;;  %v294_v55 = vld [vmem:[%s4895_s6 + $0xb0] sm:$0xff]  ;;  %v297_v0 = vld [vmem:[%s4895_s6 + $0xc8] sm:$0xff] }
  0x40   :  { %v290_v57 = vld [vmem:[%s4895_s6 + $0x90] sm:$0xff]  ;;  %v295_v63 = vld [vmem:[%s4895_s6 + $0xb8] sm:$0xff]  ;;  %v296_v5 = vld [vmem:[%s4895_s6 + $0xc0] sm:$0xff] }
  0x41   :  { %v298_v9 = vld [vmem:[%s4895_s6 + $0xd0] sm:$0xff]  ;;  %v301_v10 = vld [vmem:[%s4895_s6 + $0xe8] sm:$0xff]  ;;  %v304_v18 = vld [vmem:[%s4895_s6 + $0x100] sm:$0xff] }
  0x42   :  { %3178 = vmatpush1.bf16.msra.mxu1 %v3177_v48  ;;  %v284_v48 = vld [vmem:[%s4895_s6 + $0x60] sm:$0xff]  ;;  %v306_v12 = vld [vmem:[%s4895_s6 + $0x110] sm:$0xff]  ;;  %v3256_v15 = vpack.c.bf16 %v301_v10, %v298_v9  ;;  %v307_v19 = vld [vmem:[%s4895_s6 + $0x118] sm:$0xff] }
  0x43   :  { %3180 = vmatprep.subr.bf16.mxu1 %v3179_v52  ;;  %v286_v52 = vld [vmem:[%s4895_s6 + $0x70] sm:$0xff]  ;;  %v3221_v56 = vpack.c.bf16 %v287_v51, %v284_v48  ;;  %v312_v21 = vld [vmem:[%s4895_s6 + $0x140] sm:$0xff]  ;;  %v3259_v24 = vpack.c.bf16 %v307_v19, %v304_v18  ;;  %v313_v28 = vld [vmem:[%s4895_s6 + $0x148] sm:$0xff] }
  0x44   :  { %v310_v27 = vld [vmem:[%s4895_s6 + $0x130] sm:$0xff]  ;;  %v317_v35 = vld [vmem:[%s4895_s6 + $0x168] sm:$0xff]  ;;  %v319_v37 = vld [vmem:[%s4895_s6 + $0x178] sm:$0xff] }
  0x45   :  { %v318_v30 = vld [vmem:[%s4895_s6 + $0x170] sm:$0xff]  ;;  %v3262_v33 = vpack.c.bf16 %v313_v28, %v310_v27  ;;  %v4126_v40 = vld [vmem:[%s4891_s2] sm:$0xff]  ;;  %v97_v42 = vld [vmem:[%s4893_s4 + $0x8] sm:$0xff]  ;;  %v458_v28 = vshrl.u32 %v372_v61, 7 }
  0x46   :  { %3182 = vmatpush1.bf16.msra.mxu1 %v3181_v54  ;;  %v291_v54 = vld [vmem:[%s4895_s6 + $0x98] sm:$0xff]  ;;  %v314_v32 = vld [vmem:[%s4895_s6 + $0x150] sm:$0xff]  ;;  %v96_v41 = vld [vmem:[%s4893_s4] sm:$0xff] }
  0x47   :  { %3184 = vmatprep.subr.bf16.mxu1 %v3183_v58  ;;  %v3250_v58 = vpack.c.bf16 %v289_v53, %v286_v52  ;;  %v3223_v59 = vpack.c.bf16 %v294_v55, %v291_v54  ;;  %v112_v44 = vld [vmem:[%s4893_s4 + $0x80] sm:$0xff]  ;;  %v113_v45 = vld [vmem:[%s4893_s4 + $0x88] sm:$0xff]  ;;  %v99_v48 = vld [vmem:[%s4893_s4 + $0x18] sm:$0xff] }
  0x48   :  { %v115_v51 = vld [vmem:[%s4893_s4 + $0x98] sm:$0xff]  ;;  %v100_v53 = vld [vmem:[%s4893_s4 + $0x20] sm:$0xff]  ;;  %v101_v54 = vld [vmem:[%s4893_s4 + $0x28] sm:$0xff] }
  0x49   :  { %v3274_v55 = vpack.c.bf16 %v101_v54, %v100_v53  ;;  %v106_v10 = vld [vmem:[%s4893_s4 + $0x50] sm:$0xff]  ;;  %v124_v19 = vld [vmem:[%s4893_s4 + $0xe0] sm:$0xff] }
  0x4a   :  { %3186 = vmatpush1.bf16.msra.mxu1 %v3185_v60  ;;  %v293_v60 = vld [vmem:[%s4895_s6 + $0xa8] sm:$0xff] }
  0x4b   :  { %3212 = vmatprep.subr.bf16.mxu1 %v3211_v29  ;;  %v315_v29 = vld [vmem:[%s4895_s6 + $0x158] sm:$0xff] }
  0x4c   :  { %v3239_v34 = vpack.c.bf16 %v318_v30, %v315_v29  ;;  %v467_v29 = vsub.s32 2, %v458_v28  ;;  %v320_v30 = vld [vmem:[%s4896_s7] sm:$0x7] }
  0xa8   :  { %v378_v3 = vpop.permute.xlu0 %377 }
  0xa9   :  { %vm379_vm2 = vcmp.eq.s32.totalorder %v373_v62, %v378_v3  ;;  %v292_v62 = vld [vmem:[%s4895_s6 + $0xa0] sm:$0xff] }
  0xaa   :  { %v2378_v7 = vsel %vm379_vm2, 1.0, %v3699_v2  ;;  %v300_v3 = vld [vmem:[%s4895_s6 + $0xe0] sm:$0xff]  ;;  %v3253_v6 = vpack.c.bf16 %v295_v63, %v292_v62  ;;  %v118_v63 = vld [vmem:[%s4893_s4 + $0xb0] sm:$0xff] }
  0xab   :  { %2649 = vmatmul.mubr.msk.f32.vlgmr.msra.gmra.mrb[0].mxu0 %vm382_vm1, %v2378_v7  ;;  %v3227_v7 = vpack.c.bf16 %v300_v3, %v297_v0  ;;  %v119_v0 = vld [vmem:[%s4893_s4 + $0xb8] sm:$0xff] }
  0xac   :  { %3189 = vmatpush3.bf16.msra.mxu0 %v3188_v4  ;;  %2683 = vmatprep.mubr.msk.f32.mxu0 %vm3700_vm0, %v3699_v2  ;;  %v3225_v4 = vpack.c.bf16 %v293_v60, %v290_v57  ;;  %v117_v57 = vld [vmem:[%s4893_s4 + $0xa8] sm:$0xff]  ;;  %v103_v60 = vld [vmem:[%s4893_s4 + $0x38] sm:$0xff]  ;;  %v3301_v3 = vpack.c.bf16 %v119_v0, %v118_v63 }
  0xad   :  { %3190 = vmatprep.subr.bf16.mxu0 %v3698_v1 }
  0xb0   :  { %3192 = vmatpush3.bf16.msra.mxu0 %v3191_v8  ;;  %v299_v8 = vld [vmem:[%s4895_s6 + $0xd8] sm:$0xff] }
  0xb1   :  { %3193 = vmatprep.subr.bf16.mxu0 %v3698_v1  ;;  %v3229_v13 = vpack.c.bf16 %v299_v8, %v296_v5  ;;  %v105_v5 = vld [vmem:[%s4893_s4 + $0x48] sm:$0xff] }
  0xb2   :  { %v121_v8 = vld [vmem:[%s4893_s4 + $0xc8] sm:$0xff] }
  0xb4   :  { %3195 = vmatpush3.bf16.msra.mxu0 %v3194_v11  ;;  %v303_v11 = vld [vmem:[%s4895_s6 + $0xf8] sm:$0xff] }
  0xb5   :  { %3196 = vmatprep.subr.bf16.mxu0 %v3698_v1  ;;  %v3231_v16 = vpack.c.bf16 %v306_v12, %v303_v11  ;;  %v107_v11 = vld [vmem:[%s4893_s4 + $0x58] sm:$0xff] }
  0xb6   :  { %v3283_v12 = vpack.c.bf16 %v107_v11, %v106_v10  ;;  %v128_v10 = vld [vmem:[%s4893_s4 + $0x100] sm:$0xff]  ;;  %v129_v11 = vld [vmem:[%s4893_s4 + $0x108] sm:$0xff] }
  0xb8   :  { %3198 = vmatpush3.bf16.msra.mxu0 %v3197_v14  ;;  %v302_v14 = vld [vmem:[%s4895_s6 + $0xf0] sm:$0xff] }
  0xb9   :  { %3199 = vmatprep.subr.bf16.mxu0 %v3698_v1 }
  0xbc   :  { %3201 = vmatpush3.bf16.msra.mxu0 %v3200_v17  ;;  %v305_v17 = vld [vmem:[%s4895_s6 + $0x108] sm:$0xff] }
  0xbd   :  { %3202 = vmatprep.subr.bf16.mxu0 %v3698_v1  ;;  %v3233_v22 = vpack.c.bf16 %v305_v17, %v302_v14  ;;  %v123_v14 = vld [vmem:[%s4893_s4 + $0xd8] sm:$0xff]  ;;  %v109_v17 = vld [vmem:[%s4893_s4 + $0x68] sm:$0xff] }
  0xc0   :  { %3204 = vmatpush3.bf16.msra.mxu0 %v3203_v20  ;;  %v309_v20 = vld [vmem:[%s4895_s6 + $0x128] sm:$0xff] }
  0xc1   :  { %3205 = vmatprep.subr.bf16.mxu0 %v3698_v1  ;;  %v3235_v25 = vpack.c.bf16 %v312_v21, %v309_v20  ;;  %v125_v20 = vld [vmem:[%s4893_s4 + $0xe8] sm:$0xff] }
  0xc2   :  { %v3310_v21 = vpack.c.bf16 %v125_v20, %v124_v19 }
  0xc4   :  { %3207 = vmatpush3.bf16.msra.mxu0 %v3206_v23  ;;  %v308_v23 = vld [vmem:[%s4895_s6 + $0x120] sm:$0xff] }
  0xc5   :  { %3208 = vmatprep.subr.bf16.mxu0 %v3698_v1 }
  0xc8   :  { %3210 = vmatpush3.bf16.msra.mxu0 %v3209_v26  ;;  %v311_v26 = vld [vmem:[%s4895_s6 + $0x138] sm:$0xff] }
  0xc9   :  { %3243 = vmatprep.subr.bf16.mxu0 %v3698_v1  ;;  %v3237_v31 = vpack.c.bf16 %v311_v26, %v308_v23  ;;  %v111_v23 = vld [vmem:[%s4893_s4 + $0x78] sm:$0xff] }
  0xca   :  { %v127_v26 = vld [vmem:[%s4893_s4 + $0xf8] sm:$0xff] }
 0x17e   :  { %v452_v43 = vpop.f32.mrb[0].mxu0 }
 0x17f   :  { %v2650_v46 = vpop.f32.mrb[1].mxu0  ;;  %537 = vmatmul.mubr.f32.vlgmr.msra.gmra.mrb[0].mxu1 %v452_v43  ;;  %2684 = vmatmul.mubr.f32.vlgmr.msra.gmra.mrb[2].mxu0 %v452_v43  ;;  %v3268_v43 = vpack.c.bf16 %v97_v42, %v96_v41 }
 0x180   :  { %3214 = vmatpush1.bf16.msra.mxu1 %v3213_v36  ;;  %3245 = vmatpush3.bf16.msra.mxu0 %v3244_v38  ;;  %v316_v36 = vld [vmem:[%s4895_s6 + $0x160] sm:$0xff]  ;;  %v3241_v38 = vpack.c.bf16 %v317_v35, %v314_v32  ;;  %v3292_v46 = vpack.c.bf16 %v113_v45, %v112_v44  ;;  %v459_v35 = vsub.s32 0, %v458_v28 }
 0x181   :  { %3216 = vmatprep.subr.bf16.mxu1 %v3215_v39  ;;  %3246 = vmatprep.subr.bf16.mxu0 %v3698_v1  ;;  %v3265_v39 = vpack.c.bf16 %v319_v37, %v316_v36  ;;  %v321_v36 = vld [vmem:[%s4897_s8] sm:$0x7]  ;;  %v463_v37 = vsub.s32 1, %v458_v28 }
 0x182   :  { %693 = vmatprep.mubr.f32.mxu1 %v3699_v2  ;;  %2718 = vmatprep.mubr.msk.f32.mxu0 %vm3700_vm0, %v3699_v2 }
 0x183   :  { %v464_v41 = vrot.slane %v320_v30, %v463_v37  ;;  %v621_v42 = vrot.slane %v321_v36, %v463_v37  ;;  %v137_v37 = vld [vmem:[%s4893_s4 + $0x148] sm:$0xff] }
 0x184   :  { %3218 = vmatpush1.bf16.msra.mxu1 %v3217_v47  ;;  %3248 = vmatpush3.bf16.msra.mxu0 %v3247_v49  ;;  %v98_v47 = vld [vmem:[%s4893_s4 + $0x10] sm:$0xff] }
 0x185   :  { %3220 = vmatprep.subr.bf16.mxu1 %v3219_v50  ;;  %3249 = vmatprep.subr.bf16.mxu0 %v3698_v1  ;;  %v3271_v49 = vpack.c.bf16 %v99_v48, %v98_v47  ;;  %v114_v50 = vld [vmem:[%s4893_s4 + $0x90] sm:$0xff]  ;;  %v3533_v44 = vadd.f32 %v621_v42, %v464_v41  ;;  %v153_v41 = vld [vmem:[%s4893_s4 + $0x1c8] sm:$0xff] }
 0x186   :  { %v3295_v52 = vpack.c.bf16 %v115_v51, %v114_v50 }
 0x188   :  { %3222 = vmatpush1.bf16.msra.mxu1 %v3221_v56  ;;  %3251 = vmatpush3.bf16.msra.mxu0 %v3250_v58  ;;  %v116_v56 = vld [vmem:[%s4893_s4 + $0xa0] sm:$0xff] }
 0x189   :  { %3224 = vmatprep.subr.bf16.mxu1 %v3223_v59  ;;  %3252 = vmatprep.subr.bf16.mxu0 %v3698_v1  ;;  %v3298_v58 = vpack.c.bf16 %v117_v57, %v116_v56  ;;  %v102_v59 = vld [vmem:[%s4893_s4 + $0x30] sm:$0xff] }
 0x18a   :  { %v3277_v62 = vpack.c.bf16 %v103_v60, %v102_v59 }
 0x18c   :  { %3226 = vmatpush1.bf16.msra.mxu1 %v3225_v4  ;;  %3254 = vmatpush3.bf16.msra.mxu0 %v3253_v6  ;;  %v104_v4 = vld [vmem:[%s4893_s4 + $0x40] sm:$0xff] }
 0x18d   :  { %3228 = vmatprep.subr.bf16.mxu1 %v3227_v7  ;;  %3255 = vmatprep.subr.bf16.mxu0 %v3698_v1  ;;  %v3280_v6 = vpack.c.bf16 %v105_v5, %v104_v4  ;;  %v120_v7 = vld [vmem:[%s4893_s4 + $0xc0] sm:$0xff] }
 0x18e   :  { %v3304_v9 = vpack.c.bf16 %v121_v8, %v120_v7 }
 0x190   :  { %3230 = vmatpush1.bf16.msra.mxu1 %v3229_v13  ;;  %3257 = vmatpush3.bf16.msra.mxu0 %v3256_v15  ;;  %v122_v13 = vld [vmem:[%s4893_s4 + $0xd0] sm:$0xff] }
 0x191   :  { %3232 = vmatprep.subr.bf16.mxu1 %v3231_v16  ;;  %3258 = vmatprep.subr.bf16.mxu0 %v3698_v1  ;;  %v3307_v15 = vpack.c.bf16 %v123_v14, %v122_v13  ;;  %v108_v16 = vld [vmem:[%s4893_s4 + $0x60] sm:$0xff]  ;;  %v145_v13 = vld [vmem:[%s4893_s4 + $0x188] sm:$0xff]  ;;  %v3316_v14 = vpack.c.bf16 %v129_v11, %v128_v10 }
 0x192   :  { %v3286_v18 = vpack.c.bf16 %v109_v17, %v108_v16  ;;  %v130_v17 = vld [vmem:[%s4893_s4 + $0x110] sm:$0xff] }
 0x194   :  { %3234 = vmatpush1.bf16.msra.mxu1 %v3233_v22  ;;  %3260 = vmatpush3.bf16.msra.mxu0 %v3259_v24  ;;  %v110_v22 = vld [vmem:[%s4893_s4 + $0x70] sm:$0xff] }
 0x195   :  { %3236 = vmatprep.subr.bf16.mxu1 %v3235_v25  ;;  %3261 = vmatprep.subr.bf16.mxu0 %v3698_v1  ;;  %v126_v24 = vld [vmem:[%s4893_s4 + $0xf0] sm:$0xff]  ;;  %v3289_v25 = vpack.c.bf16 %v111_v23, %v110_v22  ;;  %v147_v22 = vld [vmem:[%s4893_s4 + $0x198] sm:$0xff] }
 0x196   :  { %v3313_v27 = vpack.c.bf16 %v127_v26, %v126_v24  ;;  %v132_v24 = vld [vmem:[%s4893_s4 + $0x120] sm:$0xff] }
 0x198   :  { %3238 = vmatpush1.bf16.msra.mxu1 %v3237_v31  ;;  %3263 = vmatpush3.bf16.msra.mxu0 %v3262_v33  ;;  %v468_v31 = vrot.slane %v320_v30, %v467_v29 }
 0x199   :  { %3240 = vmatprep.subr.bf16.mxu1 %v3239_v34  ;;  %3264 = vmatprep.subr.bf16.mxu0 %v3698_v1 }
 0x19c   :  { %3242 = vmatpush1.bf16.msra.mxu1 %v3241_v38  ;;  %3266 = vmatpush3.bf16.msra.mxu0 %v3265_v39  ;;  %v460_v38 = vrot.slane %v320_v30, %v459_v35  ;;  %v617_v39 = vrot.slane %v321_v36, %v459_v35  ;;  %v134_v30 = vld [vmem:[%s4893_s4 + $0x130] sm:$0xff] }
 0x19d   :  { %3267 = vmatprep.subr.bf16.mxu1 %v3698_v1  ;;  %3291 = vmatprep.subr.bf16.mxu0 %v3698_v1 }
 0x19e   :  { %v3531_v61 = vadd.f32 %v617_v39, %v460_v38  ;;  %v152_v39 = vld [vmem:[%s4893_s4 + $0x1c0] sm:$0xff] }
 0x19f   :  { %694 = vmatmul.mubr.f32.vlgmr.msra.gmra.mrb[0].mxu1 %v4126_v40  ;;  %2719 = vmatmul.mubr.f32.vlgmr.msra.gmra.mrb[4].mxu0 %v4126_v40 }
 0x1a0   :  { %2753 = vmatprep.mubr.msk.f32.mxu1 %vm3700_vm0, %v3699_v2  ;;  %2788 = vmatprep.mubr.msk.f32.mxu0 %vm3700_vm0, %v3699_v2 }
 0x1a1   :  { %3269 = vmatpush3.bf16.msra.mxu1 %v3268_v43  ;;  %3293 = vmatpush3.bf16.msra.mxu0 %v3292_v46  ;;  %v625_v43 = vrot.slane %v321_v36, %v467_v29  ;;  %v136_v36 = vld [vmem:[%s4893_s4 + $0x140] sm:$0xff] }
 0x1a2   :  { %3270 = vmatprep.subr.bf16.mxu1 %v3698_v1  ;;  %3294 = vmatprep.subr.bf16.mxu0 %v3698_v1  ;;  %v3328_v42 = vpack.c.bf16 %v137_v37, %v136_v36  ;;  %v187_v36 = vld [vmem:[%s4893_s4 + $0x2d8] sm:$0xff] }
 0x1a5   :  { %3272 = vmatpush3.bf16.msra.mxu1 %v3271_v49  ;;  %3296 = vmatpush3.bf16.msra.mxu0 %v3295_v52 }
 0x1a6   :  { %3273 = vmatprep.subr.bf16.mxu1 %v3698_v1  ;;  %3297 = vmatprep.subr.bf16.mxu0 %v3698_v1 }
 0x1a9   :  { %3275 = vmatpush3.bf16.msra.mxu1 %v3274_v55  ;;  %3299 = vmatpush3.bf16.msra.mxu0 %v3298_v58 }
 0x1aa   :  { %3276 = vmatprep.subr.bf16.mxu1 %v3698_v1  ;;  %3300 = vmatprep.subr.bf16.mxu0 %v3698_v1 }
 0x1ad   :  { %3278 = vmatpush3.bf16.msra.mxu1 %v3277_v62  ;;  %3302 = vmatpush3.bf16.msra.mxu0 %v3301_v3  ;;  %v3701_v62 = vmov 1966171168  }
 0x1ae   :  { %3279 = vmatprep.subr.bf16.mxu1 %v3698_v1  ;;  %3303 = vmatprep.subr.bf16.mxu0 %v3698_v1  ;;  %v794_v63 = vunpack.c.l.s4 %v3701_v62  ;;  %v161_v62 = vld [vmem:[%s4893_s4 + $0x208] sm:$0xff] }
 0x1b0   :  { %v795_v3 = vunpack.c.0.s8 %v794_v63 }
 0x1b1   :  { %3281 = vmatpush3.bf16.msra.mxu1 %v3280_v6  ;;  %3305 = vmatpush3.bf16.msra.mxu0 %v3304_v9 }
 0x1b2   :  { %3282 = vmatprep.subr.bf16.mxu1 %v3698_v1  ;;  %3306 = vmatprep.subr.bf16.mxu0 %v3698_v1  ;;  %v4255_v6 = vsub.s32 %v795_v3, %v458_v28  ;;  %v149_v28 = vld [vmem:[%s4893_s4 + $0x1a8] sm:$0xff] }
 0x1b3   :  { %v177_v3 = vld [vmem:[%s4893_s4 + $0x288] sm:$0xff] }
 0x1b5   :  { %3284 = vmatpush3.bf16.msra.mxu1 %v3283_v12  ;;  %3308 = vmatpush3.bf16.msra.mxu0 %v3307_v15 }
 0x1b6   :  { %3285 = vmatprep.subr.bf16.mxu1 %v3698_v1  ;;  %3309 = vmatprep.subr.bf16.mxu0 %v3698_v1 }
 0x1b9   :  { %3287 = vmatpush3.bf16.msra.mxu1 %v3286_v18  ;;  %3311 = vmatpush3.bf16.msra.mxu0 %v3310_v21  ;;  %v131_v18 = vld [vmem:[%s4893_s4 + $0x118] sm:$0xff]  ;;  %v146_v21 = vld [vmem:[%s4893_s4 + $0x190] sm:$0xff] }
 0x1ba   :  { %3288 = vmatprep.subr.bf16.mxu1 %v3698_v1  ;;  %3312 = vmatprep.subr.bf16.mxu0 %v3698_v1  ;;  %v3319_v23 = vpack.c.bf16 %v131_v18, %v130_v17  ;;  %v3343_v26 = vpack.c.bf16 %v147_v22, %v146_v21  ;;  %v180_v17 = vld [vmem:[%s4893_s4 + $0x2a0] sm:$0xff]  ;;  %v181_v18 = vld [vmem:[%s4893_s4 + $0x2a8] sm:$0xff]  ;;  %v167_v21 = vld [vmem:[%s4893_s4 + $0x238] sm:$0xff] }
 0x1bb   :  { %v3394_v22 = vpack.c.bf16 %v181_v18, %v180_v17  ;;  %v200_v18 = vld [vmem:[%s4893_s4 + $0x340] sm:$0xff] }
 0x1bd   :  { %3290 = vmatpush3.bf16.msra.mxu1 %v3289_v25  ;;  %3314 = vmatpush3.bf16.msra.mxu0 %v3313_v27  ;;  %v133_v25 = vld [vmem:[%s4893_s4 + $0x128] sm:$0xff]  ;;  %v148_v27 = vld [vmem:[%s4893_s4 + $0x1a0] sm:$0xff] }
 0x1be   :  { %3315 = vmatprep.subr.bf16.mxu1 %v3698_v1  ;;  %3339 = vmatprep.subr.bf16.mxu0 %v3698_v1  ;;  %v3322_v29 = vpack.c.bf16 %v133_v25, %v132_v24  ;;  %v183_v24 = vld [vmem:[%s4893_s4 + $0x2b8] sm:$0xff] }
 0x252   :  { %v609_v32 = vpop.f32.mrb[2].mxu0 }
 0x253   :  { %v610_v33 = vadd.f32 %v609_v32, %v468_v31  ;;  %v2685_v34 = vpop.f32.mrb[3].mxu0  ;;  %v135_v31 = vld [vmem:[%s4893_s4 + $0x138] sm:$0xff]  ;;  %v3346_v32 = vpack.c.bf16 %v149_v28, %v148_v27  ;;  %v169_v27 = vld [vmem:[%s4893_s4 + $0x248] sm:$0xff] }
 0x254   :  { %v151_v34 = vld [vmem:[%s4893_s4 + $0x1b8] sm:$0xff]  ;;  %v3325_v35 = vpack.c.bf16 %v135_v31, %v134_v30  ;;  %v185_v30 = vld [vmem:[%s4893_s4 + $0x2c8] sm:$0xff] }
 0x272   :  { %v695_v45 = vpop.f32.mrb[0].mxu1  ;;  %v766_v46 = vpop.f32.mrb[4].mxu0 }
 0x273   :  { %v3532_v47 = vadd.f32 %v3531_v61, %v695_v45  ;;  %v697_v48 = vpop.f32.mrb[1].mxu1  ;;  %v767_v49 = vadd.f32 %v766_v46, %v625_v43  ;;  %v2720_v50 = vpop.f32.mrb[5].mxu0  ;;  %v138_v61 = vld [vmem:[%s4893_s4 + $0x150] sm:$0xff]  ;;  %v139_v43 = vld [vmem:[%s4893_s4 + $0x158] sm:$0xff] }
 0x274   :  { %v3534_v51 = vadd.f32 %v3533_v44, %v697_v48  ;;  %v3352_v44 = vpack.c.bf16 %v153_v41, %v152_v39  ;;  %v154_v45 = vld [vmem:[%s4893_s4 + $0x1d0] sm:$0xff]  ;;  %v155_v46 = vld [vmem:[%s4893_s4 + $0x1d8] sm:$0xff]  ;;  %v140_v48 = vld [vmem:[%s4893_s4 + $0x160] sm:$0xff] }
 0x275   :  { %v2380_v52 = vmul.f32 -1.442695, %v3532_v47  ;;  %v3331_v47 = vpack.c.bf16 %v139_v43, %v138_v61  ;;  %v3355_v50 = vpack.c.bf16 %v155_v46, %v154_v45  ;;  %v173_v39 = vld [vmem:[%s4893_s4 + $0x268] sm:$0xff]  ;;  %v174_v45 = vld [vmem:[%s4893_s4 + $0x270] sm:$0xff]  ;;  %v175_v46 = vld [vmem:[%s4893_s4 + $0x278] sm:$0xff] }
 0x276   :  { %v2381_v53 = vmul.f32 -1.442695, %v3534_v51  ;;  %v156_v51 = vld [vmem:[%s4893_s4 + $0x1e0] sm:$0xff]  ;;  %v189_v61 = vld [vmem:[%s4893_s4 + $0x2e8] sm:$0xff] }
 0x277   :  { %3549 = vpow2.f32 %v2380_v52  ;;  %v157_v52 = vld [vmem:[%s4893_s4 + $0x1e8] sm:$0xff] }
 0x278   :  { %3551 = vpow2.f32 %v2381_v53 }
 0x281   :  { %v3550_v54 = vpop.eup %3549 }
 0x282   :  { %v774_v55 = vadd.f32 1.0, %v3550_v54  ;;  %v3552_v56 = vpop.eup %3551  ;;  %v142_v54 = vld [vmem:[%s4893_s4 + $0x170] sm:$0xff] }
 0x283   :  { %v781_v57 = vadd.f32 1.0, %v3552_v56  ;;  %v3358_v56 = vpack.c.bf16 %v157_v52, %v156_v51  ;;  %v3385_v51 = vpack.c.bf16 %v175_v46, %v174_v45  ;;  %v192_v52 = vld [vmem:[%s4893_s4 + $0x300] sm:$0xff] }
 0x284   :  { %3553 = vrcp.f32 %v774_v55  ;;  %v143_v55 = vld [vmem:[%s4893_s4 + $0x178] sm:$0xff] }
 0x285   :  { %3555 = vrcp.f32 %v781_v57  ;;  %v158_v57 = vld [vmem:[%s4893_s4 + $0x1f0] sm:$0xff] }
 0x28e   :  { %v3554_v58 = vpop.eup %3553 }
 0x28f   :  { %v784_v59 = vmul.f32 %v3554_v58, %v767_v49  ;;  %v3556_v0 = vpop.eup %3555  ;;  %v141_v49 = vld [vmem:[%s4893_s4 + $0x168] sm:$0xff]  ;;  %v159_v58 = vld [vmem:[%s4893_s4 + $0x1f8] sm:$0xff] }
 0x290   :  { %v787_v4 = vsub.f32 1.0, %v3556_v0  ;;  %v789_v7 = vmul.f32 %v3556_v0, %v4126_v40  ;;  %v144_v40 = vld [vmem:[%s4893_s4 + $0x180] sm:$0xff]  ;;  %v3334_v53 = vpack.c.bf16 %v141_v49, %v140_v48  ;;  %v3361_v63 = vpack.c.bf16 %v159_v58, %v158_v57  ;;  %v190_v48 = vld [vmem:[%s4893_s4 + $0x2f0] sm:$0xff]  ;;  %v191_v49 = vld [vmem:[%s4893_s4 + $0x2f8] sm:$0xff] }
 0x291   :  { %v785_v60 = vadd.f32 %v784_v59, %v610_v33  ;;  %v3340_v19 = vpack.c.bf16 %v145_v13, %v144_v40  ;;  %v150_v33 = vld [vmem:[%s4893_s4 + $0x1b0] sm:$0xff]  ;;  %v3337_v59 = vpack.c.bf16 %v143_v55, %v142_v54  ;;  %v176_v0 = vld [vmem:[%s4893_s4 + $0x280] sm:$0xff]  ;;  %v179_v40 = vld [vmem:[%s4893_s4 + $0x298] sm:$0xff]  ;;  %v3409_v54 = vpack.c.bf16 %v191_v49, %v190_v48 }
 0x292   :  { %v3349_v38 = vpack.c.bf16 %v151_v34, %v150_v33  ;;  %v3388_v10 = vpack.c.bf16 %v177_v3, %v176_v0  ;;  %v171_v33 = vld [vmem:[%s4893_s4 + $0x258] sm:$0xff]  ;;  %v209_v57 = vld [vmem:[%s4893_s4 + $0x388] sm:$0xff]  ;;  %v210_v3 = vld [vmem:[%s4893_s4 + $0x390] sm:$0xff] }
 0x293   :  { %3557 = vtanh.f32 %v785_v60  ;;  %v160_v60 = vld [vmem:[%s4893_s4 + $0x200] sm:$0xff] }
 0x29d   :  { %v3558_v5 = vpop.eup %3557 }
 0x29e   :  { %v788_v8 = vmul.f32 %v3558_v5, %v787_v4  ;;  %v3364_v4 = vpack.c.bf16 %v161_v62, %v160_v60  ;;  %v194_v60 = vld [vmem:[%s4893_s4 + $0x310] sm:$0xff]  ;;  %v195_v62 = vld [vmem:[%s4893_s4 + $0x318] sm:$0xff] }
 0x2a0   :  { %v4258_v9 = vadd.f32 %v789_v7, %v788_v8  ;;  %v162_v7 = vld [vmem:[%s4893_s4 + $0x210] sm:$0xff]  ;;  %v163_v8 = vld [vmem:[%s4893_s4 + $0x218] sm:$0xff] }
 0x2a1   :  { %v3367_v13 = vpack.c.bf16 %v163_v8, %v162_v7  ;;  %v197_v7 = vld [vmem:[%s4893_s4 + $0x328] sm:$0xff] }
 0x2a2   :  { %v799_v12 = vrot.slane %v4258_v9, %v4255_v6  ;;  %2347 = vst [vmem:[#allocation8] sm:$0xff] %v4258_v9  ;;  %v792_v43 = vcombine.high %v4258_v9, %v4258_v9 }
 0x2a4   :  { %v4276_v15 = vrot.slane %v799_v12, %v4255_v6  ;;  %v807_v16 = vcombine.high %v799_v12, %v799_v12  ;;  %v178_v12 = vld [vmem:[%s4893_s4 + $0x290] sm:$0xff] }
 0x2a6   :  { %2754 = vmatmul.mubr.f32.vlgmr.msra.gmra.mrb[2].mxu1 %v4276_v15  ;;  %v4286_v20 = vrot.slane %v807_v16, %v4255_v6  ;;  %v837_v5 = vcombine.high %v4276_v15, %v4276_v15  ;;  %v165_v15 = vld [vmem:[%s4893_s4 + $0x228] sm:$0xff]  ;;  %v3391_v16 = vpack.c.bf16 %v179_v40, %v178_v12  ;;  %v198_v40 = vld [vmem:[%s4893_s4 + $0x330] sm:$0xff] }
 0x2a7   :  { %3317 = vmatpush3.bf16.msra.mxu1 %v3316_v14  ;;  %2823 = vmatprep.mubr.msk.f32.mxu1 %vm3700_vm0, %v3699_v2  ;;  %v164_v14 = vld [vmem:[%s4893_s4 + $0x220] sm:$0xff] }
 0x2a8   :  { %2789 = vmatmul.mubr.f32.vlgmr.msra.gmra.mrb[6].mxu0 %v4286_v20  ;;  %3318 = vmatprep.subr.bf16.mxu1 %v3698_v1  ;;  %v839_v11 = vcombine.high %v4286_v20, %v4286_v20  ;;  %v166_v20 = vld [vmem:[%s4893_s4 + $0x230] sm:$0xff] }
 0x2a9   :  { %3341 = vmatpush3.bf16.msra.mxu0 %v3340_v19  ;;  %2858 = vmatprep.mubr.msk.f32.mxu0 %vm3700_vm0, %v3699_v2  ;;  %v3370_v19 = vpack.c.bf16 %v165_v15, %v164_v14  ;;  %v3373_v25 = vpack.c.bf16 %v167_v21, %v166_v20  ;;  %v214_v15 = vld [vmem:[%s4893_s4 + $0x3b0] sm:$0xff]  ;;  %v216_v21 = vld [vmem:[%s4893_s4 + $0x3c0] sm:$0xff] }
 0x2aa   :  { %3342 = vmatprep.subr.bf16.mxu0 %v3698_v1 }
 0x2ab   :  { %3320 = vmatpush3.bf16.msra.mxu1 %v3319_v23  ;;  %v182_v23 = vld [vmem:[%s4893_s4 + $0x2b0] sm:$0xff] }
 0x2ac   :  { %3321 = vmatprep.subr.bf16.mxu1 %v3698_v1  ;;  %v3397_v28 = vpack.c.bf16 %v183_v24, %v182_v23  ;;  %v202_v24 = vld [vmem:[%s4893_s4 + $0x350] sm:$0xff] }
 0x2ad   :  { %3344 = vmatpush3.bf16.msra.mxu0 %v3343_v26  ;;  %v168_v26 = vld [vmem:[%s4893_s4 + $0x240] sm:$0xff] }
 0x2ae   :  { %3345 = vmatprep.subr.bf16.mxu0 %v3698_v1  ;;  %v3376_v31 = vpack.c.bf16 %v169_v27, %v168_v26  ;;  %v218_v27 = vld [vmem:[%s4893_s4 + $0x3d0] sm:$0xff] }
 0x2af   :  { %3323 = vmatpush3.bf16.msra.mxu1 %v3322_v29  ;;  %v184_v29 = vld [vmem:[%s4893_s4 + $0x2c0] sm:$0xff] }
 0x2b0   :  { %3324 = vmatprep.subr.bf16.mxu1 %v3698_v1  ;;  %v3400_v34 = vpack.c.bf16 %v185_v30, %v184_v29  ;;  %v204_v30 = vld [vmem:[%s4893_s4 + $0x360] sm:$0xff] }
 0x2b1   :  { %3347 = vmatpush3.bf16.msra.mxu0 %v3346_v32  ;;  %v170_v32 = vld [vmem:[%s4893_s4 + $0x250] sm:$0xff] }
 0x2b2   :  { %3348 = vmatprep.subr.bf16.mxu0 %v3698_v1  ;;  %v3379_v37 = vpack.c.bf16 %v171_v33, %v170_v32  ;;  %v220_v33 = vld [vmem:[%s4893_s4 + $0x3e0] sm:$0xff] }
 0x2b3   :  { %3326 = vmatpush3.bf16.msra.mxu1 %v3325_v35  ;;  %v186_v35 = vld [vmem:[%s4893_s4 + $0x2d0] sm:$0xff] }
 0x2b4   :  { %3327 = vmatprep.subr.bf16.mxu1 %v3698_v1  ;;  %v3403_v41 = vpack.c.bf16 %v187_v36, %v186_v35  ;;  %v206_v36 = vld [vmem:[%s4893_s4 + $0x370] sm:$0xff] }
 0x2b5   :  { %3350 = vmatpush3.bf16.msra.mxu0 %v3349_v38  ;;  %v172_v38 = vld [vmem:[%s4893_s4 + $0x260] sm:$0xff] }
 0x2b6   :  { %3351 = vmatprep.subr.bf16.mxu0 %v3698_v1 }
 0x2b7   :  { %3329 = vmatpush3.bf16.msra.mxu1 %v3328_v42  ;;  %v188_v42 = vld [vmem:[%s4893_s4 + $0x2e0] sm:$0xff] }
 0x2b8   :  { %3330 = vmatprep.subr.bf16.mxu1 %v3698_v1 }
 0x2b9   :  { %3353 = vmatpush3.bf16.msra.mxu0 %v3352_v44  ;;  %v3382_v44 = vpack.c.bf16 %v173_v39, %v172_v38  ;;  %v222_v39 = vld [vmem:[%s4893_s4 + $0x3f0] sm:$0xff] }
 0x2ba   :  { %3354 = vmatprep.subr.bf16.mxu0 %v3698_v1 }
 0x2bb   :  { %3332 = vmatpush3.bf16.msra.mxu1 %v3331_v47  ;;  %v3406_v47 = vpack.c.bf16 %v189_v61, %v188_v42 }
 0x2bc   :  { %3333 = vmatprep.subr.bf16.mxu1 %v3698_v1 }
 0x2bd   :  { %3356 = vmatpush3.bf16.msra.mxu0 %v3355_v50  ;;  %v806_v50 = vrot.slane %v792_v43, %v4255_v6 }
 0x2be   :  { %3357 = vmatprep.subr.bf16.mxu0 %v3698_v1 }
 0x2bf   :  { %3335 = vmatpush3.bf16.msra.mxu1 %v3334_v53  ;;  %v193_v53 = vld [vmem:[%s4893_s4 + $0x308] sm:$0xff]  ;;  %v808_v55 = vcombine.high %v806_v50, %v806_v50 }
 0x2c0   :  { %3336 = vmatprep.subr.bf16.mxu1 %v3698_v1  ;;  %v3412_v58 = vpack.c.bf16 %v193_v53, %v192_v52 }
 0x2c1   :  { %3359 = vmatpush3.bf16.msra.mxu0 %v3358_v56  ;;  %v208_v56 = vld [vmem:[%s4893_s4 + $0x380] sm:$0xff]  ;;  %v4532_v0 = vrot.slane %v808_v55, %v4255_v6 }
 0x2c2   :  { %3360 = vmatprep.subr.bf16.mxu0 %v3698_v1 }
 0x2c3   :  { %3338 = vmatpush3.bf16.msra.mxu1 %v3337_v59  ;;  %v4521_v59 = vrot.slane %v806_v50, %v4255_v6  ;;  %v196_v6 = vld [vmem:[%s4893_s4 + $0x320] sm:$0xff] }
 0x2c4   :  { %3363 = vmatprep.subr.bf16.mxu1 %v3698_v1  ;;  %v3418_v12 = vpack.c.bf16 %v197_v7, %v196_v6 }
 0x2c5   :  { %3362 = vmatpush3.bf16.msra.mxu0 %v3361_v63  ;;  %v3436_v63 = vpack.c.bf16 %v209_v57, %v208_v56  ;;  %v838_v43 = vcombine.high %v4521_v59, %v4521_v59 }
 0x2c6   :  { %2824 = vmatmul.mubr.f32.vlgmr.msra.gmra.mrb[4].mxu1 %v837_v5  ;;  %3387 = vmatprep.subr.bf16.mxu0 %v3698_v1  ;;  %v3415_v5 = vpack.c.bf16 %v195_v62, %v194_v60 }
 0x2c7   :  { %3365 = vmatpush3.bf16.msra.mxu1 %v3364_v4  ;;  %2893 = vmatprep.mubr.msk.f32.mxu1 %vm3700_vm0, %v3699_v2  ;;  %v211_v4 = vld [vmem:[%s4893_s4 + $0x398] sm:$0xff] }
 0x2c8   :  { %2859 = vmatmul.mubr.f32.vlgmr.msra.gmra.mrb[8].mxu0 %v839_v11  ;;  %3366 = vmatprep.subr.bf16.mxu1 %v3698_v1  ;;  %v3439_v8 = vpack.c.bf16 %v211_v4, %v210_v3  ;;  %v213_v11 = vld [vmem:[%s4893_s4 + $0x3a8] sm:$0xff] }
 0x2c9   :  { %3389 = vmatpush3.bf16.msra.mxu0 %v3388_v10  ;;  %2928 = vmatprep.mubr.msk.f32.mxu0 %vm3700_vm0, %v3699_v2  ;;  %v212_v10 = vld [vmem:[%s4893_s4 + $0x3a0] sm:$0xff] }
 0x2ca   :  { %3390 = vmatprep.subr.bf16.mxu0 %v3698_v1  ;;  %v3442_v14 = vpack.c.bf16 %v213_v11, %v212_v10 }
 0x2cb   :  { %3368 = vmatpush3.bf16.msra.mxu1 %v3367_v13  ;;  %v199_v13 = vld [vmem:[%s4893_s4 + $0x338] sm:$0xff] }
 0x2cc   :  { %3369 = vmatprep.subr.bf16.mxu1 %v3698_v1  ;;  %v3421_v17 = vpack.c.bf16 %v199_v13, %v198_v40 }
 0x2cd   :  { %3392 = vmatpush3.bf16.msra.mxu0 %v3391_v16  ;;  %v215_v16 = vld [vmem:[%s4893_s4 + $0x3b8] sm:$0xff] }
 0x2ce   :  { %3393 = vmatprep.subr.bf16.mxu0 %v3698_v1  ;;  %v3445_v20 = vpack.c.bf16 %v215_v16, %v214_v15 }
 0x2cf   :  { %3371 = vmatpush3.bf16.msra.mxu1 %v3370_v19  ;;  %v201_v19 = vld [vmem:[%s4893_s4 + $0x348] sm:$0xff] }
 0x2d0   :  { %3372 = vmatprep.subr.bf16.mxu1 %v3698_v1  ;;  %v3424_v23 = vpack.c.bf16 %v201_v19, %v200_v18 }
 0x2d1   :  { %3395 = vmatpush3.bf16.msra.mxu0 %v3394_v22  ;;  %v217_v22 = vld [vmem:[%s4893_s4 + $0x3c8] sm:$0xff] }
 0x2d2   :  { %3396 = vmatprep.subr.bf16.mxu0 %v3698_v1  ;;  %v3448_v26 = vpack.c.bf16 %v217_v22, %v216_v21 }
 0x2d3   :  { %3374 = vmatpush3.bf16.msra.mxu1 %v3373_v25  ;;  %v203_v25 = vld [vmem:[%s4893_s4 + $0x358] sm:$0xff] }
 0x2d4   :  { %3375 = vmatprep.subr.bf16.mxu1 %v3698_v1  ;;  %v3427_v29 = vpack.c.bf16 %v203_v25, %v202_v24  ;;  %v88_v24 = vld [vmem:[%s4892_s3] sm:$0xff] }
 0x2d5   :  { %3398 = vmatpush3.bf16.msra.mxu0 %v3397_v28  ;;  %v219_v28 = vld [vmem:[%s4893_s4 + $0x3d8] sm:$0xff] }
 0x2d6   :  { %3399 = vmatprep.subr.bf16.mxu0 %v3698_v1  ;;  %v3451_v32 = vpack.c.bf16 %v219_v28, %v218_v27 }
 0x2d7   :  { %3377 = vmatpush3.bf16.msra.mxu1 %v3376_v31  ;;  %v205_v31 = vld [vmem:[%s4893_s4 + $0x368] sm:$0xff] }
 0x2d8   :  { %3378 = vmatprep.subr.bf16.mxu1 %v3698_v1  ;;  %v3430_v35 = vpack.c.bf16 %v205_v31, %v204_v30 }
 0x2d9   :  { %3401 = vmatpush3.bf16.msra.mxu0 %v3400_v34  ;;  %v221_v34 = vld [vmem:[%s4893_s4 + $0x3e8] sm:$0xff] }
 0x2da   :  { %3402 = vmatprep.subr.bf16.mxu0 %v3698_v1  ;;  %v3454_v38 = vpack.c.bf16 %v221_v34, %v220_v33 }
 0x2db   :  { %3380 = vmatpush3.bf16.msra.mxu1 %v3379_v37  ;;  %v207_v37 = vld [vmem:[%s4893_s4 + $0x378] sm:$0xff] }
 0x2dc   :  { %3381 = vmatprep.subr.bf16.mxu1 %v3698_v1  ;;  %v3433_v42 = vpack.c.bf16 %v207_v37, %v206_v36 }
 0x2dd   :  { %3404 = vmatpush3.bf16.msra.mxu0 %v3403_v41  ;;  %v223_v41 = vld [vmem:[%s4893_s4 + $0x3f8] sm:$0xff] }
 0x2de   :  { %3405 = vmatprep.subr.bf16.mxu0 %v3698_v1  ;;  %v3457_v61 = vpack.c.bf16 %v223_v41, %v222_v39 }
 0x2df   :  { %3383 = vmatpush3.bf16.msra.mxu1 %v3382_v44  ;;  %v840_v44 = vcombine.high %v4532_v0, %v4532_v0 }
 0x2e0   :  { %3384 = vmatprep.subr.bf16.mxu1 %v3698_v1 }
 0x2e1   :  { %3407 = vmatpush3.bf16.msra.mxu0 %v3406_v47 }
 0x2e2   :  { %3408 = vmatprep.subr.bf16.mxu0 %v3698_v1 }
 0x2e3   :  { %3386 = vmatpush3.bf16.msra.mxu1 %v3385_v51 }
 0x2e4   :  { %3411 = vmatprep.subr.bf16.mxu1 %v3698_v1 }
 0x2e5   :  { %3410 = vmatpush3.bf16.msra.mxu0 %v3409_v54 }
 0x2e6   :  { %2894 = vmatmul.mubr.f32.vlgmr.msra.gmra.mrb[6].mxu1 %v4521_v59  ;;  %3435 = vmatprep.subr.bf16.mxu0 %v3698_v1 }
 0x2e7   :  { %3413 = vmatpush3.bf16.msra.mxu1 %v3412_v58  ;;  %2963 = vmatprep.mubr.msk.f32.mxu1 %vm3700_vm0, %v3699_v2 }
 0x2e8   :  { %2929 = vmatmul.mubr.f32.vlgmr.msra.gmra.mrb[10].mxu0 %v4532_v0  ;;  %3414 = vmatprep.subr.bf16.mxu1 %v3698_v1 }
 0x2e9   :  { %3437 = vmatpush3.bf16.msra.mxu0 %v3436_v63  ;;  %2998 = vmatprep.mubr.msk.f32.mxu0 %vm3700_vm0, %v3699_v2 }
 0x2ea   :  { %3438 = vmatprep.subr.bf16.mxu0 %v3698_v1 }
 0x2eb   :  { %3416 = vmatpush3.bf16.msra.mxu1 %v3415_v5 }
 0x2ec   :  { %3417 = vmatprep.subr.bf16.mxu1 %v3698_v1 }
 0x2ed   :  { %3440 = vmatpush3.bf16.msra.mxu0 %v3439_v8 }
 0x2ee   :  { %3441 = vmatprep.subr.bf16.mxu0 %v3698_v1 }
 0x2ef   :  { %3419 = vmatpush3.bf16.msra.mxu1 %v3418_v12 }
 0x2f0   :  { %3420 = vmatprep.subr.bf16.mxu1 %v3698_v1 }
 0x2f1   :  { %3443 = vmatpush3.bf16.msra.mxu0 %v3442_v14 }
 0x2f2   :  { %3444 = vmatprep.subr.bf16.mxu0 %v3698_v1 }
 0x2f3   :  { %3422 = vmatpush3.bf16.msra.mxu1 %v3421_v17 }
 0x2f4   :  { %3423 = vmatprep.subr.bf16.mxu1 %v3698_v1 }
 0x2f5   :  { %3446 = vmatpush3.bf16.msra.mxu0 %v3445_v20 }
 0x2f6   :  { %3447 = vmatprep.subr.bf16.mxu0 %v3698_v1 }
 0x2f7   :  { %3425 = vmatpush3.bf16.msra.mxu1 %v3424_v23 }
 0x2f8   :  { %3426 = vmatprep.subr.bf16.mxu1 %v3698_v1 }
 0x2f9   :  { %3449 = vmatpush3.bf16.msra.mxu0 %v3448_v26 }
 0x2fa   :  { %3450 = vmatprep.subr.bf16.mxu0 %v3698_v1 }
 0x2fb   :  { %3428 = vmatpush3.bf16.msra.mxu1 %v3427_v29 }
 0x2fc   :  { %3429 = vmatprep.subr.bf16.mxu1 %v3698_v1 }
 0x2fd   :  { %3452 = vmatpush3.bf16.msra.mxu0 %v3451_v32 }
 0x2fe   :  { %3453 = vmatprep.subr.bf16.mxu0 %v3698_v1 }
 0x2ff   :  { %3431 = vmatpush3.bf16.msra.mxu1 %v3430_v35 }
 0x300   :  { %3432 = vmatprep.subr.bf16.mxu1 %v3698_v1 }
 0x301   :  { %3455 = vmatpush3.bf16.msra.mxu0 %v3454_v38 }
 0x302   :  { %3456 = vmatprep.subr.bf16.mxu0 %v3698_v1 }
 0x303   :  { %3434 = vmatpush3.bf16.msra.mxu1 %v3433_v42 }
 0x304   :  { %3021 = vmatprep.subr.mxu1 %v3699_v2 }
 0x305   :  { %3458 = vmatpush3.bf16.msra.mxu0 %v3457_v61 }
 0x306   :  { %2964 = vmatmul.mubr.f32.vlgmr.msra.gmra.mrb[8].mxu1 %v838_v43  ;;  %3001 = vmatprep.subr.mxu0 %v3699_v2 }
 0x307   :  { %3023 = vmatprep.mubr.msk.f32.mxu1 %vm3700_vm0, %v3699_v2 }
 0x308   :  { %2999 = vmatmul.mubr.f32.vlgmr.msra.gmra.mrb[12].mxu0 %v840_v44 }
 0x309   :  { %3003 = vmatprep.mubr.msk.f32.mxu0 %vm3700_vm0, %v3699_v2  ;;  %3002 = vmatpush3.msra.mxu0 %v88_v24 }
 0x30a   :  { %3006 = vmatprep.subr.mxu0 %v3699_v2 }
 0x379   :  { %v915_v45 = vpop.f32.mrb[2].mxu1 }
 0x37a   :  { %v2755_v46 = vpop.f32.mrb[3].mxu1  ;;  %v1410_v47 = vsel %vm1409_vm3, %v915_v45, -inf }
 0x37b   :  { %1411 = vmax.xlane.f32.xlu0 %v1410_v47  ;;  %v985_v48 = vpop.f32.mrb[6].mxu0 }
 0x37c   :  { %v2790_v49 = vpop.f32.mrb[7].mxu0  ;;  %v1413_v50 = vsel %vm1409_vm3, %v985_v48, -inf }
 0x37d   :  { %1414 = vmax.xlane.f32.xlu1 %v1413_v50 }
 0x399   :  { %v1055_v51 = vpop.f32.mrb[4].mxu1 }
 0x39a   :  { %v2825_v52 = vpop.f32.mrb[5].mxu1  ;;  %v1416_v53 = vsel %vm1409_vm3, %v1055_v51, -inf }
 0x39b   :  { %1417 = vmax.xlane.f32.xlu1 %v1416_v53  ;;  %v1125_v54 = vpop.f32.mrb[8].mxu0 }
 0x39c   :  { %v2860_v55 = vpop.f32.mrb[9].mxu0  ;;  %v1419_v56 = vsel %vm1409_vm3, %v1125_v54, -inf }
 0x39f   :  { %1420 = vmax.xlane.f32.xlu1 %v1419_v56 }
 0x3b9   :  { %v1195_v57 = vpop.f32.mrb[6].mxu1 }
 0x3ba   :  { %v2895_v58 = vpop.f32.mrb[7].mxu1  ;;  %v1422_v59 = vsel %vm1409_vm3, %v1195_v57, -inf }
 0x3bb   :  { %1423 = vmax.xlane.f32.xlu1 %v1422_v59  ;;  %v1265_v60 = vpop.f32.mrb[10].mxu0 }
 0x3bc   :  { %v2930_v62 = vpop.f32.mrb[11].mxu0  ;;  %v1425_v63 = vsel %vm1409_vm3, %v1265_v60, -inf }
 0x3bf   :  { %1426 = vmax.xlane.f32.xlu1 %v1425_v63  ;;  %v91_v63 = vld [vmem:[%s4892_s3 + $0x18] sm:$0xff] }
 0x3d9   :  { %v1335_v0 = vpop.f32.mrb[8].mxu1 }
 0x3da   :  { %v2965_v3 = vpop.f32.mrb[9].mxu1  ;;  %v1428_v4 = vsel %vm1409_vm3, %v1335_v0, -inf }
 0x3db   :  { %1429 = vmax.xlane.f32.xlu1 %v1428_v4  ;;  %v1405_v5 = vpop.f32.mrb[12].mxu0  ;;  %v93_v4 = vld [vmem:[%s4892_s3 + $0x28] sm:$0xff] }
 0x3dc   :  { %v3000_v6 = vpop.f32.mrb[13].mxu0  ;;  %v1431_v7 = vsel %vm1409_vm3, %v1405_v5, -inf }
 0x3df   :  { %1432 = vmax.xlane.f32.xlu1 %v1431_v7 }
 0x408   :  { %v1412_v8 = vpop.xlane.xlu0 %1411 }
 0x409   :  { %v1434_v10 = vsub.f32 %v915_v45, %v1412_v8  ;;  %v92_v45 = vld [vmem:[%s4892_s3 + $0x20] sm:$0xff] }
 0x40a   :  { %v1415_v11 = vpop.xlane.xlu1 %1414  ;;  %3022 = vmatpush3.msra.mxu1 %v92_v45  ;;  %v340_v45 = vld [vmem:[%s4898_s9 + $0x90] sm:$0xff] }
 0x40b   :  { %v1442_v12 = vmul.f32 1.442695, %v1434_v10  ;;  %v1435_v40 = vsub.f32 %v985_v48, %v1415_v11  ;;  %3031 = vmatprep.subr.mxu1 %v3699_v2  ;;  %v94_v10 = vld [vmem:[%s4892_s3 + $0x30] sm:$0xff] }
 0x40d   :  { %3559 = vpow2.f32 %v1442_v12  ;;  %v1444_v13 = vmul.f32 1.442695, %v1435_v40  ;;  %v95_v40 = vld [vmem:[%s4892_s3 + $0x38] sm:$0xff] }
 0x40f   :  { %3561 = vpow2.f32 %v1444_v13 }
 0x417   :  { %v3560_v14 = vpop.eup %3559 }
 0x418   :  { %v1458_v15 = vsel %vm1409_vm3, %v3560_v14, 0.0 }
 0x419   :  { %v4651_v16 = vpop.eup %3561  ;;  %1459 = vadd.xlane.f32.xlu1 %v1458_v15 }
 0x41a   :  { %v1461_v17 = vsel %vm1409_vm3, %v4651_v16, 0.0 }
 0x41d   :  { %1462 = vadd.xlane.f32.xlu1 %v1461_v17  ;;  %v322_v17 = vld [vmem:[%s4898_s9] sm:$0xff] }
 0x428   :  { %v1418_v18 = vpop.xlane.xlu1 %1417 }
 0x429   :  { %v1436_v19 = vsub.f32 %v1055_v51, %v1418_v18  ;;  %v323_v18 = vld [vmem:[%s4898_s9 + $0x8] sm:$0xff] }
 0x42b   :  { %v1446_v20 = vmul.f32 1.442695, %v1436_v19 }
 0x42c   :  { %v1421_v21 = vpop.xlane.xlu1 %1420 }
 0x42d   :  { %3563 = vpow2.f32 %v1446_v20  ;;  %v1437_v22 = vsub.f32 %v1125_v54, %v1421_v21  ;;  %v89_v54 = vld [vmem:[%s4892_s3 + $0x8] sm:$0xff]  ;;  %v3484_v20 = vpack.c.bf16 %v323_v18, %v322_v17 }
 0x42f   :  { %v1448_v23 = vmul.f32 1.442695, %v1437_v22  ;;  %v324_v22 = vld [vmem:[%s4898_s9 + $0x10] sm:$0xff] }
 0x431   :  { %3565 = vpow2.f32 %v1448_v23  ;;  %v325_v23 = vld [vmem:[%s4898_s9 + $0x18] sm:$0xff] }
 0x432   :  { %v3487_v24 = vpack.c.bf16 %v325_v23, %v324_v22 }
 0x437   :  { %v3564_v25 = vpop.eup %3563 }
 0x438   :  { %v1464_v26 = vsel %vm1409_vm3, %v3564_v25, 0.0 }
 0x439   :  { %1465 = vadd.xlane.f32.xlu0 %v1464_v26  ;;  %v327_v26 = vld [vmem:[%s4898_s9 + $0x28] sm:$0xff] }
 0x43b   :  { %v4660_v27 = vpop.eup %3565 }
 0x43c   :  { %v1467_v28 = vsel %vm1409_vm3, %v4660_v27, 0.0 }
 0x43d   :  { %1468 = vadd.xlane.f32.xlu1 %v1467_v28  ;;  %v328_v28 = vld [vmem:[%s4898_s9 + $0x30] sm:$0xff] }
 0x448   :  { %v1424_v29 = vpop.xlane.xlu1 %1423 }
 0x449   :  { %v1438_v30 = vsub.f32 %v1195_v57, %v1424_v29  ;;  %v90_v57 = vld [vmem:[%s4892_s3 + $0x10] sm:$0xff]  ;;  %v329_v29 = vld [vmem:[%s4898_s9 + $0x38] sm:$0xff] }
 0x44b   :  { %v1450_v31 = vmul.f32 1.442695, %v1438_v30  ;;  %v3493_v30 = vpack.c.bf16 %v329_v29, %v328_v28 }
 0x44c   :  { %v1427_v32 = vpop.xlane.xlu1 %1426 }
 0x44d   :  { %3567 = vpow2.f32 %v1450_v31  ;;  %v1439_v33 = vsub.f32 %v1265_v60, %v1427_v32  ;;  %v330_v31 = vld [vmem:[%s4898_s9 + $0x40] sm:$0xff]  ;;  %v331_v32 = vld [vmem:[%s4898_s9 + $0x48] sm:$0xff] }
 0x44f   :  { %v1452_v34 = vmul.f32 1.442695, %v1439_v33  ;;  %v3496_v33 = vpack.c.bf16 %v331_v32, %v330_v31  ;;  %v356_v31 = vld [vmem:[#allocation5 + $0x8] sm:$0xff] }
 0x451   :  { %3569 = vpow2.f32 %v1452_v34  ;;  %v332_v34 = vld [vmem:[%s4898_s9 + $0x50] sm:$0xff] }
 0x457   :  { %v4664_v35 = vpop.eup %3567 }
 0x458   :  { %v1470_v36 = vsel %vm1409_vm3, %v4664_v35, 0.0 }
 0x459   :  { %1471 = vadd.xlane.f32.xlu0 %v1470_v36 }
 0x45b   :  { %v4668_v37 = vpop.eup %3569 }
 0x45c   :  { %v1473_v38 = vsel %vm1409_vm3, %v4668_v37, 0.0 }
 0x45d   :  { %1474 = vadd.xlane.f32.xlu1 %v1473_v38  ;;  %v335_v38 = vld [vmem:[%s4898_s9 + $0x68] sm:$0xff] }
 0x468   :  { %v1430_v39 = vpop.xlane.xlu1 %1429 }
 0x469   :  { %v1440_v41 = vsub.f32 %v1335_v0, %v1430_v39 }
 0x46b   :  { %v1454_v42 = vmul.f32 1.442695, %v1440_v41  ;;  %v336_v41 = vld [vmem:[%s4898_s9 + $0x70] sm:$0xff] }
 0x46c   :  { %v1433_v61 = vpop.xlane.xlu1 %1432 }
 0x46d   :  { %3571 = vpow2.f32 %v1454_v42  ;;  %v1441_v43 = vsub.f32 %v1405_v5, %v1433_v61  ;;  %v337_v42 = vld [vmem:[%s4898_s9 + $0x78] sm:$0xff] }
 0x46e   :  { %v3505_v61 = vpack.c.bf16 %v337_v42, %v336_v41  ;;  %v359_v42 = vld [vmem:[#allocation5 + $0x20] sm:$0xff] }
 0x46f   :  { %v1456_v44 = vmul.f32 1.442695, %v1441_v43  ;;  %v338_v43 = vld [vmem:[%s4898_s9 + $0x80] sm:$0xff] }
 0x471   :  { %3573 = vpow2.f32 %v1456_v44  ;;  %v339_v44 = vld [vmem:[%s4898_s9 + $0x88] sm:$0xff] }
 0x477   :  { %v4676_v46 = vpop.eup %3571 }
 0x478   :  { %v1476_v47 = vsel %vm1409_vm3, %v4676_v46, 0.0 }
 0x479   :  { %1477 = vadd.xlane.f32.xlu0 %v1476_v47  ;;  %v341_v47 = vld [vmem:[%s4898_s9 + $0x98] sm:$0xff] }
 0x47b   :  { %v4680_v48 = vpop.eup %3573 }
 0x47c   :  { %v1479_v49 = vsel %vm1409_vm3, %v4680_v48, 0.0 }
 0x47d   :  { %1480 = vadd.xlane.f32.xlu1 %v1479_v49  ;;  %v343_v49 = vld [vmem:[%s4898_s9 + $0xa8] sm:$0xff] }
 0x4a6   :  { %v1460_v50 = vpop.xlane.xlu1 %1459 }
 0x4a7   :  { %3575 = vrcp.f32 %v1460_v50 }
 0x4aa   :  { %v1463_v51 = vpop.xlane.xlu1 %1462 }
 0x4ab   :  { %3577 = vrcp.f32 %v1463_v51  ;;  %v344_v51 = vld [vmem:[%s4898_s9 + $0xb0] sm:$0xff] }
 0x4b1   :  { %v3576_v52 = vpop.eup %3575 }
 0x4b2   :  { %v1490_v53 = vmul.f32 %v3576_v52, %v3560_v14  ;;  %v345_v52 = vld [vmem:[%s4898_s9 + $0xb8] sm:$0xff] }
 0x4b4   :  { %3004 = vmatmul.mubr.msk.f32.vlgmr.msra.gmra.mrb[14].mxu0 %vm1498_vm4, %v1490_v53  ;;  %v3469_v53 = vpack.c.bf16 %v345_v52, %v344_v51  ;;  %v366_v51 = vld [vmem:[#allocation5 + $0x58] sm:$0xff] }
 0x4b5   :  { %v3578_v55 = vpop.eup %3577  ;;  %3007 = vmatpush3.msra.mxu0 %v89_v54  ;;  %3008 = vmatprep.mubr.msk.f32.mxu0 %vm3700_vm0, %v3699_v2  ;;  %v346_v54 = vld [vmem:[%s4898_s9 + $0xc0] sm:$0xff] }
 0x4b6   :  { %v1491_v56 = vmul.f32 %v3578_v55, %v4651_v16  ;;  %3011 = vmatprep.subr.mxu0 %v3699_v2  ;;  %v347_v55 = vld [vmem:[%s4898_s9 + $0xc8] sm:$0xff] }
 0x4b8   :  { %3009 = vmatmul.mubr.msk.f32.vlgmr.msra.gmra.mrb[16].mxu0 %vm1498_vm4, %v1491_v56  ;;  %v3472_v56 = vpack.c.bf16 %v347_v55, %v346_v54  ;;  %v368_v54 = vld [vmem:[#allocation5 + $0x68] sm:$0xff] }
 0x4b9   :  { %3012 = vmatpush3.msra.mxu0 %v90_v57  ;;  %3013 = vmatprep.mubr.msk.f32.mxu0 %vm3700_vm0, %v3699_v2  ;;  %v348_v57 = vld [vmem:[%s4898_s9 + $0xd0] sm:$0xff] }
 0x4ba   :  { %3016 = vmatprep.subr.mxu0 %v3699_v2 }
 0x4c6   :  { %v1466_v58 = vpop.xlane.xlu0 %1465 }
 0x4c7   :  { %3579 = vrcp.f32 %v1466_v58  ;;  %v349_v58 = vld [vmem:[%s4898_s9 + $0xd8] sm:$0xff] }
 0x4ca   :  { %v1469_v59 = vpop.xlane.xlu1 %1468 }
 0x4cb   :  { %3581 = vrcp.f32 %v1469_v59  ;;  %v3475_v59 = vpack.c.bf16 %v349_v58, %v348_v57  ;;  %v370_v57 = vld [vmem:[#allocation5 + $0x78] sm:$0xff] }
 0x4d1   :  { %v3580_v60 = vpop.eup %3579 }
 0x4d2   :  { %v1492_v62 = vmul.f32 %v3580_v60, %v3564_v25  ;;  %v326_v25 = vld [vmem:[%s4898_s9 + $0x20] sm:$0xff] }
 0x4d3   :  { %v350_v60 = vld [vmem:[%s4898_s9 + $0xe0] sm:$0xff] }
 0x4d4   :  { %3014 = vmatmul.mubr.msk.f32.vlgmr.msra.gmra.mrb[18].mxu0 %vm1498_vm4, %v1492_v62  ;;  %v351_v62 = vld [vmem:[%s4898_s9 + $0xe8] sm:$0xff] }
 0x4d5   :  { %v3582_v0 = vpop.eup %3581  ;;  %3017 = vmatpush3.msra.mxu0 %v91_v63  ;;  %3018 = vmatprep.mubr.msk.f32.mxu0 %vm3700_vm0, %v3699_v2  ;;  %v3478_v63 = vpack.c.bf16 %v351_v62, %v350_v60 }
 0x4d6   :  { %v1493_v3 = vmul.f32 %v3582_v0, %v4660_v27  ;;  %3026 = vmatprep.subr.mxu0 %v3699_v2  ;;  %v3490_v27 = vpack.c.bf16 %v327_v26, %v326_v25  ;;  %v352_v0 = vld [vmem:[%s4898_s9 + $0xf0] sm:$0xff] }
 0x4d8   :  { %3019 = vmatmul.mubr.msk.f32.vlgmr.msra.gmra.mrb[20].mxu0 %vm1498_vm4, %v1493_v3  ;;  %v353_v3 = vld [vmem:[%s4898_s9 + $0xf8] sm:$0xff] }
 0x4d9   :  { %3027 = vmatpush3.msra.mxu0 %v93_v4  ;;  %3028 = vmatprep.mubr.msk.f32.mxu0 %vm3700_vm0, %v3699_v2  ;;  %v3481_v4 = vpack.c.bf16 %v353_v3, %v352_v0 }
 0x4da   :  { %3036 = vmatprep.subr.mxu0 %v3699_v2 }
 0x4e6   :  { %v1472_v5 = vpop.xlane.xlu0 %1471 }
 0x4e7   :  { %3583 = vrcp.f32 %v1472_v5 }
 0x4ea   :  { %v1475_v6 = vpop.xlane.xlu1 %1474 }
 0x4eb   :  { %3585 = vrcp.f32 %v1475_v6 }
 0x4f1   :  { %v3584_v7 = vpop.eup %3583 }
 0x4f2   :  { %v1494_v8 = vmul.f32 %v3584_v7, %v4664_v35  ;;  %v333_v35 = vld [vmem:[%s4898_s9 + $0x58] sm:$0xff] }
 0x4f3   :  { %v3499_v36 = vpack.c.bf16 %v333_v35, %v332_v34 }
 0x4f4   :  { %3024 = vmatmul.mubr.msk.f32.vlgmr.msra.gmra.mrb[10].mxu1 %vm1498_vm4, %v1494_v8 }
 0x4f5   :  { %v3586_v11 = vpop.eup %3585  ;;  %3032 = vmatpush3.msra.mxu1 %v94_v10  ;;  %3033 = vmatprep.mubr.msk.f32.mxu1 %vm3700_vm0, %v3699_v2 }
 0x4f6   :  { %v1495_v12 = vmul.f32 %v3586_v11, %v4668_v37  ;;  %3459 = vmatprep.subr.bf16.mxu1 %v3698_v1  ;;  %v334_v37 = vld [vmem:[%s4898_s9 + $0x60] sm:$0xff] }
 0x4f7   :  { %v3502_v39 = vpack.c.bf16 %v335_v38, %v334_v37  ;;  %v357_v37 = vld [vmem:[#allocation5 + $0x10] sm:$0xff]  ;;  %v358_v38 = vld [vmem:[#allocation5 + $0x18] sm:$0xff] }
 0x4f8   :  { %3029 = vmatmul.mubr.msk.f32.vlgmr.msra.gmra.mrb[22].mxu0 %vm1498_vm4, %v1495_v12  ;;  %v3511_v41 = vpack.c.bf16 %v358_v38, %v357_v37 }
 0x4f9   :  { %3037 = vmatpush3.msra.mxu0 %v95_v40  ;;  %3038 = vmatprep.mubr.msk.f32.mxu0 %vm3700_vm0, %v3699_v2 }
 0x4fa   :  { %3483 = vmatprep.subr.bf16.mxu0 %v3698_v1 }
 0x506   :  { %v1478_v13 = vpop.xlane.xlu0 %1477 }
 0x507   :  { %3587 = vrcp.f32 %v1478_v13 }
 0x50a   :  { %v1481_v14 = vpop.xlane.xlu1 %1480 }
 0x50b   :  { %3589 = vrcp.f32 %v1481_v14 }
 0x511   :  { %v3588_v15 = vpop.eup %3587 }
 0x512   :  { %v1496_v16 = vmul.f32 %v3588_v15, %v4676_v46  ;;  %v3460_v46 = vpack.c.bf16 %v339_v44, %v338_v43  ;;  %v361_v44 = vld [vmem:[#allocation5 + $0x30] sm:$0xff] }
 0x514   :  { %3034 = vmatmul.mubr.msk.f32.vlgmr.msra.gmra.mrb[12].mxu1 %vm1498_vm4, %v1496_v16 }
 0x515   :  { %v3590_v19 = vpop.eup %3589  ;;  %3073 = vmatprep.mubr.msk.f32.mxu1 %vm3700_vm0, %v3699_v2  ;;  %3461 = vmatpush3.bf16.msra.mxu1 %v3460_v46 }
 0x516   :  { %v1497_v21 = vmul.f32 %v3590_v19, %v4680_v48  ;;  %v3463_v48 = vpack.c.bf16 %v341_v47, %v340_v45  ;;  %3462 = vmatprep.subr.bf16.mxu1 %v3698_v1  ;;  %v362_v45 = vld [vmem:[#allocation5 + $0x38] sm:$0xff] }
 0x517   :  { %v3517_v46 = vpack.c.bf16 %v362_v45, %v361_v44 }
 0x518   :  { %3039 = vmatmul.mubr.msk.f32.vlgmr.msra.gmra.mrb[24].mxu0 %vm1498_vm4, %v1497_v21 }
 0x519   :  { %3485 = vmatpush3.bf16.msra.mxu0 %v3484_v20  ;;  %3108 = vmatprep.mubr.msk.f32.mxu0 %vm3700_vm0, %v3699_v2 }
 0x51a   :  { %3486 = vmatprep.subr.bf16.mxu0 %v3698_v1  ;;  %3464 = vmatpush3.bf16.msra.mxu1 %v3463_v48 }
 0x51b   :  { %3465 = vmatprep.subr.bf16.mxu1 %v3698_v1 }
 0x51d   :  { %3488 = vmatpush3.bf16.msra.mxu0 %v3487_v24 }
 0x51e   :  { %3489 = vmatprep.subr.bf16.mxu0 %v3698_v1 }
 0x521   :  { %3491 = vmatpush3.bf16.msra.mxu0 %v3490_v27 }
 0x522   :  { %3492 = vmatprep.subr.bf16.mxu0 %v3698_v1 }
 0x525   :  { %3494 = vmatpush3.bf16.msra.mxu0 %v3493_v30  ;;  %v355_v30 = vld [vmem:[#allocation5] sm:$0xff] }
 0x526   :  { %3495 = vmatprep.subr.bf16.mxu0 %v3698_v1 }
 0x529   :  { %3497 = vmatpush3.bf16.msra.mxu0 %v3496_v33 }
 0x52a   :  { %3498 = vmatprep.subr.bf16.mxu0 %v3698_v1 }
 0x52d   :  { %3500 = vmatpush3.bf16.msra.mxu0 %v3499_v36  ;;  %v3508_v36 = vpack.c.bf16 %v356_v31, %v355_v30 }
 0x52e   :  { %3501 = vmatprep.subr.bf16.mxu0 %v3698_v1 }
 0x531   :  { %3503 = vmatpush3.bf16.msra.mxu0 %v3502_v39 }
 0x532   :  { %3504 = vmatprep.subr.bf16.mxu0 %v3698_v1 }
 0x535   :  { %3506 = vmatpush3.bf16.msra.mxu0 %v3505_v61  ;;  %v360_v61 = vld [vmem:[#allocation5 + $0x28] sm:$0xff] }
 0x536   :  { %v3514_v43 = vpack.c.bf16 %v360_v61, %v359_v42 }
 0x538   :  { %3109 = vmatmul.mubr.f32.vlgmr.msra.gmra.mrb[26].mxu0 %v4258_v9  ;;  %v342_v9 = vld [vmem:[%s4898_s9 + $0xa0] sm:$0xff] }
 0x539   :  { %v3466_v50 = vpack.c.bf16 %v343_v49, %v342_v9  ;;  %v364_v9 = vld [vmem:[#allocation5 + $0x48] sm:$0xff] }
 0x53b   :  { %3467 = vmatpush3.bf16.msra.mxu1 %v3466_v50  ;;  %v365_v50 = vld [vmem:[#allocation5 + $0x50] sm:$0xff] }
 0x53c   :  { %3468 = vmatprep.subr.bf16.mxu1 %v3698_v1  ;;  %v3523_v52 = vpack.c.bf16 %v366_v51, %v365_v50 }
 0x53f   :  { %3470 = vmatpush3.bf16.msra.mxu1 %v3469_v53  ;;  %v367_v53 = vld [vmem:[#allocation5 + $0x60] sm:$0xff] }
 0x540   :  { %3471 = vmatprep.subr.bf16.mxu1 %v3698_v1  ;;  %v3526_v55 = vpack.c.bf16 %v368_v54, %v367_v53 }
 0x543   :  { %3473 = vmatpush3.bf16.msra.mxu1 %v3472_v56  ;;  %v369_v56 = vld [vmem:[#allocation5 + $0x70] sm:$0xff] }
 0x544   :  { %3474 = vmatprep.subr.bf16.mxu1 %v3698_v1  ;;  %v3529_v58 = vpack.c.bf16 %v370_v57, %v369_v56 }
 0x547   :  { %3476 = vmatpush3.bf16.msra.mxu1 %v3475_v59  ;;  %v2390_v59 = vld [vmem:[%s4899_s10] ss:$0 sm:$0xff]  ;;  %s3702_s10 = smov [#allocation8]  }
 0x548   :  { %3477 = vmatprep.subr.bf16.mxu1 %v3698_v1  ;;  %s2364_s23 = sshll.u32 %s3702_s10, 4  ;;  %s2365_s23 = int_to_ptr.vmem [resolvable:$true] %s2364_s23 }
 0x549   :  { %s3641_s24 = scalar_lea.vmem %s2365_s23, 128  ;;  %p3646_p3 = scmp.lt.s32.totalorder %s2365_s23, %s2365_s23 }
 0x54a   :  { %p3642_p2 = scmp.ne.s32.totalorder %s2365_s23, %s3641_s24  ;;  %p3647_p4 = scmp.lt.s32.totalorder %s3641_s24, %s3641_s24 }
 0x54b   :  { %3479 = vmatpush3.bf16.msra.mxu1 %v3478_v63 }
 0x54c   :  { %3480 = vmatprep.subr.bf16.mxu1 %v3698_v1  ;;  %p3648_p5 = por %p3647_p4, %p3646_p3 }
 0x54e   :  { %p3649_p6 = pnand %p3648_p5, %p3642_p2 }
 0x54f   :  { %3482 = vmatpush3.bf16.msra.mxu1 %v3481_v4  ;;  %v2391_v4 = vld [vmem:[%s4901_s12] ss:$0 sm:$0xff] }
 0x550   :  { %3507 = vmatprep.subr.bf16.mxu1 %v3698_v1 }
 0x587   :  { %v1568_v5 = vpop.f32.mrb[14].mxu0 }
 0x588   :  { %v3005_v6 = vpop.f32.mrb[15].mxu0 }
 0x58b   :  { %v1641_v7 = vpop.f32.mrb[16].mxu0 }
 0x58c   :  { %v2091_v8 = vrot.slane %v1641_v7, 7  ;;  %v3010_v10 = vpop.f32.mrb[17].mxu0 }
 0x58e   :  { %v2093_v11 = vsel %vm2092_vm5, %v2091_v8, %v1568_v5 }
 0x5a7   :  { %v1714_v12 = vpop.f32.mrb[18].mxu0 }
 0x5a8   :  { %v2094_v40 = vrot.slane %v1714_v12, 6  ;;  %v3015_v13 = vpop.f32.mrb[19].mxu0 }
 0x5aa   :  { %v2096_v14 = vsel %vm2095_vm6, %v2094_v40, %v2093_v11 }
 0x5ab   :  { %v1787_v15 = vpop.f32.mrb[20].mxu0 }
 0x5ac   :  { %v2097_v16 = vrot.slane %v1787_v15, 5  ;;  %v3020_v17 = vpop.f32.mrb[21].mxu0 }
 0x5ae   :  { %v2099_v18 = vsel %vm2098_vm7, %v2097_v16, %v2096_v14 }
 0x5c7   :  { %v1860_v19 = vpop.f32.mrb[10].mxu1 }
 0x5c8   :  { %v2100_v20 = vrot.slane %v1860_v19, 4  ;;  %v3025_v21 = vpop.f32.mrb[11].mxu1 }
 0x5ca   :  { %v2102_v22 = vsel %vm2101_vm8, %v2100_v20, %v2099_v18 }
 0x5cb   :  { %v1933_v23 = vpop.f32.mrb[22].mxu0 }
 0x5cc   :  { %v2103_v24 = vrot.slane %v1933_v23, 3  ;;  %v3030_v25 = vpop.f32.mrb[23].mxu0 }
 0x5ce   :  { %v2105_v26 = vsel %vm2104_vm9, %v2103_v24, %v2102_v22 }
 0x5e7   :  { %v2006_v27 = vpop.f32.mrb[12].mxu1 }
 0x5e8   :  { %v2106_v28 = vrot.slane %v2006_v27, 2  ;;  %v3035_v29 = vpop.f32.mrb[13].mxu1 }
 0x5ea   :  { %v2108_v32 = vsel %vm2107_vm10, %v2106_v28, %v2105_v26 }
 0x5eb   :  { %v2079_v33 = vpop.f32.mrb[24].mxu0 }
 0x5ec   :  { %v2109_v34 = vrot.slane %v2079_v33, 1  ;;  %v3040_v35 = vpop.f32.mrb[25].mxu0 }
 0x5ee   :  { %v2111_v39 = vsel %vm2110_vm11, %v2109_v34, %v2108_v32 }
 0x5ef   :  { %3074 = vmatmul.mubr.f32.vlgmr.msra.gmra.mrb[14].mxu1 %v2111_v39 }
 0x5f0   :  { %3509 = vmatpush3.bf16.msra.mxu1 %v3508_v36  ;;  %3143 = vmatprep.mubr.msk.f32.mxu1 %vm3700_vm0, %v3699_v2  ;;  %v363_v2 = vld [vmem:[#allocation5 + $0x40] sm:$0xff] }
 0x5f1   :  { %3510 = vmatprep.subr.bf16.mxu1 %v3698_v1  ;;  %v3520_v49 = vpack.c.bf16 %v364_v9, %v363_v2 }
 0x5f4   :  { %3512 = vmatpush3.bf16.msra.mxu1 %v3511_v41 }
 0x5f5   :  { %3513 = vmatprep.subr.bf16.mxu1 %v3698_v1 }
 0x5f8   :  { %3515 = vmatpush3.bf16.msra.mxu1 %v3514_v43 }
 0x5f9   :  { %3516 = vmatprep.subr.bf16.mxu1 %v3698_v1 }
 0x5fc   :  { %3518 = vmatpush3.bf16.msra.mxu1 %v3517_v46 }
 0x5fd   :  { %3519 = vmatprep.subr.bf16.mxu1 %v3698_v1 }
 0x600   :  { %3521 = vmatpush3.bf16.msra.mxu1 %v3520_v49 }
 0x601   :  { %3522 = vmatprep.subr.bf16.mxu1 %v3698_v1 }
 0x604   :  { %3524 = vmatpush3.bf16.msra.mxu1 %v3523_v52 }
 0x605   :  { %3525 = vmatprep.subr.bf16.mxu1 %v3698_v1 }
 0x608   :  { %3527 = vmatpush3.bf16.msra.mxu1 %v3526_v55 }
 0x609   :  { %3528 = vmatprep.subr.bf16.mxu1 %v3698_v1 }
 0x60b   :  { %v2249_v47 = vpop.f32.mrb[26].mxu0 }
 0x60c   :  { %v3110_v48 = vpop.f32.mrb[27].mxu0  ;;  %3530 = vmatpush3.bf16.msra.mxu1 %v3529_v58 }
 0x6c2   :  { %v2179_v60 = vpop.f32.mrb[14].mxu1 }
 0x6c3   :  { %v2250_v62 = vadd.f32 %v2249_v47, %v2179_v60  ;;  %v3075_v63 = vpop.f32.mrb[15].mxu1 }
 0x6c5   :  { %v2259_v0 = vadd.f32 %v2390_v59, %v2250_v62 }
 0x6c7   :  { %3591 = vtanh.f32 %v2259_v0 }
 0x6d1   :  { %v3592_v3 = vpop.eup %3591 }
 0x6d2   :  { %3144 = vmatmul.mubr.f32.vlgmr.msra.gmra.mrb[16].mxu1 %v3592_v3 }
 0x7a5   :  { %v2333_v5 = vpop.f32.mrb[16].mxu1 }
 0x7a6   :  { %v2334_v6 = vadd.f32 %v2391_v4, %v2333_v5  ;;  %v3145_v7 = vpop.f32.mrb[17].mxu1 }
 0x7a8   :  { %2337 = vmax.xlane.f32.xlu0 %v2334_v6 }
 0x835   :  { %v2338_v1 = vpop.xlane.xlu0 %2337 }
 0x836   :  { %v2339_v8 = vsub.f32 %v2334_v6, %v2338_v1 }
 0x838   :  { %v2340_v10 = vmul.f32 1.442695, %v2339_v8 }
 0x83a   :  { %3593 = vpow2.f32 %v2340_v10 }
 0x844   :  { %v3594_v11 = vpop.eup %3593 }
 0x845   :  { %2342 = vadd.xlane.f32.xlu1 %v3594_v11 }
 0x846   :  { %3652 = shalt.err (!%p3649_p6)
}
 0x847   :  { %s3653_s0 = scalar_lea.hbm %s4903_s14, 128 }
 0x848   :  { %p3654_p7 = scmp.ne.s32.totalorder %s4903_s14, %s3653_s0  ;;  %p3657_p8 = scmp.lt.u32.totalorder %s3653_s0, %s4903_s14 }
 0x84a   :  { %p3659_p9 = pnand %p3657_p8, %p3654_p7 }
 0x84c   :  { %3662 = shalt.err (!%p3659_p9)
}
 0x84d   :  { %2367 = dma.vmem_to_hbm [thread:$0]  %s2365_s23, 128, %s4903_s14, [#allocation9]  }
 0x84e   :  { %s3703_s17 = smov [#allocation7]  }
 0x84f   :  { %s2354_s18 = sshll.u32 %s3703_s17, 4  ;;  %s2355_s18 = int_to_ptr.vmem [resolvable:$true] %s2354_s18 }
 0x850   :  { %s3663_s19 = scalar_lea.vmem %s2355_s18, 128  ;;  %p3668_p11 = scmp.lt.s32.totalorder %s2355_s18, %s2355_s18 }
 0x851   :  { %p3664_p10 = scmp.ne.s32.totalorder %s2355_s18, %s3663_s19  ;;  %p3669_p12 = scmp.lt.s32.totalorder %s3663_s19, %s3663_s19 }
 0x853   :  { %p3670_p13 = por %p3669_p12, %p3668_p11 }
 0x855   :  { %p3671_p0 = pnand %p3670_p13, %p3664_p10 }
 0x8d2   :  { %v2343_v12 = vpop.xlane.xlu1 %2342 }
 0x8d3   :  { %3595 = vrcp.f32 %v2343_v12 }
 0x8dd   :  { %v3596_v40 = vpop.eup %3595 }
 0x8de   :  { %v2345_v13 = vmul.f32 %v3596_v40, %v3594_v11 }
 0x8e0   :  { %2346 = vst [vmem:[#allocation7] sm:$0xff] %v2345_v13 }
 0x8e1   :  { %3674 = shalt.err (!%p3671_p0)
}
 0x8e2   :  { %s3675_s21 = scalar_lea.hbm %s4902_s13, 128 }
 0x8e3   :  { %p3676_p1 = scmp.ne.s32.totalorder %s4902_s13, %s3675_s21  ;;  %p3679_p2 = scmp.lt.u32.totalorder %s3675_s21, %s4902_s13 }
 0x8e5   :  { %p3681_p3 = pnand %p3679_p2, %p3676_p1 }
 0x8e7   :  { %3684 = shalt.err (!%p3681_p3)
}
 0x8e8   :  { %2357 = dma.vmem_to_hbm [thread:$0]  %s2355_s18, 128, %s4902_s13, [#allocation4]  }
 0x8e9   :  { %3689 = dma.done.wait [#allocation4], 128  }
 0x8ea   :  { %3690 = vsyncadd [#allocation4], 4294967168 }
 0x8eb   :  { %3691 = dma.done.wait [#allocation9], 128  }
 0x8ec   :  { %3692 = vsyncadd [#allocation9], 4294967168 }
 0x8ed   :  { %2374 = vsyncpa [#allocation3], 1 }
 0x8ee   :  { %2375 = vsyncpa [#allocation6], 1 }
 0x8ef   :  { %2376 = vsyncpa [#allocation4], 1 }
 0x8f0   :  { %2377 = vsyncpa [#allocation9], 1 }

// kernel: tpu_custom_call.1
= control target key start
LH: loop header
LB: loop body
LE: loop exit
PB: predicated region body
PF: predicated region fallthrough
CT: control target
= control target key end

     0   :  { %20 = vsyncpa [#allocation3], 0  ;;  %s4889_s0 = inlined_call_operand.vmem [shape: s32[8,1], index: 0, kind: input, shape index: {}]   ;;  %s4890_s1 = inlined_call_operand.hbm [shape: f32[48,128], index: 1, kind: input, shape index: {}]   ;;  %s4891_s2 = inlined_call_operand.vmem [shape: f32[8,128], index: 2, kind: input, shape index: {}]   ;;  %s4892_s3 = inlined_call_operand.vmem [shape: f32[8,8,128], index: 3, kind: input, shape index: {}]   ;;  %s4893_s4 = inlined_call_operand.vmem [shape: f32[8,128,8], index: 4, kind: input, shape index: {}]   ;;  %s4894_s5 = inlined_call_operand.vmem [shape: f32[128,384], index: 5, kind: input, shape index: {}]   ;;  %s4895_s6 = inlined_call_operand.vmem [shape: f32[128,384], index: 6, kind: input, shape index: {}]   ;;  %s4896_s7 = inlined_call_operand.vmem [shape: f32[1,384], index: 7, kind: input, shape index: {}]   ;;  %s4897_s8 = inlined_call_operand.vmem [shape: f32[1,384], index: 8, kind: input, shape index: {}]   ;;  %s4898_s9 = inlined_call_operand.vmem [shape: f32[256,128], index: 9, kind: input, shape index: {}]   ;;  %s4899_s10 = inlined_call_operand.vmem [shape: f32[1,128], index: 10, kind: input, shape index: {}]   ;;  %s4900_s11 = inlined_call_operand.hbm [shape: f32[128,128], index: 11, kind: input, shape index: {}]   ;;  %s4901_s12 = inlined_call_operand.vmem [shape: f32[1,128], index: 12, kind: input, shape index: {}]   ;;  %s4902_s13 = inlined_call_operand.hbm [shape: f32[1,8,128], index: 13, kind: output, shape index: {0}]   ;;  %s4903_s14 = inlined_call_operand.hbm [shape: f32[8,128], index: 14, kind: output, shape index: {1}]  }
   0x1   :  { %21 = vsyncpa [#allocation6], 0 }
   0x2   :  { %22 = vsyncpa [#allocation4], 0 }
   0x3   :  { %23 = vsyncpa [#allocation9], 0  ;;  %s3693_s29 = smov [#allocation2]   ;;  %s3597_s17 = scalar_lea.hbm %s4890_s1, 768 }
   0x4   :  { %s31_s30 = sshll.u32 %s3693_s29, 4  ;;  %p3598_p0 = scmp.ne.s32.totalorder %s4890_s1, %s3597_s17  ;;  %s32_s30 = int_to_ptr.vmem [resolvable:$true] %s31_s30 }
   0x5   :  { %p3601_p1 = scmp.lt.u32.totalorder %s3597_s17, %s4890_s1 }
   0x7   :  { %p3603_p2 = pnand %p3601_p1, %p3598_p0 }
   0x9   :  { %3606 = shalt.err (!%p3603_p2)
}
   0xa   :  { %s3607_s22 = scalar_lea.vmem %s32_s30, 768  ;;  %p3612_p4 = scmp.lt.s32.totalorder %s32_s30, %s32_s30 }
   0xb   :  { %p3608_p3 = scmp.ne.s32.totalorder %s32_s30, %s3607_s22  ;;  %p3613_p5 = scmp.lt.s32.totalorder %s3607_s22, %s3607_s22 }
   0xd   :  { %p3614_p6 = por %p3613_p5, %p3612_p4 }
   0xf   :  { %p3615_p7 = pnand %p3614_p6, %p3608_p3 }
  0x11   :  { %3618 = shalt.err (!%p3615_p7)
}
  0x12   :  { %s3694_s23 = smov 128   ;;  %s3695_s24 = smov 8  }
  0x13   :  { %37 = dma.hbm_to_vmem [thread:$0]  %s4890_s1, 768, %s32_s30, [#allocation3], %s3694_s23, %s3694_s23, %s3695_s24  }
  0x14   :  { %s3696_s27 = smov [#allocation5]   ;;  %s3619_s16 = scalar_lea.hbm %s4900_s11, 2048 }
  0x15   :  { %s61_s28 = sshll.u32 %s3696_s27, 4  ;;  %p3620_p8 = scmp.ne.s32.totalorder %s4900_s11, %s3619_s16  ;;  %s62_s28 = int_to_ptr.vmem [resolvable:$true] %s61_s28 }
  0x16   :  { %p3623_p9 = scmp.lt.u32.totalorder %s3619_s16, %s4900_s11 }
  0x18   :  { %p3625_p10 = pnand %p3623_p9, %p3620_p8 }
  0x1a   :  { %3628 = shalt.err (!%p3625_p10)
}
  0x1b   :  { %s3629_s21 = scalar_lea.vmem %s62_s28, 2048  ;;  %p3634_p12 = scmp.lt.s32.totalorder %s62_s28, %s62_s28 }
  0x1c   :  { %p3630_p11 = scmp.ne.s32.totalorder %s62_s28, %s3629_s21  ;;  %p3635_p13 = scmp.lt.s32.totalorder %s3629_s21, %s3629_s21 }
  0x1e   :  { %p3636_p0 = por %p3635_p13, %p3634_p12 }
  0x20   :  { %p3637_p1 = pnand %p3636_p0, %p3630_p11 }
  0x22   :  { %3640 = shalt.err (!%p3637_p1)
}
  0x23   :  { %67 = dma.hbm_to_vmem [thread:$0]  %s4900_s11, 2048, %s62_s28, [#allocation6], %s3694_s23, %s3694_s23, %s3695_s24  }
  0x24   :  { %3685 = dma.done.wait [#allocation3], 768  }
  0x25   :  { %3686 = vsyncadd [#allocation3], 4294966528 }
  0x26   :  { %3687 = dma.done.wait [#allocation6], 2048  }
  0x27   :  { %3688 = vsyncadd [#allocation6], 4294965248  ;;  %v3697_v0 = vmov 0   ;;  %v3698_v1 = vmov 0.0|0.0   ;;  %v3699_v2 = vmov 0.0   ;;  %v375_v3 = vld [vmem:[%s4889_s0] sm:$0xff]  ;;  %v372_v61 = vlaneseq }
  0x28   :  { %3548 = vset.pattern.permute.xlu0 %v3697_v0  ;;  %3146 = vmatprep.subr.bf16.mxu0 %v3698_v1  ;;  %v82_v4 = vld [vmem:[#allocation2] sm:$0xff]  ;;  %v83_v5 = vld [vmem:[#allocation2 + $0x8] sm:$0xff]  ;;  %v84_v7 = vld [vmem:[#allocation2 + $0x10] sm:$0xff]  ;;  %vm3700_vm0 = vmmov 0   ;;  %vm382_vm1 = vcmask 392192   ;;  %vm1409_vm3 = vcmask 57344  }
  0x29   :  { %536 = vmatprep.mubr.f32.mxu1 %v3699_v2  ;;  %377 = vperm.xlu0 %3548, %v375_v3   ;;  %v3147_v6 = vpack.c.bf16 %v83_v5, %v82_v4  ;;  %v85_v8 = vld [vmem:[#allocation2 + $0x18] sm:$0xff]  ;;  %v228_v11 = vld [vmem:[%s4894_s5 + $0x20] sm:$0xff]  ;;  %v86_v13 = vld [vmem:[#allocation2 + $0x20] sm:$0xff]  ;;  %v373_v62 = vand.u32 127, %v372_v61  ;;  %vm1498_vm4 = vcmask 64512   ;;  %vm2092_vm5 = vcmask 1041409  }
  0x2a   :  { %2648 = vmatprep.mubr.msk.f32.mxu0 %vm3700_vm0, %v3699_v2  ;;  %v3150_v9 = vpack.c.bf16 %v85_v8, %v84_v7  ;;  %v225_v10 = vld [vmem:[%s4894_s5 + $0x8] sm:$0xff]  ;;  %v224_v12 = vld [vmem:[%s4894_s5] sm:$0xff]  ;;  %v87_v14 = vld [vmem:[#allocation2 + $0x28] sm:$0xff]  ;;  %vm2095_vm6 = vcmask 1042434   ;;  %vm2098_vm7 = vcmask 1043459   ;;  %vm2101_vm8 = vcmask 1044484  }
  0x2b   :  { %3148 = vmatpush3.bf16.msra.mxu0 %v3147_v6  ;;  %v3155_v15 = vpack.c.bf16 %v228_v11, %v225_v10  ;;  %v227_v16 = vld [vmem:[%s4894_s5 + $0x18] sm:$0xff]  ;;  %v234_v19 = vld [vmem:[%s4894_s5 + $0x50] sm:$0xff]  ;;  %v233_v22 = vld [vmem:[%s4894_s5 + $0x48] sm:$0xff]  ;;  %v3153_v23 = vpack.c.bf16 %v87_v14, %v86_v13  ;;  %vm2104_vm9 = vcmask 1045509   ;;  %vm2107_vm10 = vcmask 1046534  }
  0x2c   :  { %3149 = vmatprep.subr.bf16.mxu0 %v3698_v1  ;;  %v3157_v17 = vpack.c.bf16 %v227_v16, %v224_v12  ;;  %v231_v18 = vld [vmem:[%s4894_s5 + $0x38] sm:$0xff]  ;;  %v230_v20 = vld [vmem:[%s4894_s5 + $0x30] sm:$0xff]  ;;  %v237_v25 = vld [vmem:[%s4894_s5 + $0x68] sm:$0xff]  ;;  %vm2110_vm11 = vcmask 1047559  }
  0x2d   :  { %3156 = vmatprep.subr.bf16.mxu1 %v3155_v15  ;;  %v3159_v21 = vpack.c.bf16 %v234_v19, %v231_v18  ;;  %v3161_v24 = vpack.c.bf16 %v233_v22, %v230_v20  ;;  %v240_v26 = vld [vmem:[%s4894_s5 + $0x80] sm:$0xff]  ;;  %v239_v29 = vld [vmem:[%s4894_s5 + $0x78] sm:$0xff]  ;;  %v246_v32 = vld [vmem:[%s4894_s5 + $0xb0] sm:$0xff] }
  0x2e   :  { %3158 = vmatpush1.bf16.msra.mxu1 %v3157_v17  ;;  %v236_v27 = vld [vmem:[%s4894_s5 + $0x60] sm:$0xff]  ;;  %v3163_v28 = vpack.c.bf16 %v240_v26, %v237_v25  ;;  %v243_v31 = vld [vmem:[%s4894_s5 + $0x98] sm:$0xff]  ;;  %v242_v33 = vld [vmem:[%s4894_s5 + $0x90] sm:$0xff] }
  0x2f   :  { %3151 = vmatpush3.bf16.msra.mxu0 %v3150_v9  ;;  %3160 = vmatprep.subr.bf16.mxu1 %v3159_v21  ;;  %v3165_v30 = vpack.c.bf16 %v239_v29, %v236_v27  ;;  %v3167_v34 = vpack.c.bf16 %v246_v32, %v243_v31  ;;  %v245_v35 = vld [vmem:[%s4894_s5 + $0xa8] sm:$0xff]  ;;  %v252_v38 = vld [vmem:[%s4894_s5 + $0xe0] sm:$0xff]  ;;  %v251_v41 = vld [vmem:[%s4894_s5 + $0xd8] sm:$0xff] }
  0x30   :  { %3152 = vmatprep.subr.bf16.mxu0 %v3698_v1  ;;  %v3169_v36 = vpack.c.bf16 %v245_v35, %v242_v33  ;;  %v249_v37 = vld [vmem:[%s4894_s5 + $0xc8] sm:$0xff]  ;;  %v248_v39 = vld [vmem:[%s4894_s5 + $0xc0] sm:$0xff]  ;;  %v255_v43 = vld [vmem:[%s4894_s5 + $0xf8] sm:$0xff] }
  0x31   :  { %v3171_v40 = vpack.c.bf16 %v252_v38, %v249_v37  ;;  %v3173_v42 = vpack.c.bf16 %v251_v41, %v248_v39  ;;  %v258_v44 = vld [vmem:[%s4894_s5 + $0x110] sm:$0xff]  ;;  %v257_v47 = vld [vmem:[%s4894_s5 + $0x108] sm:$0xff]  ;;  %v264_v50 = vld [vmem:[%s4894_s5 + $0x140] sm:$0xff] }
  0x32   :  { %3162 = vmatpush1.bf16.msra.mxu1 %v3161_v24  ;;  %v254_v45 = vld [vmem:[%s4894_s5 + $0xf0] sm:$0xff]  ;;  %v3175_v46 = vpack.c.bf16 %v258_v44, %v255_v43  ;;  %v261_v49 = vld [vmem:[%s4894_s5 + $0x128] sm:$0xff]  ;;  %v260_v51 = vld [vmem:[%s4894_s5 + $0x120] sm:$0xff] }
  0x33   :  { %3154 = vmatpush3.bf16.msra.mxu0 %v3153_v23  ;;  %3164 = vmatprep.subr.bf16.mxu1 %v3163_v28  ;;  %v3177_v48 = vpack.c.bf16 %v257_v47, %v254_v45  ;;  %v3179_v52 = vpack.c.bf16 %v264_v50, %v261_v49  ;;  %v263_v53 = vld [vmem:[%s4894_s5 + $0x138] sm:$0xff]  ;;  %v270_v56 = vld [vmem:[%s4894_s5 + $0x170] sm:$0xff]  ;;  %v269_v59 = vld [vmem:[%s4894_s5 + $0x168] sm:$0xff] }
  0x34   :  { %3187 = vmatprep.subr.bf16.mxu0 %v3698_v1  ;;  %v3181_v54 = vpack.c.bf16 %v263_v53, %v260_v51  ;;  %v267_v55 = vld [vmem:[%s4894_s5 + $0x158] sm:$0xff]  ;;  %v266_v57 = vld [vmem:[%s4894_s5 + $0x150] sm:$0xff]  ;;  %v229_v0 = vld [vmem:[%s4894_s5 + $0x28] sm:$0xff] }
  0x35   :  { %v3183_v58 = vpack.c.bf16 %v270_v56, %v267_v55  ;;  %v3185_v60 = vpack.c.bf16 %v269_v59, %v266_v57  ;;  %v226_v63 = vld [vmem:[%s4894_s5 + $0x10] sm:$0xff]  ;;  %v232_v5 = vld [vmem:[%s4894_s5 + $0x40] sm:$0xff]  ;;  %v235_v6 = vld [vmem:[%s4894_s5 + $0x58] sm:$0xff] }
  0x36   :  { %3166 = vmatpush1.bf16.msra.mxu1 %v3165_v30  ;;  %v3188_v4 = vpack.c.bf16 %v229_v0, %v226_v63  ;;  %v3191_v8 = vpack.c.bf16 %v235_v6, %v232_v5  ;;  %v238_v9 = vld [vmem:[%s4894_s5 + $0x70] sm:$0xff]  ;;  %v241_v10 = vld [vmem:[%s4894_s5 + $0x88] sm:$0xff]  ;;  %v244_v12 = vld [vmem:[%s4894_s5 + $0xa0] sm:$0xff] }
  0x37   :  { %3168 = vmatprep.subr.bf16.mxu1 %v3167_v34  ;;  %v3194_v11 = vpack.c.bf16 %v241_v10, %v238_v9  ;;  %v247_v13 = vld [vmem:[%s4894_s5 + $0xb8] sm:$0xff]  ;;  %v250_v15 = vld [vmem:[%s4894_s5 + $0xd0] sm:$0xff]  ;;  %v253_v16 = vld [vmem:[%s4894_s5 + $0xe8] sm:$0xff] }
  0x38   :  { %v3197_v14 = vpack.c.bf16 %v247_v13, %v244_v12  ;;  %v3200_v17 = vpack.c.bf16 %v253_v16, %v250_v15  ;;  %v256_v18 = vld [vmem:[%s4894_s5 + $0x100] sm:$0xff]  ;;  %v259_v19 = vld [vmem:[%s4894_s5 + $0x118] sm:$0xff]  ;;  %v262_v21 = vld [vmem:[%s4894_s5 + $0x130] sm:$0xff] }
  0x39   :  { %v3203_v20 = vpack.c.bf16 %v259_v19, %v256_v18  ;;  %v265_v22 = vld [vmem:[%s4894_s5 + $0x148] sm:$0xff]  ;;  %v268_v24 = vld [vmem:[%s4894_s5 + $0x160] sm:$0xff]  ;;  %v271_v25 = vld [vmem:[%s4894_s5 + $0x178] sm:$0xff] }
  0x3a   :  { %3170 = vmatpush1.bf16.msra.mxu1 %v3169_v36  ;;  %v3206_v23 = vpack.c.bf16 %v265_v22, %v262_v21  ;;  %v3209_v26 = vpack.c.bf16 %v271_v25, %v268_v24  ;;  %v273_v27 = vld [vmem:[%s4895_s6 + $0x8] sm:$0xff]  ;;  %v276_v28 = vld [vmem:[%s4895_s6 + $0x20] sm:$0xff]  ;;  %v275_v31 = vld [vmem:[%s4895_s6 + $0x18] sm:$0xff] }
  0x3b   :  { %3172 = vmatprep.subr.bf16.mxu1 %v3171_v40  ;;  %v3211_v29 = vpack.c.bf16 %v276_v28, %v273_v27  ;;  %v272_v30 = vld [vmem:[%s4895_s6] sm:$0xff]  ;;  %v274_v32 = vld [vmem:[%s4895_s6 + $0x10] sm:$0xff]  ;;  %v277_v33 = vld [vmem:[%s4895_s6 + $0x28] sm:$0xff] }
  0x3c   :  { %v279_v34 = vld [vmem:[%s4895_s6 + $0x38] sm:$0xff]  ;;  %v282_v35 = vld [vmem:[%s4895_s6 + $0x50] sm:$0xff]  ;;  %v3213_v36 = vpack.c.bf16 %v275_v31, %v272_v30  ;;  %v3244_v38 = vpack.c.bf16 %v277_v33, %v274_v32  ;;  %v281_v40 = vld [vmem:[%s4895_s6 + $0x48] sm:$0xff] }
  0x3d   :  { %v278_v37 = vld [vmem:[%s4895_s6 + $0x30] sm:$0xff]  ;;  %v3215_v39 = vpack.c.bf16 %v282_v35, %v279_v34  ;;  %v280_v41 = vld [vmem:[%s4895_s6 + $0x40] sm:$0xff]  ;;  %v285_v44 = vld [vmem:[%s4895_s6 + $0x68] sm:$0xff] }
  0x3e   :  { %3174 = vmatpush1.bf16.msra.mxu1 %v3173_v42  ;;  %v283_v42 = vld [vmem:[%s4895_s6 + $0x58] sm:$0xff]  ;;  %v288_v45 = vld [vmem:[%s4895_s6 + $0x80] sm:$0xff]  ;;  %v3217_v47 = vpack.c.bf16 %v281_v40, %v278_v37  ;;  %v289_v53 = vld [vmem:[%s4895_s6 + $0x88] sm:$0xff] }
  0x3f   :  { %3176 = vmatprep.subr.bf16.mxu1 %v3175_v46  ;;  %v3247_v49 = vpack.c.bf16 %v283_v42, %v280_v41  ;;  %v3219_v50 = vpack.c.bf16 %v288_v45, %v285_v44  ;;  %v287_v51 = vld [vmem:[%s4895_s6 + $0x78] sm:$0xff]  ;;  %v294_v55 = vld [vmem:[%s4895_s6 + $0xb0] sm:$0xff]  ;;  %v297_v0 = vld [vmem:[%s4895_s6 + $0xc8] sm:$0xff] }
  0x40   :  { %v290_v57 = vld [vmem:[%s4895_s6 + $0x90] sm:$0xff]  ;;  %v295_v63 = vld [vmem:[%s4895_s6 + $0xb8] sm:$0xff]  ;;  %v296_v5 = vld [vmem:[%s4895_s6 + $0xc0] sm:$0xff] }
  0x41   :  { %v298_v9 = vld [vmem:[%s4895_s6 + $0xd0] sm:$0xff]  ;;  %v301_v10 = vld [vmem:[%s4895_s6 + $0xe8] sm:$0xff]  ;;  %v304_v18 = vld [vmem:[%s4895_s6 + $0x100] sm:$0xff] }
  0x42   :  { %3178 = vmatpush1.bf16.msra.mxu1 %v3177_v48  ;;  %v284_v48 = vld [vmem:[%s4895_s6 + $0x60] sm:$0xff]  ;;  %v306_v12 = vld [vmem:[%s4895_s6 + $0x110] sm:$0xff]  ;;  %v3256_v15 = vpack.c.bf16 %v301_v10, %v298_v9  ;;  %v307_v19 = vld [vmem:[%s4895_s6 + $0x118] sm:$0xff] }
  0x43   :  { %3180 = vmatprep.subr.bf16.mxu1 %v3179_v52  ;;  %v286_v52 = vld [vmem:[%s4895_s6 + $0x70] sm:$0xff]  ;;  %v3221_v56 = vpack.c.bf16 %v287_v51, %v284_v48  ;;  %v312_v21 = vld [vmem:[%s4895_s6 + $0x140] sm:$0xff]  ;;  %v3259_v24 = vpack.c.bf16 %v307_v19, %v304_v18  ;;  %v313_v28 = vld [vmem:[%s4895_s6 + $0x148] sm:$0xff] }
  0x44   :  { %v310_v27 = vld [vmem:[%s4895_s6 + $0x130] sm:$0xff]  ;;  %v317_v35 = vld [vmem:[%s4895_s6 + $0x168] sm:$0xff]  ;;  %v319_v37 = vld [vmem:[%s4895_s6 + $0x178] sm:$0xff] }
  0x45   :  { %v318_v30 = vld [vmem:[%s4895_s6 + $0x170] sm:$0xff]  ;;  %v3262_v33 = vpack.c.bf16 %v313_v28, %v310_v27  ;;  %v4126_v40 = vld [vmem:[%s4891_s2] sm:$0xff]  ;;  %v97_v42 = vld [vmem:[%s4893_s4 + $0x8] sm:$0xff]  ;;  %v458_v28 = vshrl.u32 %v372_v61, 7 }
  0x46   :  { %3182 = vmatpush1.bf16.msra.mxu1 %v3181_v54  ;;  %v291_v54 = vld [vmem:[%s4895_s6 + $0x98] sm:$0xff]  ;;  %v314_v32 = vld [vmem:[%s4895_s6 + $0x150] sm:$0xff]  ;;  %v96_v41 = vld [vmem:[%s4893_s4] sm:$0xff] }
  0x47   :  { %3184 = vmatprep.subr.bf16.mxu1 %v3183_v58  ;;  %v3250_v58 = vpack.c.bf16 %v289_v53, %v286_v52  ;;  %v3223_v59 = vpack.c.bf16 %v294_v55, %v291_v54  ;;  %v112_v44 = vld [vmem:[%s4893_s4 + $0x80] sm:$0xff]  ;;  %v113_v45 = vld [vmem:[%s4893_s4 + $0x88] sm:$0xff]  ;;  %v99_v48 = vld [vmem:[%s4893_s4 + $0x18] sm:$0xff] }
  0x48   :  { %v115_v51 = vld [vmem:[%s4893_s4 + $0x98] sm:$0xff]  ;;  %v100_v53 = vld [vmem:[%s4893_s4 + $0x20] sm:$0xff]  ;;  %v101_v54 = vld [vmem:[%s4893_s4 + $0x28] sm:$0xff] }
  0x49   :  { %v3274_v55 = vpack.c.bf16 %v101_v54, %v100_v53  ;;  %v106_v10 = vld [vmem:[%s4893_s4 + $0x50] sm:$0xff]  ;;  %v124_v19 = vld [vmem:[%s4893_s4 + $0xe0] sm:$0xff] }
  0x4a   :  { %3186 = vmatpush1.bf16.msra.mxu1 %v3185_v60  ;;  %v293_v60 = vld [vmem:[%s4895_s6 + $0xa8] sm:$0xff] }
  0x4b   :  { %3212 = vmatprep.subr.bf16.mxu1 %v3211_v29  ;;  %v315_v29 = vld [vmem:[%s4895_s6 + $0x158] sm:$0xff] }
  0x4c   :  { %v3239_v34 = vpack.c.bf16 %v318_v30, %v315_v29  ;;  %v467_v29 = vsub.s32 2, %v458_v28  ;;  %v320_v30 = vld [vmem:[%s4896_s7] sm:$0x7] }
  0xa8   :  { %v378_v3 = vpop.permute.xlu0 %377 }
  0xa9   :  { %vm379_vm2 = vcmp.eq.s32.totalorder %v373_v62, %v378_v3  ;;  %v292_v62 = vld [vmem:[%s4895_s6 + $0xa0] sm:$0xff] }
  0xaa   :  { %v2378_v7 = vsel %vm379_vm2, 1.0, %v3699_v2  ;;  %v300_v3 = vld [vmem:[%s4895_s6 + $0xe0] sm:$0xff]  ;;  %v3253_v6 = vpack.c.bf16 %v295_v63, %v292_v62  ;;  %v118_v63 = vld [vmem:[%s4893_s4 + $0xb0] sm:$0xff] }
  0xab   :  { %2649 = vmatmul.mubr.msk.f32.vlgmr.msra.gmra.mrb[0].mxu0 %vm382_vm1, %v2378_v7  ;;  %v3227_v7 = vpack.c.bf16 %v300_v3, %v297_v0  ;;  %v119_v0 = vld [vmem:[%s4893_s4 + $0xb8] sm:$0xff] }
  0xac   :  { %3189 = vmatpush3.bf16.msra.mxu0 %v3188_v4  ;;  %2683 = vmatprep.mubr.msk.f32.mxu0 %vm3700_vm0, %v3699_v2  ;;  %v3225_v4 = vpack.c.bf16 %v293_v60, %v290_v57  ;;  %v117_v57 = vld [vmem:[%s4893_s4 + $0xa8] sm:$0xff]  ;;  %v103_v60 = vld [vmem:[%s4893_s4 + $0x38] sm:$0xff]  ;;  %v3301_v3 = vpack.c.bf16 %v119_v0, %v118_v63 }
  0xad   :  { %3190 = vmatprep.subr.bf16.mxu0 %v3698_v1 }
  0xb0   :  { %3192 = vmatpush3.bf16.msra.mxu0 %v3191_v8  ;;  %v299_v8 = vld [vmem:[%s4895_s6 + $0xd8] sm:$0xff] }
  0xb1   :  { %3193 = vmatprep.subr.bf16.mxu0 %v3698_v1  ;;  %v3229_v13 = vpack.c.bf16 %v299_v8, %v296_v5  ;;  %v105_v5 = vld [vmem:[%s4893_s4 + $0x48] sm:$0xff] }
  0xb2   :  { %v121_v8 = vld [vmem:[%s4893_s4 + $0xc8] sm:$0xff] }
  0xb4   :  { %3195 = vmatpush3.bf16.msra.mxu0 %v3194_v11  ;;  %v303_v11 = vld [vmem:[%s4895_s6 + $0xf8] sm:$0xff] }
  0xb5   :  { %3196 = vmatprep.subr.bf16.mxu0 %v3698_v1  ;;  %v3231_v16 = vpack.c.bf16 %v306_v12, %v303_v11  ;;  %v107_v11 = vld [vmem:[%s4893_s4 + $0x58] sm:$0xff] }
  0xb6   :  { %v3283_v12 = vpack.c.bf16 %v107_v11, %v106_v10  ;;  %v128_v10 = vld [vmem:[%s4893_s4 + $0x100] sm:$0xff]  ;;  %v129_v11 = vld [vmem:[%s4893_s4 + $0x108] sm:$0xff] }
  0xb8   :  { %3198 = vmatpush3.bf16.msra.mxu0 %v3197_v14  ;;  %v302_v14 = vld [vmem:[%s4895_s6 + $0xf0] sm:$0xff] }
  0xb9   :  { %3199 = vmatprep.subr.bf16.mxu0 %v3698_v1 }
  0xbc   :  { %3201 = vmatpush3.bf16.msra.mxu0 %v3200_v17  ;;  %v305_v17 = vld [vmem:[%s4895_s6 + $0x108] sm:$0xff] }
  0xbd   :  { %3202 = vmatprep.subr.bf16.mxu0 %v3698_v1  ;;  %v3233_v22 = vpack.c.bf16 %v305_v17, %v302_v14  ;;  %v123_v14 = vld [vmem:[%s4893_s4 + $0xd8] sm:$0xff]  ;;  %v109_v17 = vld [vmem:[%s4893_s4 + $0x68] sm:$0xff] }
  0xc0   :  { %3204 = vmatpush3.bf16.msra.mxu0 %v3203_v20  ;;  %v309_v20 = vld [vmem:[%s4895_s6 + $0x128] sm:$0xff] }
  0xc1   :  { %3205 = vmatprep.subr.bf16.mxu0 %v3698_v1  ;;  %v3235_v25 = vpack.c.bf16 %v312_v21, %v309_v20  ;;  %v125_v20 = vld [vmem:[%s4893_s4 + $0xe8] sm:$0xff] }
  0xc2   :  { %v3310_v21 = vpack.c.bf16 %v125_v20, %v124_v19 }
  0xc4   :  { %3207 = vmatpush3.bf16.msra.mxu0 %v3206_v23  ;;  %v308_v23 = vld [vmem:[%s4895_s6 + $0x120] sm:$0xff] }
  0xc5   :  { %3208 = vmatprep.subr.bf16.mxu0 %v3698_v1 }
  0xc8   :  { %3210 = vmatpush3.bf16.msra.mxu0 %v3209_v26  ;;  %v311_v26 = vld [vmem:[%s4895_s6 + $0x138] sm:$0xff] }
  0xc9   :  { %3243 = vmatprep.subr.bf16.mxu0 %v3698_v1  ;;  %v3237_v31 = vpack.c.bf16 %v311_v26, %v308_v23  ;;  %v111_v23 = vld [vmem:[%s4893_s4 + $0x78] sm:$0xff] }
  0xca   :  { %v127_v26 = vld [vmem:[%s4893_s4 + $0xf8] sm:$0xff] }
 0x17e   :  { %v452_v43 = vpop.f32.mrb[0].mxu0 }
 0x17f   :  { %v2650_v46 = vpop.f32.mrb[1].mxu0  ;;  %537 = vmatmul.mubr.f32.vlgmr.msra.gmra.mrb[0].mxu1 %v452_v43  ;;  %2684 = vmatmul.mubr.f32.vlgmr.msra.gmra.mrb[2].mxu0 %v452_v43  ;;  %v3268_v43 = vpack.c.bf16 %v97_v42, %v96_v41 }
 0x180   :  { %3214 = vmatpush1.bf16.msra.mxu1 %v3213_v36  ;;  %3245 = vmatpush3.bf16.msra.mxu0 %v3244_v38  ;;  %v316_v36 = vld [vmem:[%s4895_s6 + $0x160] sm:$0xff]  ;;  %v3241_v38 = vpack.c.bf16 %v317_v35, %v314_v32  ;;  %v3292_v46 = vpack.c.bf16 %v113_v45, %v112_v44  ;;  %v459_v35 = vsub.s32 0, %v458_v28 }
 0x181   :  { %3216 = vmatprep.subr.bf16.mxu1 %v3215_v39  ;;  %3246 = vmatprep.subr.bf16.mxu0 %v3698_v1  ;;  %v3265_v39 = vpack.c.bf16 %v319_v37, %v316_v36  ;;  %v321_v36 = vld [vmem:[%s4897_s8] sm:$0x7]  ;;  %v463_v37 = vsub.s32 1, %v458_v28 }
 0x182   :  { %693 = vmatprep.mubr.f32.mxu1 %v3699_v2  ;;  %2718 = vmatprep.mubr.msk.f32.mxu0 %vm3700_vm0, %v3699_v2 }
 0x183   :  { %v464_v41 = vrot.slane %v320_v30, %v463_v37  ;;  %v621_v42 = vrot.slane %v321_v36, %v463_v37  ;;  %v137_v37 = vld [vmem:[%s4893_s4 + $0x148] sm:$0xff] }
 0x184   :  { %3218 = vmatpush1.bf16.msra.mxu1 %v3217_v47  ;;  %3248 = vmatpush3.bf16.msra.mxu0 %v3247_v49  ;;  %v98_v47 = vld [vmem:[%s4893_s4 + $0x10] sm:$0xff] }
 0x185   :  { %3220 = vmatprep.subr.bf16.mxu1 %v3219_v50  ;;  %3249 = vmatprep.subr.bf16.mxu0 %v3698_v1  ;;  %v3271_v49 = vpack.c.bf16 %v99_v48, %v98_v47  ;;  %v114_v50 = vld [vmem:[%s4893_s4 + $0x90] sm:$0xff]  ;;  %v3533_v44 = vadd.f32 %v621_v42, %v464_v41  ;;  %v153_v41 = vld [vmem:[%s4893_s4 + $0x1c8] sm:$0xff] }
 0x186   :  { %v3295_v52 = vpack.c.bf16 %v115_v51, %v114_v50 }
 0x188   :  { %3222 = vmatpush1.bf16.msra.mxu1 %v3221_v56  ;;  %3251 = vmatpush3.bf16.msra.mxu0 %v3250_v58  ;;  %v116_v56 = vld [vmem:[%s4893_s4 + $0xa0] sm:$0xff] }
 0x189   :  { %3224 = vmatprep.subr.bf16.mxu1 %v3223_v59  ;;  %3252 = vmatprep.subr.bf16.mxu0 %v3698_v1  ;;  %v3298_v58 = vpack.c.bf16 %v117_v57, %v116_v56  ;;  %v102_v59 = vld [vmem:[%s4893_s4 + $0x30] sm:$0xff] }
 0x18a   :  { %v3277_v62 = vpack.c.bf16 %v103_v60, %v102_v59 }
 0x18c   :  { %3226 = vmatpush1.bf16.msra.mxu1 %v3225_v4  ;;  %3254 = vmatpush3.bf16.msra.mxu0 %v3253_v6  ;;  %v104_v4 = vld [vmem:[%s4893_s4 + $0x40] sm:$0xff] }
 0x18d   :  { %3228 = vmatprep.subr.bf16.mxu1 %v3227_v7  ;;  %3255 = vmatprep.subr.bf16.mxu0 %v3698_v1  ;;  %v3280_v6 = vpack.c.bf16 %v105_v5, %v104_v4  ;;  %v120_v7 = vld [vmem:[%s4893_s4 + $0xc0] sm:$0xff] }
 0x18e   :  { %v3304_v9 = vpack.c.bf16 %v121_v8, %v120_v7 }
 0x190   :  { %3230 = vmatpush1.bf16.msra.mxu1 %v3229_v13  ;;  %3257 = vmatpush3.bf16.msra.mxu0 %v3256_v15  ;;  %v122_v13 = vld [vmem:[%s4893_s4 + $0xd0] sm:$0xff] }
 0x191   :  { %3232 = vmatprep.subr.bf16.mxu1 %v3231_v16  ;;  %3258 = vmatprep.subr.bf16.mxu0 %v3698_v1  ;;  %v3307_v15 = vpack.c.bf16 %v123_v14, %v122_v13  ;;  %v108_v16 = vld [vmem:[%s4893_s4 + $0x60] sm:$0xff]  ;;  %v145_v13 = vld [vmem:[%s4893_s4 + $0x188] sm:$0xff]  ;;  %v3316_v14 = vpack.c.bf16 %v129_v11, %v128_v10 }
 0x192   :  { %v3286_v18 = vpack.c.bf16 %v109_v17, %v108_v16  ;;  %v130_v17 = vld [vmem:[%s4893_s4 + $0x110] sm:$0xff] }
 0x194   :  { %3234 = vmatpush1.bf16.msra.mxu1 %v3233_v22  ;;  %3260 = vmatpush3.bf16.msra.mxu0 %v3259_v24  ;;  %v110_v22 = vld [vmem:[%s4893_s4 + $0x70] sm:$0xff] }
 0x195   :  { %3236 = vmatprep.subr.bf16.mxu1 %v3235_v25  ;;  %3261 = vmatprep.subr.bf16.mxu0 %v3698_v1  ;;  %v126_v24 = vld [vmem:[%s4893_s4 + $0xf0] sm:$0xff]  ;;  %v3289_v25 = vpack.c.bf16 %v111_v23, %v110_v22  ;;  %v147_v22 = vld [vmem:[%s4893_s4 + $0x198] sm:$0xff] }
 0x196   :  { %v3313_v27 = vpack.c.bf16 %v127_v26, %v126_v24  ;;  %v132_v24 = vld [vmem:[%s4893_s4 + $0x120] sm:$0xff] }
 0x198   :  { %3238 = vmatpush1.bf16.msra.mxu1 %v3237_v31  ;;  %3263 = vmatpush3.bf16.msra.mxu0 %v3262_v33  ;;  %v468_v31 = vrot.slane %v320_v30, %v467_v29 }
 0x199   :  { %3240 = vmatprep.subr.bf16.mxu1 %v3239_v34  ;;  %3264 = vmatprep.subr.bf16.mxu0 %v3698_v1 }
 0x19c   :  { %3242 = vmatpush1.bf16.msra.mxu1 %v3241_v38  ;;  %3266 = vmatpush3.bf16.msra.mxu0 %v3265_v39  ;;  %v460_v38 = vrot.slane %v320_v30, %v459_v35  ;;  %v617_v39 = vrot.slane %v321_v36, %v459_v35  ;;  %v134_v30 = vld [vmem:[%s4893_s4 + $0x130] sm:$0xff] }
 0x19d   :  { %3267 = vmatprep.subr.bf16.mxu1 %v3698_v1  ;;  %3291 = vmatprep.subr.bf16.mxu0 %v3698_v1 }
 0x19e   :  { %v3531_v61 = vadd.f32 %v617_v39, %v460_v38  ;;  %v152_v39 = vld [vmem:[%s4893_s4 + $0x1c0] sm:$0xff] }
 0x19f   :  { %694 = vmatmul.mubr.f32.vlgmr.msra.gmra.mrb[0].mxu1 %v4126_v40  ;;  %2719 = vmatmul.mubr.f32.vlgmr.msra.gmra.mrb[4].mxu0 %v4126_v40 }
 0x1a0   :  { %2753 = vmatprep.mubr.msk.f32.mxu1 %vm3700_vm0, %v3699_v2  ;;  %2788 = vmatprep.mubr.msk.f32.mxu0 %vm3700_vm0, %v3699_v2 }
 0x1a1   :  { %3269 = vmatpush3.bf16.msra.mxu1 %v3268_v43  ;;  %3293 = vmatpush3.bf16.msra.mxu0 %v3292_v46  ;;  %v625_v43 = vrot.slane %v321_v36, %v467_v29  ;;  %v136_v36 = vld [vmem:[%s4893_s4 + $0x140] sm:$0xff] }
 0x1a2   :  { %3270 = vmatprep.subr.bf16.mxu1 %v3698_v1  ;;  %3294 = vmatprep.subr.bf16.mxu0 %v3698_v1  ;;  %v3328_v42 = vpack.c.bf16 %v137_v37, %v136_v36  ;;  %v187_v36 = vld [vmem:[%s4893_s4 + $0x2d8] sm:$0xff] }
 0x1a5   :  { %3272 = vmatpush3.bf16.msra.mxu1 %v3271_v49  ;;  %3296 = vmatpush3.bf16.msra.mxu0 %v3295_v52 }
 0x1a6   :  { %3273 = vmatprep.subr.bf16.mxu1 %v3698_v1  ;;  %3297 = vmatprep.subr.bf16.mxu0 %v3698_v1 }
 0x1a9   :  { %3275 = vmatpush3.bf16.msra.mxu1 %v3274_v55  ;;  %3299 = vmatpush3.bf16.msra.mxu0 %v3298_v58 }
 0x1aa   :  { %3276 = vmatprep.subr.bf16.mxu1 %v3698_v1  ;;  %3300 = vmatprep.subr.bf16.mxu0 %v3698_v1 }
 0x1ad   :  { %3278 = vmatpush3.bf16.msra.mxu1 %v3277_v62  ;;  %3302 = vmatpush3.bf16.msra.mxu0 %v3301_v3  ;;  %v3701_v62 = vmov 1966171168  }
 0x1ae   :  { %3279 = vmatprep.subr.bf16.mxu1 %v3698_v1  ;;  %3303 = vmatprep.subr.bf16.mxu0 %v3698_v1  ;;  %v794_v63 = vunpack.c.l.s4 %v3701_v62  ;;  %v161_v62 = vld [vmem:[%s4893_s4 + $0x208] sm:$0xff] }
 0x1b0   :  { %v795_v3 = vunpack.c.0.s8 %v794_v63 }
 0x1b1   :  { %3281 = vmatpush3.bf16.msra.mxu1 %v3280_v6  ;;  %3305 = vmatpush3.bf16.msra.mxu0 %v3304_v9 }
 0x1b2   :  { %3282 = vmatprep.subr.bf16.mxu1 %v3698_v1  ;;  %3306 = vmatprep.subr.bf16.mxu0 %v3698_v1  ;;  %v4255_v6 = vsub.s32 %v795_v3, %v458_v28  ;;  %v149_v28 = vld [vmem:[%s4893_s4 + $0x1a8] sm:$0xff] }
 0x1b3   :  { %v177_v3 = vld [vmem:[%s4893_s4 + $0x288] sm:$0xff] }
 0x1b5   :  { %3284 = vmatpush3.bf16.msra.mxu1 %v3283_v12  ;;  %3308 = vmatpush3.bf16.msra.mxu0 %v3307_v15 }
 0x1b6   :  { %3285 = vmatprep.subr.bf16.mxu1 %v3698_v1  ;;  %3309 = vmatprep.subr.bf16.mxu0 %v3698_v1 }
 0x1b9   :  { %3287 = vmatpush3.bf16.msra.mxu1 %v3286_v18  ;;  %3311 = vmatpush3.bf16.msra.mxu0 %v3310_v21  ;;  %v131_v18 = vld [vmem:[%s4893_s4 + $0x118] sm:$0xff]  ;;  %v146_v21 = vld [vmem:[%s4893_s4 + $0x190] sm:$0xff] }
 0x1ba   :  { %3288 = vmatprep.subr.bf16.mxu1 %v3698_v1  ;;  %3312 = vmatprep.subr.bf16.mxu0 %v3698_v1  ;;  %v3319_v23 = vpack.c.bf16 %v131_v18, %v130_v17  ;;  %v3343_v26 = vpack.c.bf16 %v147_v22, %v146_v21  ;;  %v180_v17 = vld [vmem:[%s4893_s4 + $0x2a0] sm:$0xff]  ;;  %v181_v18 = vld [vmem:[%s4893_s4 + $0x2a8] sm:$0xff]  ;;  %v167_v21 = vld [vmem:[%s4893_s4 + $0x238] sm:$0xff] }
 0x1bb   :  { %v3394_v22 = vpack.c.bf16 %v181_v18, %v180_v17  ;;  %v200_v18 = vld [vmem:[%s4893_s4 + $0x340] sm:$0xff] }
 0x1bd   :  { %3290 = vmatpush3.bf16.msra.mxu1 %v3289_v25  ;;  %3314 = vmatpush3.bf16.msra.mxu0 %v3313_v27  ;;  %v133_v25 = vld [vmem:[%s4893_s4 + $0x128] sm:$0xff]  ;;  %v148_v27 = vld [vmem:[%s4893_s4 + $0x1a0] sm:$0xff] }
 0x1be   :  { %3315 = vmatprep.subr.bf16.mxu1 %v3698_v1  ;;  %3339 = vmatprep.subr.bf16.mxu0 %v3698_v1  ;;  %v3322_v29 = vpack.c.bf16 %v133_v25, %v132_v24  ;;  %v183_v24 = vld [vmem:[%s4893_s4 + $0x2b8] sm:$0xff] }
 0x252   :  { %v609_v32 = vpop.f32.mrb[2].mxu0 }
 0x253   :  { %v610_v33 = vadd.f32 %v609_v32, %v468_v31  ;;  %v2685_v34 = vpop.f32.mrb[3].mxu0  ;;  %v135_v31 = vld [vmem:[%s4893_s4 + $0x138] sm:$0xff]  ;;  %v3346_v32 = vpack.c.bf16 %v149_v28, %v148_v27  ;;  %v169_v27 = vld [vmem:[%s4893_s4 + $0x248] sm:$0xff] }
 0x254   :  { %v151_v34 = vld [vmem:[%s4893_s4 + $0x1b8] sm:$0xff]  ;;  %v3325_v35 = vpack.c.bf16 %v135_v31, %v134_v30  ;;  %v185_v30 = vld [vmem:[%s4893_s4 + $0x2c8] sm:$0xff] }
 0x272   :  { %v695_v45 = vpop.f32.mrb[0].mxu1  ;;  %v766_v46 = vpop.f32.mrb[4].mxu0 }
 0x273   :  { %v3532_v47 = vadd.f32 %v3531_v61, %v695_v45  ;;  %v697_v48 = vpop.f32.mrb[1].mxu1  ;;  %v767_v49 = vadd.f32 %v766_v46, %v625_v43  ;;  %v2720_v50 = vpop.f32.mrb[5].mxu0  ;;  %v138_v61 = vld [vmem:[%s4893_s4 + $0x150] sm:$0xff]  ;;  %v139_v43 = vld [vmem:[%s4893_s4 + $0x158] sm:$0xff] }
 0x274   :  { %v3534_v51 = vadd.f32 %v3533_v44, %v697_v48  ;;  %v3352_v44 = vpack.c.bf16 %v153_v41, %v152_v39  ;;  %v154_v45 = vld [vmem:[%s4893_s4 + $0x1d0] sm:$0xff]  ;;  %v155_v46 = vld [vmem:[%s4893_s4 + $0x1d8] sm:$0xff]  ;;  %v140_v48 = vld [vmem:[%s4893_s4 + $0x160] sm:$0xff] }
 0x275   :  { %v2380_v52 = vmul.f32 -1.442695, %v3532_v47  ;;  %v3331_v47 = vpack.c.bf16 %v139_v43, %v138_v61  ;;  %v3355_v50 = vpack.c.bf16 %v155_v46, %v154_v45  ;;  %v173_v39 = vld [vmem:[%s4893_s4 + $0x268] sm:$0xff]  ;;  %v174_v45 = vld [vmem:[%s4893_s4 + $0x270] sm:$0xff]  ;;  %v175_v46 = vld [vmem:[%s4893_s4 + $0x278] sm:$0xff] }
 0x276   :  { %v2381_v53 = vmul.f32 -1.442695, %v3534_v51  ;;  %v156_v51 = vld [vmem:[%s4893_s4 + $0x1e0] sm:$0xff]  ;;  %v189_v61 = vld [vmem:[%s4893_s4 + $0x2e8] sm:$0xff] }
 0x277   :  { %3549 = vpow2.f32 %v2380_v52  ;;  %v157_v52 = vld [vmem:[%s4893_s4 + $0x1e8] sm:$0xff] }
 0x278   :  { %3551 = vpow2.f32 %v2381_v53 }
 0x281   :  { %v3550_v54 = vpop.eup %3549 }
 0x282   :  { %v774_v55 = vadd.f32 1.0, %v3550_v54  ;;  %v3552_v56 = vpop.eup %3551  ;;  %v142_v54 = vld [vmem:[%s4893_s4 + $0x170] sm:$0xff] }
 0x283   :  { %v781_v57 = vadd.f32 1.0, %v3552_v56  ;;  %v3358_v56 = vpack.c.bf16 %v157_v52, %v156_v51  ;;  %v3385_v51 = vpack.c.bf16 %v175_v46, %v174_v45  ;;  %v192_v52 = vld [vmem:[%s4893_s4 + $0x300] sm:$0xff] }
 0x284   :  { %3553 = vrcp.f32 %v774_v55  ;;  %v143_v55 = vld [vmem:[%s4893_s4 + $0x178] sm:$0xff] }
 0x285   :  { %3555 = vrcp.f32 %v781_v57  ;;  %v158_v57 = vld [vmem:[%s4893_s4 + $0x1f0] sm:$0xff] }
 0x28e   :  { %v3554_v58 = vpop.eup %3553 }
 0x28f   :  { %v784_v59 = vmul.f32 %v3554_v58, %v767_v49  ;;  %v3556_v0 = vpop.eup %3555  ;;  %v141_v49 = vld [vmem:[%s4893_s4 + $0x168] sm:$0xff]  ;;  %v159_v58 = vld [vmem:[%s4893_s4 + $0x1f8] sm:$0xff] }
 0x290   :  { %v787_v4 = vsub.f32 1.0, %v3556_v0  ;;  %v789_v7 = vmul.f32 %v3556_v0, %v4126_v40  ;;  %v144_v40 = vld [vmem:[%s4893_s4 + $0x180] sm:$0xff]  ;;  %v3334_v53 = vpack.c.bf16 %v141_v49, %v140_v48  ;;  %v3361_v63 = vpack.c.bf16 %v159_v58, %v158_v57  ;;  %v190_v48 = vld [vmem:[%s4893_s4 + $0x2f0] sm:$0xff]  ;;  %v191_v49 = vld [vmem:[%s4893_s4 + $0x2f8] sm:$0xff] }
 0x291   :  { %v785_v60 = vadd.f32 %v784_v59, %v610_v33  ;;  %v3340_v19 = vpack.c.bf16 %v145_v13, %v144_v40  ;;  %v150_v33 = vld [vmem:[%s4893_s4 + $0x1b0] sm:$0xff]  ;;  %v3337_v59 = vpack.c.bf16 %v143_v55, %v142_v54  ;;  %v176_v0 = vld [vmem:[%s4893_s4 + $0x280] sm:$0xff]  ;;  %v179_v40 = vld [vmem:[%s4893_s4 + $0x298] sm:$0xff]  ;;  %v3409_v54 = vpack.c.bf16 %v191_v49, %v190_v48 }
 0x292   :  { %v3349_v38 = vpack.c.bf16 %v151_v34, %v150_v33  ;;  %v3388_v10 = vpack.c.bf16 %v177_v3, %v176_v0  ;;  %v171_v33 = vld [vmem:[%s4893_s4 + $0x258] sm:$0xff]  ;;  %v209_v57 = vld [vmem:[%s4893_s4 + $0x388] sm:$0xff]  ;;  %v210_v3 = vld [vmem:[%s4893_s4 + $0x390] sm:$0xff] }
 0x293   :  { %3557 = vtanh.f32 %v785_v60  ;;  %v160_v60 = vld [vmem:[%s4893_s4 + $0x200] sm:$0xff] }
 0x29d   :  { %v3558_v5 = vpop.eup %3557 }
 0x29e   :  { %v788_v8 = vmul.f32 %v3558_v5, %v787_v4  ;;  %v3364_v4 = vpack.c.bf16 %v161_v62, %v160_v60  ;;  %v194_v60 = vld [vmem:[%s4893_s4 + $0x310] sm:$0xff]  ;;  %v195_v62 = vld [vmem:[%s4893_s4 + $0x318] sm:$0xff] }
 0x2a0   :  { %v4258_v9 = vadd.f32 %v789_v7, %v788_v8  ;;  %v162_v7 = vld [vmem:[%s4893_s4 + $0x210] sm:$0xff]  ;;  %v163_v8 = vld [vmem:[%s4893_s4 + $0x218] sm:$0xff] }
 0x2a1   :  { %v3367_v13 = vpack.c.bf16 %v163_v8, %v162_v7  ;;  %v197_v7 = vld [vmem:[%s4893_s4 + $0x328] sm:$0xff] }
 0x2a2   :  { %v799_v12 = vrot.slane %v4258_v9, %v4255_v6  ;;  %2347 = vst [vmem:[#allocation8] sm:$0xff] %v4258_v9  ;;  %v792_v43 = vcombine.high %v4258_v9, %v4258_v9 }
 0x2a4   :  { %v4276_v15 = vrot.slane %v799_v12, %v4255_v6  ;;  %v807_v16 = vcombine.high %v799_v12, %v799_v12  ;;  %v178_v12 = vld [vmem:[%s4893_s4 + $0x290] sm:$0xff] }
 0x2a6   :  { %2754 = vmatmul.mubr.f32.vlgmr.msra.gmra.mrb[2].mxu1 %v4276_v15  ;;  %v4286_v20 = vrot.slane %v807_v16, %v4255_v6  ;;  %v837_v5 = vcombine.high %v4276_v15, %v4276_v15  ;;  %v165_v15 = vld [vmem:[%s4893_s4 + $0x228] sm:$0xff]  ;;  %v3391_v16 = vpack.c.bf16 %v179_v40, %v178_v12  ;;  %v198_v40 = vld [vmem:[%s4893_s4 + $0x330] sm:$0xff] }
 0x2a7   :  { %3317 = vmatpush3.bf16.msra.mxu1 %v3316_v14  ;;  %2823 = vmatprep.mubr.msk.f32.mxu1 %vm3700_vm0, %v3699_v2  ;;  %v164_v14 = vld [vmem:[%s4893_s4 + $0x220] sm:$0xff] }
 0x2a8   :  { %2789 = vmatmul.mubr.f32.vlgmr.msra.gmra.mrb[6].mxu0 %v4286_v20  ;;  %3318 = vmatprep.subr.bf16.mxu1 %v3698_v1  ;;  %v839_v11 = vcombine.high %v4286_v20, %v4286_v20  ;;  %v166_v20 = vld [vmem:[%s4893_s4 + $0x230] sm:$0xff] }
 0x2a9   :  { %3341 = vmatpush3.bf16.msra.mxu0 %v3340_v19  ;;  %2858 = vmatprep.mubr.msk.f32.mxu0 %vm3700_vm0, %v3699_v2  ;;  %v3370_v19 = vpack.c.bf16 %v165_v15, %v164_v14  ;;  %v3373_v25 = vpack.c.bf16 %v167_v21, %v166_v20  ;;  %v214_v15 = vld [vmem:[%s4893_s4 + $0x3b0] sm:$0xff]  ;;  %v216_v21 = vld [vmem:[%s4893_s4 + $0x3c0] sm:$0xff] }
 0x2aa   :  { %3342 = vmatprep.subr.bf16.mxu0 %v3698_v1 }
 0x2ab   :  { %3320 = vmatpush3.bf16.msra.mxu1 %v3319_v23  ;;  %v182_v23 = vld [vmem:[%s4893_s4 + $0x2b0] sm:$0xff] }
 0x2ac   :  { %3321 = vmatprep.subr.bf16.mxu1 %v3698_v1  ;;  %v3397_v28 = vpack.c.bf16 %v183_v24, %v182_v23  ;;  %v202_v24 = vld [vmem:[%s4893_s4 + $0x350] sm:$0xff] }
 0x2ad   :  { %3344 = vmatpush3.bf16.msra.mxu0 %v3343_v26  ;;  %v168_v26 = vld [vmem:[%s4893_s4 + $0x240] sm:$0xff] }
 0x2ae   :  { %3345 = vmatprep.subr.bf16.mxu0 %v3698_v1  ;;  %v3376_v31 = vpack.c.bf16 %v169_v27, %v168_v26  ;;  %v218_v27 = vld [vmem:[%s4893_s4 + $0x3d0] sm:$0xff] }
 0x2af   :  { %3323 = vmatpush3.bf16.msra.mxu1 %v3322_v29  ;;  %v184_v29 = vld [vmem:[%s4893_s4 + $0x2c0] sm:$0xff] }
 0x2b0   :  { %3324 = vmatprep.subr.bf16.mxu1 %v3698_v1  ;;  %v3400_v34 = vpack.c.bf16 %v185_v30, %v184_v29  ;;  %v204_v30 = vld [vmem:[%s4893_s4 + $0x360] sm:$0xff] }
 0x2b1   :  { %3347 = vmatpush3.bf16.msra.mxu0 %v3346_v32  ;;  %v170_v32 = vld [vmem:[%s4893_s4 + $0x250] sm:$0xff] }
 0x2b2   :  { %3348 = vmatprep.subr.bf16.mxu0 %v3698_v1  ;;  %v3379_v37 = vpack.c.bf16 %v171_v33, %v170_v32  ;;  %v220_v33 = vld [vmem:[%s4893_s4 + $0x3e0] sm:$0xff] }
 0x2b3   :  { %3326 = vmatpush3.bf16.msra.mxu1 %v3325_v35  ;;  %v186_v35 = vld [vmem:[%s4893_s4 + $0x2d0] sm:$0xff] }
 0x2b4   :  { %3327 = vmatprep.subr.bf16.mxu1 %v3698_v1  ;;  %v3403_v41 = vpack.c.bf16 %v187_v36, %v186_v35  ;;  %v206_v36 = vld [vmem:[%s4893_s4 + $0x370] sm:$0xff] }
 0x2b5   :  { %3350 = vmatpush3.bf16.msra.mxu0 %v3349_v38  ;;  %v172_v38 = vld [vmem:[%s4893_s4 + $0x260] sm:$0xff] }
 0x2b6   :  { %3351 = vmatprep.subr.bf16.mxu0 %v3698_v1 }
 0x2b7   :  { %3329 = vmatpush3.bf16.msra.mxu1 %v3328_v42  ;;  %v188_v42 = vld [vmem:[%s4893_s4 + $0x2e0] sm:$0xff] }
 0x2b8   :  { %3330 = vmatprep.subr.bf16.mxu1 %v3698_v1 }
 0x2b9   :  { %3353 = vmatpush3.bf16.msra.mxu0 %v3352_v44  ;;  %v3382_v44 = vpack.c.bf16 %v173_v39, %v172_v38  ;;  %v222_v39 = vld [vmem:[%s4893_s4 + $0x3f0] sm:$0xff] }
 0x2ba   :  { %3354 = vmatprep.subr.bf16.mxu0 %v3698_v1 }
 0x2bb   :  { %3332 = vmatpush3.bf16.msra.mxu1 %v3331_v47  ;;  %v3406_v47 = vpack.c.bf16 %v189_v61, %v188_v42 }
 0x2bc   :  { %3333 = vmatprep.subr.bf16.mxu1 %v3698_v1 }
 0x2bd   :  { %3356 = vmatpush3.bf16.msra.mxu0 %v3355_v50  ;;  %v806_v50 = vrot.slane %v792_v43, %v4255_v6 }
 0x2be   :  { %3357 = vmatprep.subr.bf16.mxu0 %v3698_v1 }
 0x2bf   :  { %3335 = vmatpush3.bf16.msra.mxu1 %v3334_v53  ;;  %v193_v53 = vld [vmem:[%s4893_s4 + $0x308] sm:$0xff]  ;;  %v808_v55 = vcombine.high %v806_v50, %v806_v50 }
 0x2c0   :  { %3336 = vmatprep.subr.bf16.mxu1 %v3698_v1  ;;  %v3412_v58 = vpack.c.bf16 %v193_v53, %v192_v52 }
 0x2c1   :  { %3359 = vmatpush3.bf16.msra.mxu0 %v3358_v56  ;;  %v208_v56 = vld [vmem:[%s4893_s4 + $0x380] sm:$0xff]  ;;  %v4532_v0 = vrot.slane %v808_v55, %v4255_v6 }
 0x2c2   :  { %3360 = vmatprep.subr.bf16.mxu0 %v3698_v1 }
 0x2c3   :  { %3338 = vmatpush3.bf16.msra.mxu1 %v3337_v59  ;;  %v4521_v59 = vrot.slane %v806_v50, %v4255_v6  ;;  %v196_v6 = vld [vmem:[%s4893_s4 + $0x320] sm:$0xff] }
 0x2c4   :  { %3363 = vmatprep.subr.bf16.mxu1 %v3698_v1  ;;  %v3418_v12 = vpack.c.bf16 %v197_v7, %v196_v6 }
 0x2c5   :  { %3362 = vmatpush3.bf16.msra.mxu0 %v3361_v63  ;;  %v3436_v63 = vpack.c.bf16 %v209_v57, %v208_v56  ;;  %v838_v43 = vcombine.high %v4521_v59, %v4521_v59 }
 0x2c6   :  { %2824 = vmatmul.mubr.f32.vlgmr.msra.gmra.mrb[4].mxu1 %v837_v5  ;;  %3387 = vmatprep.subr.bf16.mxu0 %v3698_v1  ;;  %v3415_v5 = vpack.c.bf16 %v195_v62, %v194_v60 }
 0x2c7   :  { %3365 = vmatpush3.bf16.msra.mxu1 %v3364_v4  ;;  %2893 = vmatprep.mubr.msk.f32.mxu1 %vm3700_vm0, %v3699_v2  ;;  %v211_v4 = vld [vmem:[%s4893_s4 + $0x398] sm:$0xff] }
 0x2c8   :  { %2859 = vmatmul.mubr.f32.vlgmr.msra.gmra.mrb[8].mxu0 %v839_v11  ;;  %3366 = vmatprep.subr.bf16.mxu1 %v3698_v1  ;;  %v3439_v8 = vpack.c.bf16 %v211_v4, %v210_v3  ;;  %v213_v11 = vld [vmem:[%s4893_s4 + $0x3a8] sm:$0xff] }
 0x2c9   :  { %3389 = vmatpush3.bf16.msra.mxu0 %v3388_v10  ;;  %2928 = vmatprep.mubr.msk.f32.mxu0 %vm3700_vm0, %v3699_v2  ;;  %v212_v10 = vld [vmem:[%s4893_s4 + $0x3a0] sm:$0xff] }
 0x2ca   :  { %3390 = vmatprep.subr.bf16.mxu0 %v3698_v1  ;;  %v3442_v14 = vpack.c.bf16 %v213_v11, %v212_v10 }
 0x2cb   :  { %3368 = vmatpush3.bf16.msra.mxu1 %v3367_v13  ;;  %v199_v13 = vld [vmem:[%s4893_s4 + $0x338] sm:$0xff] }
 0x2cc   :  { %3369 = vmatprep.subr.bf16.mxu1 %v3698_v1  ;;  %v3421_v17 = vpack.c.bf16 %v199_v13, %v198_v40 }
 0x2cd   :  { %3392 = vmatpush3.bf16.msra.mxu0 %v3391_v16  ;;  %v215_v16 = vld [vmem:[%s4893_s4 + $0x3b8] sm:$0xff] }
 0x2ce   :  { %3393 = vmatprep.subr.bf16.mxu0 %v3698_v1  ;;  %v3445_v20 = vpack.c.bf16 %v215_v16, %v214_v15 }
 0x2cf   :  { %3371 = vmatpush3.bf16.msra.mxu1 %v3370_v19  ;;  %v201_v19 = vld [vmem:[%s4893_s4 + $0x348] sm:$0xff] }
 0x2d0   :  { %3372 = vmatprep.subr.bf16.mxu1 %v3698_v1  ;;  %v3424_v23 = vpack.c.bf16 %v201_v19, %v200_v18 }
 0x2d1   :  { %3395 = vmatpush3.bf16.msra.mxu0 %v3394_v22  ;;  %v217_v22 = vld [vmem:[%s4893_s4 + $0x3c8] sm:$0xff] }
 0x2d2   :  { %3396 = vmatprep.subr.bf16.mxu0 %v3698_v1  ;;  %v3448_v26 = vpack.c.bf16 %v217_v22, %v216_v21 }
 0x2d3   :  { %3374 = vmatpush3.bf16.msra.mxu1 %v3373_v25  ;;  %v203_v25 = vld [vmem:[%s4893_s4 + $0x358] sm:$0xff] }
 0x2d4   :  { %3375 = vmatprep.subr.bf16.mxu1 %v3698_v1  ;;  %v3427_v29 = vpack.c.bf16 %v203_v25, %v202_v24  ;;  %v88_v24 = vld [vmem:[%s4892_s3] sm:$0xff] }
 0x2d5   :  { %3398 = vmatpush3.bf16.msra.mxu0 %v3397_v28  ;;  %v219_v28 = vld [vmem:[%s4893_s4 + $0x3d8] sm:$0xff] }
 0x2d6   :  { %3399 = vmatprep.subr.bf16.mxu0 %v3698_v1  ;;  %v3451_v32 = vpack.c.bf16 %v219_v28, %v218_v27 }
 0x2d7   :  { %3377 = vmatpush3.bf16.msra.mxu1 %v3376_v31  ;;  %v205_v31 = vld [vmem:[%s4893_s4 + $0x368] sm:$0xff] }
 0x2d8   :  { %3378 = vmatprep.subr.bf16.mxu1 %v3698_v1  ;;  %v3430_v35 = vpack.c.bf16 %v205_v31, %v204_v30 }
 0x2d9   :  { %3401 = vmatpush3.bf16.msra.mxu0 %v3400_v34  ;;  %v221_v34 = vld [vmem:[%s4893_s4 + $0x3e8] sm:$0xff] }
 0x2da   :  { %3402 = vmatprep.subr.bf16.mxu0 %v3698_v1  ;;  %v3454_v38 = vpack.c.bf16 %v221_v34, %v220_v33 }
 0x2db   :  { %3380 = vmatpush3.bf16.msra.mxu1 %v3379_v37  ;;  %v207_v37 = vld [vmem:[%s4893_s4 + $0x378] sm:$0xff] }
 0x2dc   :  { %3381 = vmatprep.subr.bf16.mxu1 %v3698_v1  ;;  %v3433_v42 = vpack.c.bf16 %v207_v37, %v206_v36 }
 0x2dd   :  { %3404 = vmatpush3.bf16.msra.mxu0 %v3403_v41  ;;  %v223_v41 = vld [vmem:[%s4893_s4 + $0x3f8] sm:$0xff] }
 0x2de   :  { %3405 = vmatprep.subr.bf16.mxu0 %v3698_v1  ;;  %v3457_v61 = vpack.c.bf16 %v223_v41, %v222_v39 }
 0x2df   :  { %3383 = vmatpush3.bf16.msra.mxu1 %v3382_v44  ;;  %v840_v44 = vcombine.high %v4532_v0, %v4532_v0 }
 0x2e0   :  { %3384 = vmatprep.subr.bf16.mxu1 %v3698_v1 }
 0x2e1   :  { %3407 = vmatpush3.bf16.msra.mxu0 %v3406_v47 }
 0x2e2   :  { %3408 = vmatprep.subr.bf16.mxu0 %v3698_v1 }
 0x2e3   :  { %3386 = vmatpush3.bf16.msra.mxu1 %v3385_v51 }
 0x2e4   :  { %3411 = vmatprep.subr.bf16.mxu1 %v3698_v1 }
 0x2e5   :  { %3410 = vmatpush3.bf16.msra.mxu0 %v3409_v54 }
 0x2e6   :  { %2894 = vmatmul.mubr.f32.vlgmr.msra.gmra.mrb[6].mxu1 %v4521_v59  ;;  %3435 = vmatprep.subr.bf16.mxu0 %v3698_v1 }
 0x2e7   :  { %3413 = vmatpush3.bf16.msra.mxu1 %v3412_v58  ;;  %2963 = vmatprep.mubr.msk.f32.mxu1 %vm3700_vm0, %v3699_v2 }
 0x2e8   :  { %2929 = vmatmul.mubr.f32.vlgmr.msra.gmra.mrb[10].mxu0 %v4532_v0  ;;  %3414 = vmatprep.subr.bf16.mxu1 %v3698_v1 }
 0x2e9   :  { %3437 = vmatpush3.bf16.msra.mxu0 %v3436_v63  ;;  %2998 = vmatprep.mubr.msk.f32.mxu0 %vm3700_vm0, %v3699_v2 }
 0x2ea   :  { %3438 = vmatprep.subr.bf16.mxu0 %v3698_v1 }
 0x2eb   :  { %3416 = vmatpush3.bf16.msra.mxu1 %v3415_v5 }
 0x2ec   :  { %3417 = vmatprep.subr.bf16.mxu1 %v3698_v1 }
 0x2ed   :  { %3440 = vmatpush3.bf16.msra.mxu0 %v3439_v8 }
 0x2ee   :  { %3441 = vmatprep.subr.bf16.mxu0 %v3698_v1 }
 0x2ef   :  { %3419 = vmatpush3.bf16.msra.mxu1 %v3418_v12 }
 0x2f0   :  { %3420 = vmatprep.subr.bf16.mxu1 %v3698_v1 }
 0x2f1   :  { %3443 = vmatpush3.bf16.msra.mxu0 %v3442_v14 }
 0x2f2   :  { %3444 = vmatprep.subr.bf16.mxu0 %v3698_v1 }
 0x2f3   :  { %3422 = vmatpush3.bf16.msra.mxu1 %v3421_v17 }
 0x2f4   :  { %3423 = vmatprep.subr.bf16.mxu1 %v3698_v1 }
 0x2f5   :  { %3446 = vmatpush3.bf16.msra.mxu0 %v3445_v20 }
 0x2f6   :  { %3447 = vmatprep.subr.bf16.mxu0 %v3698_v1 }
 0x2f7   :  { %3425 = vmatpush3.bf16.msra.mxu1 %v3424_v23 }
 0x2f8   :  { %3426 = vmatprep.subr.bf16.mxu1 %v3698_v1 }
 0x2f9   :  { %3449 = vmatpush3.bf16.msra.mxu0 %v3448_v26 }
 0x2fa   :  { %3450 = vmatprep.subr.bf16.mxu0 %v3698_v1 }
 0x2fb   :  { %3428 = vmatpush3.bf16.msra.mxu1 %v3427_v29 }
 0x2fc   :  { %3429 = vmatprep.subr.bf16.mxu1 %v3698_v1 }
 0x2fd   :  { %3452 = vmatpush3.bf16.msra.mxu0 %v3451_v32 }
 0x2fe   :  { %3453 = vmatprep.subr.bf16.mxu0 %v3698_v1 }
 0x2ff   :  { %3431 = vmatpush3.bf16.msra.mxu1 %v3430_v35 }
 0x300   :  { %3432 = vmatprep.subr.bf16.mxu1 %v3698_v1 }
 0x301   :  { %3455 = vmatpush3.bf16.msra.mxu0 %v3454_v38 }
 0x302   :  { %3456 = vmatprep.subr.bf16.mxu0 %v3698_v1 }
 0x303   :  { %3434 = vmatpush3.bf16.msra.mxu1 %v3433_v42 }
 0x304   :  { %3021 = vmatprep.subr.mxu1 %v3699_v2 }
 0x305   :  { %3458 = vmatpush3.bf16.msra.mxu0 %v3457_v61 }
 0x306   :  { %2964 = vmatmul.mubr.f32.vlgmr.msra.gmra.mrb[8].mxu1 %v838_v43  ;;  %3001 = vmatprep.subr.mxu0 %v3699_v2 }
 0x307   :  { %3023 = vmatprep.mubr.msk.f32.mxu1 %vm3700_vm0, %v3699_v2 }
 0x308   :  { %2999 = vmatmul.mubr.f32.vlgmr.msra.gmra.mrb[12].mxu0 %v840_v44 }
 0x309   :  { %3003 = vmatprep.mubr.msk.f32.mxu0 %vm3700_vm0, %v3699_v2  ;;  %3002 = vmatpush3.msra.mxu0 %v88_v24 }
 0x30a   :  { %3006 = vmatprep.subr.mxu0 %v3699_v2 }
 0x379   :  { %v915_v45 = vpop.f32.mrb[2].mxu1 }
 0x37a   :  { %v2755_v46 = vpop.f32.mrb[3].mxu1  ;;  %v1410_v47 = vsel %vm1409_vm3, %v915_v45, -inf }
 0x37b   :  { %1411 = vmax.xlane.f32.xlu0 %v1410_v47  ;;  %v985_v48 = vpop.f32.mrb[6].mxu0 }
 0x37c   :  { %v2790_v49 = vpop.f32.mrb[7].mxu0  ;;  %v1413_v50 = vsel %vm1409_vm3, %v985_v48, -inf }
 0x37d   :  { %1414 = vmax.xlane.f32.xlu1 %v1413_v50 }
 0x399   :  { %v1055_v51 = vpop.f32.mrb[4].mxu1 }
 0x39a   :  { %v2825_v52 = vpop.f32.mrb[5].mxu1  ;;  %v1416_v53 = vsel %vm1409_vm3, %v1055_v51, -inf }
 0x39b   :  { %1417 = vmax.xlane.f32.xlu1 %v1416_v53  ;;  %v1125_v54 = vpop.f32.mrb[8].mxu0 }
 0x39c   :  { %v2860_v55 = vpop.f32.mrb[9].mxu0  ;;  %v1419_v56 = vsel %vm1409_vm3, %v1125_v54, -inf }
 0x39f   :  { %1420 = vmax.xlane.f32.xlu1 %v1419_v56 }
 0x3b9   :  { %v1195_v57 = vpop.f32.mrb[6].mxu1 }
 0x3ba   :  { %v2895_v58 = vpop.f32.mrb[7].mxu1  ;;  %v1422_v59 = vsel %vm1409_vm3, %v1195_v57, -inf }
 0x3bb   :  { %1423 = vmax.xlane.f32.xlu1 %v1422_v59  ;;  %v1265_v60 = vpop.f32.mrb[10].mxu0 }
 0x3bc   :  { %v2930_v62 = vpop.f32.mrb[11].mxu0  ;;  %v1425_v63 = vsel %vm1409_vm3, %v1265_v60, -inf }
 0x3bf   :  { %1426 = vmax.xlane.f32.xlu1 %v1425_v63  ;;  %v91_v63 = vld [vmem:[%s4892_s3 + $0x18] sm:$0xff] }
 0x3d9   :  { %v1335_v0 = vpop.f32.mrb[8].mxu1 }
 0x3da   :  { %v2965_v3 = vpop.f32.mrb[9].mxu1  ;;  %v1428_v4 = vsel %vm1409_vm3, %v1335_v0, -inf }
 0x3db   :  { %1429 = vmax.xlane.f32.xlu1 %v1428_v4  ;;  %v1405_v5 = vpop.f32.mrb[12].mxu0  ;;  %v93_v4 = vld [vmem:[%s4892_s3 + $0x28] sm:$0xff] }
 0x3dc   :  { %v3000_v6 = vpop.f32.mrb[13].mxu0  ;;  %v1431_v7 = vsel %vm1409_vm3, %v1405_v5, -inf }
 0x3df   :  { %1432 = vmax.xlane.f32.xlu1 %v1431_v7 }
 0x408   :  { %v1412_v8 = vpop.xlane.xlu0 %1411 }
 0x409   :  { %v1434_v10 = vsub.f32 %v915_v45, %v1412_v8  ;;  %v92_v45 = vld [vmem:[%s4892_s3 + $0x20] sm:$0xff] }
 0x40a   :  { %v1415_v11 = vpop.xlane.xlu1 %1414  ;;  %3022 = vmatpush3.msra.mxu1 %v92_v45  ;;  %v340_v45 = vld [vmem:[%s4898_s9 + $0x90] sm:$0xff] }
 0x40b   :  { %v1442_v12 = vmul.f32 1.442695, %v1434_v10  ;;  %v1435_v40 = vsub.f32 %v985_v48, %v1415_v11  ;;  %3031 = vmatprep.subr.mxu1 %v3699_v2  ;;  %v94_v10 = vld [vmem:[%s4892_s3 + $0x30] sm:$0xff] }
 0x40d   :  { %3559 = vpow2.f32 %v1442_v12  ;;  %v1444_v13 = vmul.f32 1.442695, %v1435_v40  ;;  %v95_v40 = vld [vmem:[%s4892_s3 + $0x38] sm:$0xff] }
 0x40f   :  { %3561 = vpow2.f32 %v1444_v13 }
 0x417   :  { %v3560_v14 = vpop.eup %3559 }
 0x418   :  { %v1458_v15 = vsel %vm1409_vm3, %v3560_v14, 0.0 }
 0x419   :  { %v4651_v16 = vpop.eup %3561  ;;  %1459 = vadd.xlane.f32.xlu1 %v1458_v15 }
 0x41a   :  { %v1461_v17 = vsel %vm1409_vm3, %v4651_v16, 0.0 }
 0x41d   :  { %1462 = vadd.xlane.f32.xlu1 %v1461_v17  ;;  %v322_v17 = vld [vmem:[%s4898_s9] sm:$0xff] }
 0x428   :  { %v1418_v18 = vpop.xlane.xlu1 %1417 }
 0x429   :  { %v1436_v19 = vsub.f32 %v1055_v51, %v1418_v18  ;;  %v323_v18 = vld [vmem:[%s4898_s9 + $0x8] sm:$0xff] }
 0x42b   :  { %v1446_v20 = vmul.f32 1.442695, %v1436_v19 }
 0x42c   :  { %v1421_v21 = vpop.xlane.xlu1 %1420 }
 0x42d   :  { %3563 = vpow2.f32 %v1446_v20  ;;  %v1437_v22 = vsub.f32 %v1125_v54, %v1421_v21  ;;  %v89_v54 = vld [vmem:[%s4892_s3 + $0x8] sm:$0xff]  ;;  %v3484_v20 = vpack.c.bf16 %v323_v18, %v322_v17 }
 0x42f   :  { %v1448_v23 = vmul.f32 1.442695, %v1437_v22  ;;  %v324_v22 = vld [vmem:[%s4898_s9 + $0x10] sm:$0xff] }
 0x431   :  { %3565 = vpow2.f32 %v1448_v23  ;;  %v325_v23 = vld [vmem:[%s4898_s9 + $0x18] sm:$0xff] }
 0x432   :  { %v3487_v24 = vpack.c.bf16 %v325_v23, %v324_v22 }
 0x437   :  { %v3564_v25 = vpop.eup %3563 }
 0x438   :  { %v1464_v26 = vsel %vm1409_vm3, %v3564_v25, 0.0 }
 0x439   :  { %1465 = vadd.xlane.f32.xlu0 %v1464_v26  ;;  %v327_v26 = vld [vmem:[%s4898_s9 + $0x28] sm:$0xff] }
 0x43b   :  { %v4660_v27 = vpop.eup %3565 }
 0x43c   :  { %v1467_v28 = vsel %vm1409_vm3, %v4660_v27, 0.0 }
 0x43d   :  { %1468 = vadd.xlane.f32.xlu1 %v1467_v28  ;;  %v328_v28 = vld [vmem:[%s4898_s9 + $0x30] sm:$0xff] }
 0x448   :  { %v1424_v29 = vpop.xlane.xlu1 %1423 }
 0x449   :  { %v1438_v30 = vsub.f32 %v1195_v57, %v1424_v29  ;;  %v90_v57 = vld [vmem:[%s4892_s3 + $0x10] sm:$0xff]  ;;  %v329_v29 = vld [vmem:[%s4898_s9 + $0x38] sm:$0xff] }
 0x44b   :  { %v1450_v31 = vmul.f32 1.442695, %v1438_v30  ;;  %v3493_v30 = vpack.c.bf16 %v329_v29, %v328_v28 }
 0x44c   :  { %v1427_v32 = vpop.xlane.xlu1 %1426 }
 0x44d   :  { %3567 = vpow2.f32 %v1450_v31  ;;  %v1439_v33 = vsub.f32 %v1265_v60, %v1427_v32  ;;  %v330_v31 = vld [vmem:[%s4898_s9 + $0x40] sm:$0xff]  ;;  %v331_v32 = vld [vmem:[%s4898_s9 + $0x48] sm:$0xff] }
 0x44f   :  { %v1452_v34 = vmul.f32 1.442695, %v1439_v33  ;;  %v3496_v33 = vpack.c.bf16 %v331_v32, %v330_v31  ;;  %v356_v31 = vld [vmem:[#allocation5 + $0x8] sm:$0xff] }
 0x451   :  { %3569 = vpow2.f32 %v1452_v34  ;;  %v332_v34 = vld [vmem:[%s4898_s9 + $0x50] sm:$0xff] }
 0x457   :  { %v4664_v35 = vpop.eup %3567 }
 0x458   :  { %v1470_v36 = vsel %vm1409_vm3, %v4664_v35, 0.0 }
 0x459   :  { %1471 = vadd.xlane.f32.xlu0 %v1470_v36 }
 0x45b   :  { %v4668_v37 = vpop.eup %3569 }
 0x45c   :  { %v1473_v38 = vsel %vm1409_vm3, %v4668_v37, 0.0 }
 0x45d   :  { %1474 = vadd.xlane.f32.xlu1 %v1473_v38  ;;  %v335_v38 = vld [vmem:[%s4898_s9 + $0x68] sm:$0xff] }
 0x468   :  { %v1430_v39 = vpop.xlane.xlu1 %1429 }
 0x469   :  { %v1440_v41 = vsub.f32 %v1335_v0, %v1430_v39 }
 0x46b   :  { %v1454_v42 = vmul.f32 1.442695, %v1440_v41  ;;  %v336_v41 = vld [vmem:[%s4898_s9 + $0x70] sm:$0xff] }
 0x46c   :  { %v1433_v61 = vpop.xlane.xlu1 %1432 }
 0x46d   :  { %3571 = vpow2.f32 %v1454_v42  ;;  %v1441_v43 = vsub.f32 %v1405_v5, %v1433_v61  ;;  %v337_v42 = vld [vmem:[%s4898_s9 + $0x78] sm:$0xff] }
 0x46e   :  { %v3505_v61 = vpack.c.bf16 %v337_v42, %v336_v41  ;;  %v359_v42 = vld [vmem:[#allocation5 + $0x20] sm:$0xff] }
 0x46f   :  { %v1456_v44 = vmul.f32 1.442695, %v1441_v43  ;;  %v338_v43 = vld [vmem:[%s4898_s9 + $0x80] sm:$0xff] }
 0x471   :  { %3573 = vpow2.f32 %v1456_v44  ;;  %v339_v44 = vld [vmem:[%s4898_s9 + $0x88] sm:$0xff] }
 0x477   :  { %v4676_v46 = vpop.eup %3571 }
 0x478   :  { %v1476_v47 = vsel %vm1409_vm3, %v4676_v46, 0.0 }
 0x479   :  { %1477 = vadd.xlane.f32.xlu0 %v1476_v47  ;;  %v341_v47 = vld [vmem:[%s4898_s9 + $0x98] sm:$0xff] }
 0x47b   :  { %v4680_v48 = vpop.eup %3573 }
 0x47c   :  { %v1479_v49 = vsel %vm1409_vm3, %v4680_v48, 0.0 }
 0x47d   :  { %1480 = vadd.xlane.f32.xlu1 %v1479_v49  ;;  %v343_v49 = vld [vmem:[%s4898_s9 + $0xa8] sm:$0xff] }
 0x4a6   :  { %v1460_v50 = vpop.xlane.xlu1 %1459 }
 0x4a7   :  { %3575 = vrcp.f32 %v1460_v50 }
 0x4aa   :  { %v1463_v51 = vpop.xlane.xlu1 %1462 }
 0x4ab   :  { %3577 = vrcp.f32 %v1463_v51  ;;  %v344_v51 = vld [vmem:[%s4898_s9 + $0xb0] sm:$0xff] }
 0x4b1   :  { %v3576_v52 = vpop.eup %3575 }
 0x4b2   :  { %v1490_v53 = vmul.f32 %v3576_v52, %v3560_v14  ;;  %v345_v52 = vld [vmem:[%s4898_s9 + $0xb8] sm:$0xff] }
 0x4b4   :  { %3004 = vmatmul.mubr.msk.f32.vlgmr.msra.gmra.mrb[14].mxu0 %vm1498_vm4, %v1490_v53  ;;  %v3469_v53 = vpack.c.bf16 %v345_v52, %v344_v51  ;;  %v366_v51 = vld [vmem:[#allocation5 + $0x58] sm:$0xff] }
 0x4b5   :  { %v3578_v55 = vpop.eup %3577  ;;  %3007 = vmatpush3.msra.mxu0 %v89_v54  ;;  %3008 = vmatprep.mubr.msk.f32.mxu0 %vm3700_vm0, %v3699_v2  ;;  %v346_v54 = vld [vmem:[%s4898_s9 + $0xc0] sm:$0xff] }
 0x4b6   :  { %v1491_v56 = vmul.f32 %v3578_v55, %v4651_v16  ;;  %3011 = vmatprep.subr.mxu0 %v3699_v2  ;;  %v347_v55 = vld [vmem:[%s4898_s9 + $0xc8] sm:$0xff] }
 0x4b8   :  { %3009 = vmatmul.mubr.msk.f32.vlgmr.msra.gmra.mrb[16].mxu0 %vm1498_vm4, %v1491_v56  ;;  %v3472_v56 = vpack.c.bf16 %v347_v55, %v346_v54  ;;  %v368_v54 = vld [vmem:[#allocation5 + $0x68] sm:$0xff] }
 0x4b9   :  { %3012 = vmatpush3.msra.mxu0 %v90_v57  ;;  %3013 = vmatprep.mubr.msk.f32.mxu0 %vm3700_vm0, %v3699_v2  ;;  %v348_v57 = vld [vmem:[%s4898_s9 + $0xd0] sm:$0xff] }
 0x4ba   :  { %3016 = vmatprep.subr.mxu0 %v3699_v2 }
 0x4c6   :  { %v1466_v58 = vpop.xlane.xlu0 %1465 }
 0x4c7   :  { %3579 = vrcp.f32 %v1466_v58  ;;  %v349_v58 = vld [vmem:[%s4898_s9 + $0xd8] sm:$0xff] }
 0x4ca   :  { %v1469_v59 = vpop.xlane.xlu1 %1468 }
 0x4cb   :  { %3581 = vrcp.f32 %v1469_v59  ;;  %v3475_v59 = vpack.c.bf16 %v349_v58, %v348_v57  ;;  %v370_v57 = vld [vmem:[#allocation5 + $0x78] sm:$0xff] }
 0x4d1   :  { %v3580_v60 = vpop.eup %3579 }
 0x4d2   :  { %v1492_v62 = vmul.f32 %v3580_v60, %v3564_v25  ;;  %v326_v25 = vld [vmem:[%s4898_s9 + $0x20] sm:$0xff] }
 0x4d3   :  { %v350_v60 = vld [vmem:[%s4898_s9 + $0xe0] sm:$0xff] }
 0x4d4   :  { %3014 = vmatmul.mubr.msk.f32.vlgmr.msra.gmra.mrb[18].mxu0 %vm1498_vm4, %v1492_v62  ;;  %v351_v62 = vld [vmem:[%s4898_s9 + $0xe8] sm:$0xff] }
 0x4d5   :  { %v3582_v0 = vpop.eup %3581  ;;  %3017 = vmatpush3.msra.mxu0 %v91_v63  ;;  %3018 = vmatprep.mubr.msk.f32.mxu0 %vm3700_vm0, %v3699_v2  ;;  %v3478_v63 = vpack.c.bf16 %v351_v62, %v350_v60 }
 0x4d6   :  { %v1493_v3 = vmul.f32 %v3582_v0, %v4660_v27  ;;  %3026 = vmatprep.subr.mxu0 %v3699_v2  ;;  %v3490_v27 = vpack.c.bf16 %v327_v26, %v326_v25  ;;  %v352_v0 = vld [vmem:[%s4898_s9 + $0xf0] sm:$0xff] }
 0x4d8   :  { %3019 = vmatmul.mubr.msk.f32.vlgmr.msra.gmra.mrb[20].mxu0 %vm1498_vm4, %v1493_v3  ;;  %v353_v3 = vld [vmem:[%s4898_s9 + $0xf8] sm:$0xff] }
 0x4d9   :  { %3027 = vmatpush3.msra.mxu0 %v93_v4  ;;  %3028 = vmatprep.mubr.msk.f32.mxu0 %vm3700_vm0, %v3699_v2  ;;  %v3481_v4 = vpack.c.bf16 %v353_v3, %v352_v0 }
 0x4da   :  { %3036 = vmatprep.subr.mxu0 %v3699_v2 }
 0x4e6   :  { %v1472_v5 = vpop.xlane.xlu0 %1471 }
 0x4e7   :  { %3583 = vrcp.f32 %v1472_v5 }
 0x4ea   :  { %v1475_v6 = vpop.xlane.xlu1 %1474 }
 0x4eb   :  { %3585 = vrcp.f32 %v1475_v6 }
 0x4f1   :  { %v3584_v7 = vpop.eup %3583 }
 0x4f2   :  { %v1494_v8 = vmul.f32 %v3584_v7, %v4664_v35  ;;  %v333_v35 = vld [vmem:[%s4898_s9 + $0x58] sm:$0xff] }
 0x4f3   :  { %v3499_v36 = vpack.c.bf16 %v333_v35, %v332_v34 }
 0x4f4   :  { %3024 = vmatmul.mubr.msk.f32.vlgmr.msra.gmra.mrb[10].mxu1 %vm1498_vm4, %v1494_v8 }
 0x4f5   :  { %v3586_v11 = vpop.eup %3585  ;;  %3032 = vmatpush3.msra.mxu1 %v94_v10  ;;  %3033 = vmatprep.mubr.msk.f32.mxu1 %vm3700_vm0, %v3699_v2 }
 0x4f6   :  { %v1495_v12 = vmul.f32 %v3586_v11, %v4668_v37  ;;  %3459 = vmatprep.subr.bf16.mxu1 %v3698_v1  ;;  %v334_v37 = vld [vmem:[%s4898_s9 + $0x60] sm:$0xff] }
 0x4f7   :  { %v3502_v39 = vpack.c.bf16 %v335_v38, %v334_v37  ;;  %v357_v37 = vld [vmem:[#allocation5 + $0x10] sm:$0xff]  ;;  %v358_v38 = vld [vmem:[#allocation5 + $0x18] sm:$0xff] }
 0x4f8   :  { %3029 = vmatmul.mubr.msk.f32.vlgmr.msra.gmra.mrb[22].mxu0 %vm1498_vm4, %v1495_v12  ;;  %v3511_v41 = vpack.c.bf16 %v358_v38, %v357_v37 }
 0x4f9   :  { %3037 = vmatpush3.msra.mxu0 %v95_v40  ;;  %3038 = vmatprep.mubr.msk.f32.mxu0 %vm3700_vm0, %v3699_v2 }
 0x4fa   :  { %3483 = vmatprep.subr.bf16.mxu0 %v3698_v1 }
 0x506   :  { %v1478_v13 = vpop.xlane.xlu0 %1477 }
 0x507   :  { %3587 = vrcp.f32 %v1478_v13 }
 0x50a   :  { %v1481_v14 = vpop.xlane.xlu1 %1480 }
 0x50b   :  { %3589 = vrcp.f32 %v1481_v14 }
 0x511   :  { %v3588_v15 = vpop.eup %3587 }
 0x512   :  { %v1496_v16 = vmul.f32 %v3588_v15, %v4676_v46  ;;  %v3460_v46 = vpack.c.bf16 %v339_v44, %v338_v43  ;;  %v361_v44 = vld [vmem:[#allocation5 + $0x30] sm:$0xff] }
 0x514   :  { %3034 = vmatmul.mubr.msk.f32.vlgmr.msra.gmra.mrb[12].mxu1 %vm1498_vm4, %v1496_v16 }
 0x515   :  { %v3590_v19 = vpop.eup %3589  ;;  %3073 = vmatprep.mubr.msk.f32.mxu1 %vm3700_vm0, %v3699_v2  ;;  %3461 = vmatpush3.bf16.msra.mxu1 %v3460_v46 }
 0x516   :  { %v1497_v21 = vmul.f32 %v3590_v19, %v4680_v48  ;;  %v3463_v48 = vpack.c.bf16 %v341_v47, %v340_v45  ;;  %3462 = vmatprep.subr.bf16.mxu1 %v3698_v1  ;;  %v362_v45 = vld [vmem:[#allocation5 + $0x38] sm:$0xff] }
 0x517   :  { %v3517_v46 = vpack.c.bf16 %v362_v45, %v361_v44 }
 0x518   :  { %3039 = vmatmul.mubr.msk.f32.vlgmr.msra.gmra.mrb[24].mxu0 %vm1498_vm4, %v1497_v21 }
 0x519   :  { %3485 = vmatpush3.bf16.msra.mxu0 %v3484_v20  ;;  %3108 = vmatprep.mubr.msk.f32.mxu0 %vm3700_vm0, %v3699_v2 }
 0x51a   :  { %3486 = vmatprep.subr.bf16.mxu0 %v3698_v1  ;;  %3464 = vmatpush3.bf16.msra.mxu1 %v3463_v48 }
 0x51b   :  { %3465 = vmatprep.subr.bf16.mxu1 %v3698_v1 }
 0x51d   :  { %3488 = vmatpush3.bf16.msra.mxu0 %v3487_v24 }
 0x51e   :  { %3489 = vmatprep.subr.bf16.mxu0 %v3698_v1 }
 0x521   :  { %3491 = vmatpush3.bf16.msra.mxu0 %v3490_v27 }
 0x522   :  { %3492 = vmatprep.subr.bf16.mxu0 %v3698_v1 }
 0x525   :  { %3494 = vmatpush3.bf16.msra.mxu0 %v3493_v30  ;;  %v355_v30 = vld [vmem:[#allocation5] sm:$0xff] }
 0x526   :  { %3495 = vmatprep.subr.bf16.mxu0 %v3698_v1 }
 0x529   :  { %3497 = vmatpush3.bf16.msra.mxu0 %v3496_v33 }
 0x52a   :  { %3498 = vmatprep.subr.bf16.mxu0 %v3698_v1 }
 0x52d   :  { %3500 = vmatpush3.bf16.msra.mxu0 %v3499_v36  ;;  %v3508_v36 = vpack.c.bf16 %v356_v31, %v355_v30 }
 0x52e   :  { %3501 = vmatprep.subr.bf16.mxu0 %v3698_v1 }
 0x531   :  { %3503 = vmatpush3.bf16.msra.mxu0 %v3502_v39 }
 0x532   :  { %3504 = vmatprep.subr.bf16.mxu0 %v3698_v1 }
 0x535   :  { %3506 = vmatpush3.bf16.msra.mxu0 %v3505_v61  ;;  %v360_v61 = vld [vmem:[#allocation5 + $0x28] sm:$0xff] }
 0x536   :  { %v3514_v43 = vpack.c.bf16 %v360_v61, %v359_v42 }
 0x538   :  { %3109 = vmatmul.mubr.f32.vlgmr.msra.gmra.mrb[26].mxu0 %v4258_v9  ;;  %v342_v9 = vld [vmem:[%s4898_s9 + $0xa0] sm:$0xff] }
 0x539   :  { %v3466_v50 = vpack.c.bf16 %v343_v49, %v342_v9  ;;  %v364_v9 = vld [vmem:[#allocation5 + $0x48] sm:$0xff] }
 0x53b   :  { %3467 = vmatpush3.bf16.msra.mxu1 %v3466_v50  ;;  %v365_v50 = vld [vmem:[#allocation5 + $0x50] sm:$0xff] }
 0x53c   :  { %3468 = vmatprep.subr.bf16.mxu1 %v3698_v1  ;;  %v3523_v52 = vpack.c.bf16 %v366_v51, %v365_v50 }
 0x53f   :  { %3470 = vmatpush3.bf16.msra.mxu1 %v3469_v53  ;;  %v367_v53 = vld [vmem:[#allocation5 + $0x60] sm:$0xff] }
 0x540   :  { %3471 = vmatprep.subr.bf16.mxu1 %v3698_v1  ;;  %v3526_v55 = vpack.c.bf16 %v368_v54, %v367_v53 }
 0x543   :  { %3473 = vmatpush3.bf16.msra.mxu1 %v3472_v56  ;;  %v369_v56 = vld [vmem:[#allocation5 + $0x70] sm:$0xff] }
 0x544   :  { %3474 = vmatprep.subr.bf16.mxu1 %v3698_v1  ;;  %v3529_v58 = vpack.c.bf16 %v370_v57, %v369_v56 }
 0x547   :  { %3476 = vmatpush3.bf16.msra.mxu1 %v3475_v59  ;;  %v2390_v59 = vld [vmem:[%s4899_s10] ss:$0 sm:$0xff]  ;;  %s3702_s10 = smov [#allocation8]  }
 0x548   :  { %3477 = vmatprep.subr.bf16.mxu1 %v3698_v1  ;;  %s2364_s23 = sshll.u32 %s3702_s10, 4  ;;  %s2365_s23 = int_to_ptr.vmem [resolvable:$true] %s2364_s23 }
 0x549   :  { %s3641_s24 = scalar_lea.vmem %s2365_s23, 128  ;;  %p3646_p3 = scmp.lt.s32.totalorder %s2365_s23, %s2365_s23 }
 0x54a   :  { %p3642_p2 = scmp.ne.s32.totalorder %s2365_s23, %s3641_s24  ;;  %p3647_p4 = scmp.lt.s32.totalorder %s3641_s24, %s3641_s24 }
 0x54b   :  { %3479 = vmatpush3.bf16.msra.mxu1 %v3478_v63 }
 0x54c   :  { %3480 = vmatprep.subr.bf16.mxu1 %v3698_v1  ;;  %p3648_p5 = por %p3647_p4, %p3646_p3 }
 0x54e   :  { %p3649_p6 = pnand %p3648_p5, %p3642_p2 }
 0x54f   :  { %3482 = vmatpush3.bf16.msra.mxu1 %v3481_v4  ;;  %v2391_v4 = vld [vmem:[%s4901_s12] ss:$0 sm:$0xff] }
 0x550   :  { %3507 = vmatprep.subr.bf16.mxu1 %v3698_v1 }
 0x587   :  { %v1568_v5 = vpop.f32.mrb[14].mxu0 }
 0x588   :  { %v3005_v6 = vpop.f32.mrb[15].mxu0 }
 0x58b   :  { %v1641_v7 = vpop.f32.mrb[16].mxu0 }
 0x58c   :  { %v2091_v8 = vrot.slane %v1641_v7, 7  ;;  %v3010_v10 = vpop.f32.mrb[17].mxu0 }
 0x58e   :  { %v2093_v11 = vsel %vm2092_vm5, %v2091_v8, %v1568_v5 }
 0x5a7   :  { %v1714_v12 = vpop.f32.mrb[18].mxu0 }
 0x5a8   :  { %v2094_v40 = vrot.slane %v1714_v12, 6  ;;  %v3015_v13 = vpop.f32.mrb[19].mxu0 }
 0x5aa   :  { %v2096_v14 = vsel %vm2095_vm6, %v2094_v40, %v2093_v11 }
 0x5ab   :  { %v1787_v15 = vpop.f32.mrb[20].mxu0 }
 0x5ac   :  { %v2097_v16 = vrot.slane %v1787_v15, 5  ;;  %v3020_v17 = vpop.f32.mrb[21].mxu0 }
 0x5ae   :  { %v2099_v18 = vsel %vm2098_vm7, %v2097_v16, %v2096_v14 }
 0x5c7   :  { %v1860_v19 = vpop.f32.mrb[10].mxu1 }
 0x5c8   :  { %v2100_v20 = vrot.slane %v1860_v19, 4  ;;  %v3025_v21 = vpop.f32.mrb[11].mxu1 }
 0x5ca   :  { %v2102_v22 = vsel %vm2101_vm8, %v2100_v20, %v2099_v18 }
 0x5cb   :  { %v1933_v23 = vpop.f32.mrb[22].mxu0 }
 0x5cc   :  { %v2103_v24 = vrot.slane %v1933_v23, 3  ;;  %v3030_v25 = vpop.f32.mrb[23].mxu0 }
 0x5ce   :  { %v2105_v26 = vsel %vm2104_vm9, %v2103_v24, %v2102_v22 }
 0x5e7   :  { %v2006_v27 = vpop.f32.mrb[12].mxu1 }
 0x5e8   :  { %v2106_v28 = vrot.slane %v2006_v27, 2  ;;  %v3035_v29 = vpop.f32.mrb[13].mxu1 }
 0x5ea   :  { %v2108_v32 = vsel %vm2107_vm10, %v2106_v28, %v2105_v26 }
 0x5eb   :  { %v2079_v33 = vpop.f32.mrb[24].mxu0 }
 0x5ec   :  { %v2109_v34 = vrot.slane %v2079_v33, 1  ;;  %v3040_v35 = vpop.f32.mrb[25].mxu0 }
 0x5ee   :  { %v2111_v39 = vsel %vm2110_vm11, %v2109_v34, %v2108_v32 }
 0x5ef   :  { %3074 = vmatmul.mubr.f32.vlgmr.msra.gmra.mrb[14].mxu1 %v2111_v39 }
 0x5f0   :  { %3509 = vmatpush3.bf16.msra.mxu1 %v3508_v36  ;;  %3143 = vmatprep.mubr.msk.f32.mxu1 %vm3700_vm0, %v3699_v2  ;;  %v363_v2 = vld [vmem:[#allocation5 + $0x40] sm:$0xff] }
 0x5f1   :  { %3510 = vmatprep.subr.bf16.mxu1 %v3698_v1  ;;  %v3520_v49 = vpack.c.bf16 %v364_v9, %v363_v2 }
 0x5f4   :  { %3512 = vmatpush3.bf16.msra.mxu1 %v3511_v41 }
 0x5f5   :  { %3513 = vmatprep.subr.bf16.mxu1 %v3698_v1 }
 0x5f8   :  { %3515 = vmatpush3.bf16.msra.mxu1 %v3514_v43 }
 0x5f9   :  { %3516 = vmatprep.subr.bf16.mxu1 %v3698_v1 }
 0x5fc   :  { %3518 = vmatpush3.bf16.msra.mxu1 %v3517_v46 }
 0x5fd   :  { %3519 = vmatprep.subr.bf16.mxu1 %v3698_v1 }
 0x600   :  { %3521 = vmatpush3.bf16.msra.mxu1 %v3520_v49 }
 0x601   :  { %3522 = vmatprep.subr.bf16.mxu1 %v3698_v1 }
 0x604   :  { %3524 = vmatpush3.bf16.msra.mxu1 %v3523_v52 }
 0x605   :  { %3525 = vmatprep.subr.bf16.mxu1 %v3698_v1 }
 0x608   :  { %3527 = vmatpush3.bf16.msra.mxu1 %v3526_v55 }
 0x609   :  { %3528 = vmatprep.subr.bf16.mxu1 %v3698_v1 }
 0x60b   :  { %v2249_v47 = vpop.f32.mrb[26].mxu0 }
 0x60c   :  { %v3110_v48 = vpop.f32.mrb[27].mxu0  ;;  %3530 = vmatpush3.bf16.msra.mxu1 %v3529_v58 }
 0x6c2   :  { %v2179_v60 = vpop.f32.mrb[14].mxu1 }
 0x6c3   :  { %v2250_v62 = vadd.f32 %v2249_v47, %v2179_v60  ;;  %v3075_v63 = vpop.f32.mrb[15].mxu1 }
 0x6c5   :  { %v2259_v0 = vadd.f32 %v2390_v59, %v2250_v62 }
 0x6c7   :  { %3591 = vtanh.f32 %v2259_v0 }
 0x6d1   :  { %v3592_v3 = vpop.eup %3591 }
 0x6d2   :  { %3144 = vmatmul.mubr.f32.vlgmr.msra.gmra.mrb[16].mxu1 %v3592_v3 }
 0x7a5   :  { %v2333_v5 = vpop.f32.mrb[16].mxu1 }
 0x7a6   :  { %v2334_v6 = vadd.f32 %v2391_v4, %v2333_v5  ;;  %v3145_v7 = vpop.f32.mrb[17].mxu1 }
 0x7a8   :  { %2337 = vmax.xlane.f32.xlu0 %v2334_v6 }
 0x835   :  { %v2338_v1 = vpop.xlane.xlu0 %2337 }
 0x836   :  { %v2339_v8 = vsub.f32 %v2334_v6, %v2338_v1 }
 0x838   :  { %v2340_v10 = vmul.f32 1.442695, %v2339_v8 }
 0x83a   :  { %3593 = vpow2.f32 %v2340_v10 }
 0x844   :  { %v3594_v11 = vpop.eup %3593 }
 0x845   :  { %2342 = vadd.xlane.f32.xlu1 %v3594_v11 }
 0x846   :  { %3652 = shalt.err (!%p3649_p6)
}
 0x847   :  { %s3653_s0 = scalar_lea.hbm %s4903_s14, 128 }
 0x848   :  { %p3654_p7 = scmp.ne.s32.totalorder %s4903_s14, %s3653_s0  ;;  %p3657_p8 = scmp.lt.u32.totalorder %s3653_s0, %s4903_s14 }
 0x84a   :  { %p3659_p9 = pnand %p3657_p8, %p3654_p7 }
 0x84c   :  { %3662 = shalt.err (!%p3659_p9)
}
 0x84d   :  { %2367 = dma.vmem_to_hbm [thread:$0]  %s2365_s23, 128, %s4903_s14, [#allocation9]  }
 0x84e   :  { %s3703_s17 = smov [#allocation7]  }
 0x84f   :  { %s2354_s18 = sshll.u32 %s3703_s17, 4  ;;  %s2355_s18 = int_to_ptr.vmem [resolvable:$true] %s2354_s18 }
 0x850   :  { %s3663_s19 = scalar_lea.vmem %s2355_s18, 128  ;;  %p3668_p11 = scmp.lt.s32.totalorder %s2355_s18, %s2355_s18 }
 0x851   :  { %p3664_p10 = scmp.ne.s32.totalorder %s2355_s18, %s3663_s19  ;;  %p3669_p12 = scmp.lt.s32.totalorder %s3663_s19, %s3663_s19 }
 0x853   :  { %p3670_p13 = por %p3669_p12, %p3668_p11 }
 0x855   :  { %p3671_p0 = pnand %p3670_p13, %p3664_p10 }
 0x8d2   :  { %v2343_v12 = vpop.xlane.xlu1 %2342 }
 0x8d3   :  { %3595 = vrcp.f32 %v2343_v12 }
 0x8dd   :  { %v3596_v40 = vpop.eup %3595 }
 0x8de   :  { %v2345_v13 = vmul.f32 %v3596_v40, %v3594_v11 }
 0x8e0   :  { %2346 = vst [vmem:[#allocation7] sm:$0xff] %v2345_v13 }
 0x8e1   :  { %3674 = shalt.err (!%p3671_p0)
}
 0x8e2   :  { %s3675_s21 = scalar_lea.hbm %s4902_s13, 128 }
 0x8e3   :  { %p3676_p1 = scmp.ne.s32.totalorder %s4902_s13, %s3675_s21  ;;  %p3679_p2 = scmp.lt.u32.totalorder %s3675_s21, %s4902_s13 }
 0x8e5   :  { %p3681_p3 = pnand %p3679_p2, %p3676_p1 }
 0x8e7   :  { %3684 = shalt.err (!%p3681_p3)
}
 0x8e8   :  { %2357 = dma.vmem_to_hbm [thread:$0]  %s2355_s18, 128, %s4902_s13, [#allocation4]  }
 0x8e9   :  { %3689 = dma.done.wait [#allocation4], 128  }
 0x8ea   :  { %3690 = vsyncadd [#allocation4], 4294967168 }
 0x8eb   :  { %3691 = dma.done.wait [#allocation9], 128  }
 0x8ec   :  { %3692 = vsyncadd [#allocation9], 4294967168 }
 0x8ed   :  { %2374 = vsyncpa [#allocation3], 1 }
 0x8ee   :  { %2375 = vsyncpa [#allocation6], 1 }
 0x8ef   :  { %2376 = vsyncpa [#allocation4], 1 }
 0x8f0   :  { %2377 = vsyncpa [#allocation9], 1 }

</bundles_post_ra>
